<compile_context>
chip_gen: v7x
topology: tpu7x:2x2x1
jax: 0.10.0
libtpu: 0.0.40
codegen_flags: <defaults>
</compile_context>

<pallas_src>
import functools

import jax
import jax.numpy as jnp
from jax import lax
from jax.experimental import pallas as pl
from jax.experimental.pallas import tpu as pltpu

LANE = 128


def _round_up(x, m):
    return (x + m - 1) // m * m


def _pad_axis(a, axis, target):
    if a.shape[axis] == target:
        return a
    pad = [(0, 0)] * a.ndim
    pad[axis] = (0, target - a.shape[axis])
    return jnp.pad(a, pad)


def _sigmoid(z):
    # tanh-based sigmoid: numerically stable, lands on the EUP slot.
    return 0.5 * (jnp.tanh(0.5 * z) + 1.0)


# ---------------------------------------------------------------------------
# Generation-aware sizing.
# ---------------------------------------------------------------------------
def _vmem_budget():
    cap = 64 * 1024 * 1024            # conservative default (v7x-class)
    try:
        cap = int(pltpu.get_tpu_info().vmem_capacity_bytes)
    except Exception:
        pass
    if cap <= 64 * 1024 * 1024:       # v7x: 64 MiB physical per TC
        return 22 * 1024 * 1024, 40 * 1024 * 1024
    return 56 * 1024 * 1024, 96 * 1024 * 1024   # v5e / v6e: 128 MiB physical


def _pick_band(h, w, cs, cp, target_bytes):
    """Largest even row-band TH dividing h whose conv-block working set fits."""
    def footprint(th):
        planes = 3 * (th + 6) * w * (cs + cp) * 2      # x / x_l / x_r (bf16)
        h1 = 3 * (th + 4) * w * cp * 2                 # conv1 act + masked copies
        acc = 2 * (th + 2) * w * cp * 4                # f32 acc scratch + dot temp
        io = 2 * (th + 4) * w * (cs + cp) * 2 + 2 * th * w * cp * 2
        wts = 2 * 9 * (cs + 2 * cp) * cp * 2
        return planes + h1 + acc + io + wts
    best = None
    for d in range(2, h + 1, 2):
        if h % d == 0 and footprint(d) <= target_bytes:
            best = d
    if best is None:
        best = 2 if h % 2 == 0 else h
    return best


def _pick_up_rows(h1, w1):
    """Largest divisor of H1 keeping the upsample MXU M dimension <= 2048."""
    best = 1
    for d in range(1, h1 + 1):
        if h1 % d == 0 and d * w1 <= 2048:
            best = d
    return best


# ---------------------------------------------------------------------------
# Kernel 1: ConvTranspose2d(kernel=2, stride=2), 2x2 scatter fused into the
# output layout (B, H1, 2, W1, 2*Cp) -> free reshape to (B, 2H1, 2W1, Cp).
# Blocks TM input rows per step so the MXU M dimension is TM*W1.
# ---------------------------------------------------------------------------
def upsample_kernel(x_ref, w_ref, b_ref, o_ref):
    tm, w1, cin = x_ref.shape[1], x_ref.shape[2], x_ref.shape[3]
    n2 = w_ref.shape[-1]
    x = x_ref[0].reshape(tm * w1, cin)                       # (TM*W1, Cin) bf16
    rows = []
    for dy in range(2):
        z = jnp.dot(x, w_ref[dy], preferred_element_type=jnp.float32)
        z = z + b_ref[...]
        rows.append(z.reshape(tm, 1, w1, n2))
    o_ref[0] = jnp.concatenate(rows, axis=1).astype(o_ref.dtype)


def conv_transpose_2x2(x1, w_packed, b_packed, cp, vmem_limit):
    b, h1, w1, cin = x1.shape
    tm = _pick_up_rows(h1, w1)
    flops = 2 * b * h1 * w1 * cin * 4 * cp
    bytes_acc = b * h1 * w1 * (cin * 2 + 4 * cp * 2)
    out = pl.pallas_call(
        upsample_kernel,
        out_shape=jax.ShapeDtypeStruct((b, h1, 2, w1, 2 * cp), jnp.bfloat16),
        grid=(b, h1 // tm),
        in_specs=[
            pl.BlockSpec((1, tm, w1, cin), lambda i, m: (i, m, 0, 0)),
            pl.BlockSpec((2, cin, 2 * cp), lambda i, m: (0, 0, 0)),
            pl.BlockSpec((1, 2 * cp), lambda i, m: (0, 0)),
        ],
        out_specs=pl.BlockSpec((1, tm, 2, w1, 2 * cp),
                               lambda i, m: (i, m, 0, 0, 0)),
        compiler_params=pltpu.CompilerParams(
            dimension_semantics=("parallel", "parallel"),
            vmem_limit_bytes=vmem_limit),
        cost_estimate=pl.CostEstimate(flops=flops, transcendentals=0,
                                      bytes_accessed=bytes_acc),
    )(x1, w_packed, b_packed)
    # (B, H1, 2, W1, 2, Cp) -> (B, 2H1, 2W1, Cp): row-major => free reshape.
    return out.reshape(b, 2 * h1, 2 * w1, cp)


# ---------------------------------------------------------------------------
# Kernel 2: row-banded double conv (conv3x3+BN+ReLU x2).  Each grid step gets a
# TH-row band of both input planes plus 2-row halos (separate BlockSpecs on the
# same arrays).  The channel concat is fused into conv1 (two weight blocks).
# Per-batch channel sums for the cSE pool are accumulated across bands.
# ---------------------------------------------------------------------------
def convblock_kernel(xs_ref, xst_ref, xsb_ref, xu_ref, xut_ref, xub_ref,
                     w1s_ref, w1u_ref, s1_ref, b1_ref,
                     w2_ref, s2_ref, b2_ref,
                     y_ref, pool_ref, acc_ref, *, TH, W):
    band = pl.program_id(1)
    is_first = band == 0
    is_last = band == pl.num_programs(1) - 1
    cp = y_ref.shape[-1]
    HW = TH * W
    HW1 = (TH + 2) * W

    wcol = lax.broadcasted_iota(jnp.int32, (1, W, 1), 1)

    def masked_trio(x3):
        # dx==0 taps wrap reads onto input col W-1 -> zero there (left-masked);
        # dx==2 taps wrap reads onto input col 0   -> zero there (right-masked).
        r, c = x3.shape[0], x3.shape[-1]
        xl = jnp.where(wcol == W - 1, jnp.zeros_like(x3), x3)
        xr = jnp.where(wcol == 0, jnp.zeros_like(x3), x3)
        return (x3.reshape(r * W, c), xl.reshape(r * W, c), xr.reshape(r * W, c))

    def gather_plane(band_ref, top_ref, bot_ref):
        c = band_ref.shape[-1]
        zero1 = jnp.zeros((1, W, c), band_ref.dtype)
        zero2 = jnp.zeros((2, W, c), band_ref.dtype)
        top = jnp.where(is_first, zero2, top_ref[0])
        bot = jnp.where(is_last, zero2, bot_ref[0])
        # rows: 1 pad, 2 halo, TH band, 2 halo, 1 pad  => TH + 6 rows
        return masked_trio(
            jnp.concatenate([zero1, top, band_ref[0], bot, zero1], axis=0))

    xs3 = gather_plane(xs_ref, xst_ref, xsb_ref)
    xu3 = gather_plane(xu_ref, xut_ref, xub_ref)

    # ---- conv1 over TH+2 rows (band + one conv1 row each side for conv2) ----
    for k in range(9):
        dy, dx = divmod(k, 3)
        off = (dy + 1) * W + dx - 1
        pick = (1, 0, 2)[dx]                       # 0:left-mask, 1:plain, 2:right
        a = xs3[pick][off:off + HW1]
        u = xu3[pick][off:off + HW1]
        d = jnp.dot(a, w1s_ref[k], preferred_element_type=jnp.float32)
        d = d + jnp.dot(u, w1u_ref[k], preferred_element_type=jnp.float32)
        if k == 0:
            acc_ref[...] = d
        else:
            acc_ref[...] += d

    y1 = jnp.maximum(acc_ref[...] * s1_ref[...] + b1_ref[...], 0.0)

    # At the image top/bottom the extra conv1 row must be the *zero* pad row
    # that conv2 sees in PyTorch, not conv1 applied to a zero-padded input.
    row = lax.broadcasted_iota(jnp.int32, (HW1, 1), 0)
    kill = jnp.logical_or(jnp.logical_and(is_first, row < W),
                          jnp.logical_and(is_last, row >= (TH + 1) * W))
    y1 = jnp.where(kill, 0.0, y1).astype(jnp.bfloat16)

    zrow = jnp.zeros((W, cp), jnp.bfloat16)
    h1 = jnp.concatenate([zrow, y1, zrow], axis=0).reshape(TH + 4, W, cp)
    h13 = masked_trio(h1)

    # ---- conv2 over the TH-row band ----
    for k in range(9):
        dy, dx = divmod(k, 3)
        off = (dy + 1) * W + dx - 1
        pick = (1, 0, 2)[dx]
        a = h13[pick][off:off + HW]
        d = jnp.dot(a, w2_ref[k], preferred_element_type=jnp.float32)
        if k == 0:
            acc_ref[pl.ds(0, HW), :] = d
        else:
            acc_ref[pl.ds(0, HW), :] += d

    y2 = jnp.maximum(acc_ref[pl.ds(0, HW), :] * s2_ref[...] + b2_ref[...], 0.0)
    y_ref[0] = y2.reshape(TH, W, cp).astype(y_ref.dtype)

    # Partial global-average-pool sums for the cSE gate (finished outside).
    @pl.when(is_first)
    def _():
        pool_ref[0] = jnp.zeros_like(pool_ref[0])
    pool_ref[0] += jnp.sum(y2, axis=0, keepdims=True)


def conv_bn_relu_x2(xs, xu, prep, H, W, TH, vmem_limit):
    b = xs.shape[0]
    cs, cp = xs.shape[-1], prep["cp"]
    nb = H // TH
    hb = TH // 2

    band = lambda c: pl.BlockSpec((1, TH, W, c), lambda i, t: (i, t, 0, 0))
    top = lambda c: pl.BlockSpec(
        (1, 2, W, c), lambda i, t: (i, jnp.maximum(t * hb - 1, 0), 0, 0))
    bot = lambda c: pl.BlockSpec(
        (1, 2, W, c), lambda i, t: (i, jnp.minimum((t + 1) * hb, H // 2 - 1), 0, 0))
    wfull3 = lambda i, t: (0, 0, 0)
    wfull2 = lambda i, t: (0, 0)

    flops = 2 * 9 * b * H * W * ((cs + cp) * cp + cp * cp)
    bytes_acc = b * H * W * (cs + cp) * 2 + b * H * W * cp * 2

    kernel = functools.partial(convblock_kernel, TH=TH, W=W)
    return pl.pallas_call(
        kernel,
        out_shape=(jax.ShapeDtypeStruct((b, H, W, cp), jnp.bfloat16),
                   jax.ShapeDtypeStruct((b, 1, cp), jnp.float32)),
        grid=(b, nb),
        in_specs=[band(cs), top(cs), bot(cs),
                  band(cp), top(cp), bot(cp),
                  pl.BlockSpec((9, cs, cp), wfull3),
                  pl.BlockSpec((9, cp, cp), wfull3),
                  pl.BlockSpec((1, cp), wfull2),
                  pl.BlockSpec((1, cp), wfull2),
                  pl.BlockSpec((9, cp, cp), wfull3),
                  pl.BlockSpec((1, cp), wfull2),
                  pl.BlockSpec((1, cp), wfull2)],
        out_specs=(pl.BlockSpec((1, TH, W, cp), lambda i, t: (i, t, 0, 0)),
                   pl.BlockSpec((1, 1, cp), lambda i, t: (i, 0, 0))),
        scratch_shapes=[pltpu.VMEM(((TH + 2) * W, cp), jnp.float32)],
        compiler_params=pltpu.CompilerParams(
            dimension_semantics=("parallel", "arbitrary"),
            vmem_limit_bytes=vmem_limit),
        cost_estimate=pl.CostEstimate(flops=flops, transcendentals=0,
                                      bytes_accessed=bytes_acc),
    )(xs, xs, xs, xu, xu, xu,
      prep["w1s"], prep["w1u"], prep["s1"], prep["b1"],
      prep["w2"], prep["s2"], prep["b2"])


# ---------------------------------------------------------------------------
# Kernel 3: apply scSE gates: out = y2 * (cSE + sigmoid(y2 . ws + bs)).
# Pure VPU/EUP work; channel reduction on the XLU, sSE bias read from SMEM.
# ---------------------------------------------------------------------------
def scse_kernel(y_ref, cse_ref, ws_ref, bs_ref, o_ref):
    y = y_ref[0].astype(jnp.float32)                            # (TH, W, cp)
    sse = _sigmoid(jnp.sum(y * ws_ref[...], axis=-1, keepdims=True)
                   + bs_ref[0, 0])                              # (TH, W, 1)
    o_ref[0] = (y * (cse_ref[0] + sse)).astype(o_ref.dtype)


def apply_scse(y2, cse, prep, H, W, TH, vmem_limit):
    b, _, _, cp = y2.shape
    nb = H // TH
    return pl.pallas_call(
        scse_kernel,
        out_shape=jax.ShapeDtypeStruct((b, H, W, cp), jnp.float32),
        grid=(b, nb),
        in_specs=[pl.BlockSpec((1, TH, W, cp), lambda i, t: (i, t, 0, 0)),
                  pl.BlockSpec((1, 1, cp), lambda i, t: (i, 0, 0)),
                  pl.BlockSpec((1, cp), lambda i, t: (0, 0)),
                  pl.BlockSpec(memory_space=pltpu.MemorySpace.SMEM)],
        out_specs=pl.BlockSpec((1, TH, W, cp), lambda i, t: (i, t, 0, 0)),
        compiler_params=pltpu.CompilerParams(
            dimension_semantics=("parallel", "parallel"),
            vmem_limit_bytes=vmem_limit),
        cost_estimate=pl.CostEstimate(flops=5 * b * H * W * cp,
                                      transcendentals=2 * b * H * W,
                                      bytes_accessed=b * H * W * cp * 6),
    )(y2, cse, prep["ws"], prep["bs"])


# ---------------------------------------------------------------------------
# Plain-JAX glue: weight repacking / padding, F.pad semantics, layout plumbing.
# ---------------------------------------------------------------------------
def prepare_params(p, eps=1e-5):
    up_w, up_b = p["up_w"], p["up_b"]
    cin_up, cout = up_w.shape[0], up_w.shape[1]
    cp = _round_up(max(cout, LANE), LANE)
    if cout > LANE:                       # 256-wide MXU on v6e/v7x
        cp = _round_up(cp, 2 * LANE)

    # ConvTranspose2d weight (Cin, Cout, 2, 2) -> (dy, Cin, dx*cp + c), bf16.
    w_up = jnp.transpose(up_w, (2, 0, 3, 1))               # (dy, cin, dx, cout)
    w_up = _pad_axis(w_up, 3, cp).reshape(2, cin_up, 2 * cp).astype(jnp.bfloat16)
    b_up = jnp.tile(_pad_axis(up_b, 0, cp), 2).reshape(1, 2 * cp).astype(jnp.float32)

    # conv1 split: torch.cat([x2, up], dim=1) => skip channels first.
    c1_w = p["c1_w"]
    skip = c1_w.shape[1] - cout
    w1s = jnp.transpose(c1_w[:, :skip], (2, 3, 1, 0)).reshape(9, skip, cout)
    w1s = _pad_axis(w1s, 2, cp).astype(jnp.bfloat16)
    w1u = jnp.transpose(c1_w[:, skip:], (2, 3, 1, 0)).reshape(9, cout, cout)
    w1u = _pad_axis(_pad_axis(w1u, 1, cp), 2, cp).astype(jnp.bfloat16)
    sc1 = p["bn1_g"] / jnp.sqrt(p["bn1_v"] + eps)
    sh1 = (p["c1_b"] - p["bn1_m"]) * sc1 + p["bn1_b"]

    w2 = jnp.transpose(p["c2_w"], (2, 3, 1, 0)).reshape(9, cout, cout)
    w2 = _pad_axis(_pad_axis(w2, 1, cp), 2, cp).astype(jnp.bfloat16)
    sc2 = p["bn2_g"] / jnp.sqrt(p["bn2_v"] + eps)
    sh2 = (p["c2_b"] - p["bn2_m"]) * sc2 + p["bn2_b"]

    return {
        "cp": cp, "cout": cout,
        "w_up": w_up, "b_up": b_up,
        "w1s": w1s, "w1u": w1u,
        "s1": _pad_axis(sc1, 0, cp).reshape(1, cp).astype(jnp.float32),
        "b1": _pad_axis(sh1, 0, cp).reshape(1, cp).astype(jnp.float32),
        "w2": w2,
        "s2": _pad_axis(sc2, 0, cp).reshape(1, cp).astype(jnp.float32),
        "b2": _pad_axis(sh2, 0, cp).reshape(1, cp).astype(jnp.float32),
        "fc1": p["fc1_w"], "fc2": p["fc2_w"],
        "ws": _pad_axis(p["sse_w"][:, 0], 0, cp).reshape(1, cp).astype(jnp.float32),
        "bs": p["sse_b"].reshape(1, 1).astype(jnp.float32),
    }


def _pad_or_crop_hw(a, th, tw):
    """torch F.pad semantics on H (axis 1) / W (axis 2), incl. negative = crop."""
    def adjust(x, axis, d):
        if d == 0:
            return x
        lo, hi = d // 2, d - d // 2
        if d > 0:
            pad = [(0, 0)] * x.ndim
            pad[axis] = (lo, hi)
            return jnp.pad(x, pad)
        return lax.slice_in_dim(x, -lo, x.shape[axis] + hi, axis=axis)
    a = adjust(a, 1, th - a.shape[1])
    a = adjust(a, 2, tw - a.shape[2])
    return a


def upblock_forward(params, x1_nchw, x2_nchw):
    prep = prepare_params(params)
    cp, cout = prep["cp"], prep["cout"]
    target, vlim = _vmem_budget()

    x1 = jnp.transpose(x1_nchw, (0, 2, 3, 1)).astype(jnp.bfloat16)
    x2 = jnp.transpose(x2_nchw, (0, 2, 3, 1)).astype(jnp.bfloat16)

    # ConvTranspose2d(up_in, out_ch, 2, stride=2); 2x2 scatter fused in-kernel.
    up = conv_transpose_2x2(x1, prep["w_up"], prep["b_up"], cp, vlim)

    # F.pad / crop to the skip connection's spatial size (no-op when equal).
    b, hs, ws_, cs = x2.shape
    up = _pad_or_crop_hw(up, hs, ws_)

    # Row-banded double conv; skip-channel count cs stays unpadded (kernel is
    # lane-efficient when cs >= 128 in real configs).
    th = _pick_band(hs, ws_, cs, cp, target)
    y2, pool = conv_bn_relu_x2(x2, up, prep, hs, ws_, th, vlim)

    # cSE gate (tiny): global mean -> FC -> ReLU -> FC -> sigmoid, in XLA.
    mean = pool[:, 0, :cout] / float(hs * ws_)
    hid = jnp.maximum(mean @ prep["fc1"], 0.0)
    cse = jax.nn.sigmoid(hid @ prep["fc2"])
    cse = _pad_axis(cse, 1, cp).reshape(b, 1, cp).astype(jnp.float32)

    out = apply_scse(y2, cse, prep, hs, ws_, th, vlim)     # (B, H, W, cp) f32
    out = out[..., :cout]                                  # drop channel pad
    return jnp.transpose(out, (0, 3, 1, 2))                # back to NCHW


def init_params(key, up_in, skip_in, out_ch, reduction=16):
    ks = jax.random.split(key, 10)
    cin1 = out_ch + skip_in
    cr = max(out_ch // reduction, 1)
    p = {
        "up_w": 0.1 * jax.random.normal(ks[0], (up_in, out_ch, 2, 2), jnp.float32),
        "up_b": 0.1 * jax.random.normal(ks[1], (out_ch,), jnp.float32),
        "c1_w": 0.1 * jax.random.normal(ks[2], (out_ch, cin1, 3, 3), jnp.float32),
        "c1_b": 0.1 * jax.random.normal(ks[3], (out_ch,), jnp.float32),
        "bn1_g": 1.0 + 0.1 * jax.random.normal(ks[4], (out_ch,), jnp.float32),
        "bn1_b": 0.1 * jax.random.normal(ks[5], (out_ch,), jnp.float32),
        "bn1_m": jnp.zeros((out_ch,), jnp.float32),
        "bn1_v": jnp.ones((out_ch,), jnp.float32),
        "c2_w": 0.1 * jax.random.normal(ks[6], (out_ch, out_ch, 3, 3), jnp.float32),
        "c2_b": 0.1 * jax.random.normal(ks[7], (out_ch,), jnp.float32),
        "bn2_g": 1.0 + 0.1 * jax.random.normal(ks[8], (out_ch,), jnp.float32),
        "bn2_b": 0.1 * jax.random.normal(ks[9], (out_ch,), jnp.float32),
        "bn2_m": jnp.zeros((out_ch,), jnp.float32),
        "bn2_v": jnp.ones((out_ch,), jnp.float32),
    }
    ks2 = jax.random.split(jax.random.fold_in(key, 7), 4)
    p["fc1_w"] = 0.3 * jax.random.normal(ks2[0], (out_ch, cr), jnp.float32)
    p["fc2_w"] = 0.3 * jax.random.normal(ks2[1], (cr, out_ch), jnp.float32)
    p["sse_w"] = 0.3 * jax.random.normal(ks2[2], (out_ch, 1), jnp.float32)
    p["sse_b"] = 0.1 * jax.random.normal(ks2[3], (1,), jnp.float32)
    return p


if __name__ == "__main__":
    B, up_in, skip_in, out_ch = 2, 8, 8, 16
    H1 = W1 = 8                        # x1 spatial; x2 is 2x larger (16x16)

    key = jax.random.PRNGKey(0)
    k_p, k_x1, k_x2 = jax.random.split(key, 3)
    params = init_params(k_p, up_in, skip_in, out_ch)

    x1 = jax.random.normal(k_x1, (B, up_in, H1, W1), jnp.float32)            # NCHW
    x2 = jax.random.normal(k_x2, (B, skip_in, 2 * H1, 2 * W1), jnp.float32)  # NCHW

    fwd = jax.jit(upblock_forward)
    out = jax.block_until_ready(fwd(params, x1, x2))
    assert out.shape == (B, out_ch, 2 * H1, 2 * W1), out.shape
    assert bool(jnp.all(jnp.isfinite(out)))
    print("KERNEL_OK")
</pallas_src>

<mosaic_0001>
module attributes {stable_mosaic.version = 11 : i64} {
  func.func @upsample_kernel(%arg0: i32, %arg1: i32, %arg2: memref<1x8x8x8xbf16, #tpu.memory_space<vmem>>, %arg3: memref<2x8x256xbf16, #tpu.memory_space<vmem>>, %arg4: memref<1x256xf32, #tpu.memory_space<vmem>>, %arg5: memref<1x8x2x8x256xbf16, #tpu.memory_space<vmem>>) attributes {dimension_semantics = [#tpu.dimension_semantics<parallel>, #tpu.dimension_semantics<parallel>], iteration_bounds = array<i64: 2, 1>, scalar_prefetch = 0 : i64, scratch_operands = 0 : i64, tpu.core_type = #tpu.core_type<tc>, window_params = [{transform_indices = @transform_0, window_bounds = array<i64: 1, 8, 8, 8>}, {pipeline_mode = #tpu.pipeline_mode<synchronous>, transform_indices = @transform_1, window_bounds = array<i64: 2, 8, 256>}, {pipeline_mode = #tpu.pipeline_mode<synchronous>, transform_indices = @transform_2, window_bounds = array<i64: 1, 256>}, {transform_indices = @transform_3, window_bounds = array<i64: 1, 8, 2, 8, 256>}]} {
    %c0 = arith.constant 0 : index
    %c0_0 = arith.constant 0 : index
    %c0_1 = arith.constant 0 : index
    %c0_2 = arith.constant 0 : index
    %0 = vector.load %arg2[%c0, %c0_0, %c0_1, %c0_2] : memref<1x8x8x8xbf16, #tpu.memory_space<vmem>>, vector<1x8x8x8xbf16>
    %1 = vector.shape_cast %0 : vector<1x8x8x8xbf16> to vector<8x8x8xbf16>
    %2 = vector.shape_cast %1 : vector<8x8x8xbf16> to vector<64x8xbf16>
    %c0_3 = arith.constant 0 : index
    %c0_4 = arith.constant 0 : index
    %c0_5 = arith.constant 0 : index
    %3 = vector.load %arg3[%c0_3, %c0_4, %c0_5] : memref<2x8x256xbf16, #tpu.memory_space<vmem>>, vector<1x8x256xbf16>
    %4 = vector.shape_cast %3 : vector<1x8x256xbf16> to vector<8x256xbf16>
    %cst = arith.constant dense<0.000000e+00> : vector<64x256xf32>
    %5 = tpu.matmul %2, %4, %cst {dimension_numbers = #tpu.dot_dimension_numbers<[1], [0], [0], [1], [0, 0, 1, 1], [], []>} : vector<64x8xbf16>, vector<8x256xbf16>, vector<64x256xf32> -> vector<64x256xf32>
    %c0_6 = arith.constant 0 : index
    %c0_7 = arith.constant 0 : index
    %6 = vector.load %arg4[%c0_6, %c0_7] : memref<1x256xf32, #tpu.memory_space<vmem>>, vector<1x256xf32>
    %7 = vector.broadcast %6 : vector<1x256xf32> to vector<64x256xf32>
    %8 = arith.addf %5, %7 : vector<64x256xf32>
    %9 = vector.shape_cast %8 : vector<64x256xf32> to vector<8x1x8x256xf32>
    %c1 = arith.constant 1 : index
    %c0_8 = arith.constant 0 : index
    %c0_9 = arith.constant 0 : index
    %10 = vector.load %arg3[%c1, %c0_8, %c0_9] : memref<2x8x256xbf16, #tpu.memory_space<vmem>>, vector<1x8x256xbf16>
    %11 = vector.shape_cast %10 : vector<1x8x256xbf16> to vector<8x256xbf16>
    %cst_10 = arith.constant dense<0.000000e+00> : vector<64x256xf32>
    %12 = tpu.matmul %2, %11, %cst_10 {dimension_numbers = #tpu.dot_dimension_numbers<[1], [0], [0], [1], [0, 0, 1, 1], [], []>} : vector<64x8xbf16>, vector<8x256xbf16>, vector<64x256xf32> -> vector<64x256xf32>
    %c0_11 = arith.constant 0 : index
    %c0_12 = arith.constant 0 : index
    %13 = vector.load %arg4[%c0_11, %c0_12] : memref<1x256xf32, #tpu.memory_space<vmem>>, vector<1x256xf32>
    %14 = vector.broadcast %13 : vector<1x256xf32> to vector<64x256xf32>
    %15 = arith.addf %12, %14 : vector<64x256xf32>
    %16 = vector.shape_cast %15 : vector<64x256xf32> to vector<8x1x8x256xf32>
    %17 = tpu.concatenate %9, %16 in 1 : vector<8x1x8x256xf32>, vector<8x1x8x256xf32> -> vector<8x2x8x256xf32>
    %18 = arith.truncf %17 : vector<8x2x8x256xf32> to vector<8x2x8x256xbf16>
    %c0_13 = arith.constant 0 : index
    %c0_14 = arith.constant 0 : index
    %c0_15 = arith.constant 0 : index
    %c0_16 = arith.constant 0 : index
    %c0_17 = arith.constant 0 : index
    %19 = vector.load %arg5[%c0_13, %c0_14, %c0_15, %c0_16, %c0_17] : memref<1x8x2x8x256xbf16, #tpu.memory_space<vmem>>, vector<1x8x2x8x256xbf16>
    %20 = vector.shape_cast %19 : vector<1x8x2x8x256xbf16> to vector<8x2x8x256xbf16>
    %21 = vector.shape_cast %18 : vector<8x2x8x256xbf16> to vector<1x8x2x8x256xbf16>
    tpu.vector_store %arg5[%c0_13, %c0_14, %c0_15, %c0_16, %c0_17], %21 {strides = array<i32>} : memref<1x8x2x8x256xbf16, #tpu.memory_space<vmem>>, vector<1x8x2x8x256xbf16>,
    return
  }
  func.func @transform_0(%arg0: i32, %arg1: i32) -> (i32, i32, i32, i32) {
    %c0_i32 = arith.constant 0 : i32
    %c0_i32_0 = arith.constant 0 : i32
    %c0_i32_1 = arith.constant 0 : i32
    return %arg0, %arg1, %c0_i32, %c0_i32_0 : i32, i32, i32, i32
  }
  func.func @transform_1(%arg0: i32, %arg1: i32) -> (i32, i32, i32) {
    %c0_i32 = arith.constant 0 : i32
    %c0_i32_0 = arith.constant 0 : i32
    %c0_i32_1 = arith.constant 0 : i32
    %c0_i32_2 = arith.constant 0 : i32
    return %c0_i32, %c0_i32_0, %c0_i32_1 : i32, i32, i32
  }
  func.func @transform_2(%arg0: i32, %arg1: i32) -> (i32, i32) {
    %c0_i32 = arith.constant 0 : i32
    %c0_i32_0 = arith.constant 0 : i32
    %c0_i32_1 = arith.constant 0 : i32
    return %c0_i32, %c0_i32_0 : i32, i32
  }
  func.func @transform_3(%arg0: i32, %arg1: i32) -> (i32, i32, i32, i32, i32) {
    %c0_i32 = arith.constant 0 : i32
    %c0_i32_0 = arith.constant 0 : i32
    %c0_i32_1 = arith.constant 0 : i32
    %c0_i32_2 = arith.constant 0 : i32
    return %arg0, %arg1, %c0_i32, %c0_i32_0, %c0_i32_1 : i32, i32, i32, i32, i32
  }
}

module attributes {stable_mosaic.version = 11 : i64} {
  func.func @convblock_kernel(%arg0: i32, %arg1: i32, %arg2: memref<1x16x16x8xbf16, #tpu.memory_space<vmem>>, %arg3: memref<1x2x16x8xbf16, #tpu.memory_space<vmem>>, %arg4: memref<1x2x16x8xbf16, #tpu.memory_space<vmem>>, %arg5: memref<1x16x16x128xbf16, #tpu.memory_space<vmem>>, %arg6: memref<1x2x16x128xbf16, #tpu.memory_space<vmem>>, %arg7: memref<1x2x16x128xbf16, #tpu.memory_space<vmem>>, %arg8: memref<9x8x128xbf16, #tpu.memory_space<vmem>>, %arg9: memref<9x128x128xbf16, #tpu.memory_space<vmem>>, %arg10: memref<1x128xf32, #tpu.memory_space<vmem>>, %arg11: memref<1x128xf32, #tpu.memory_space<vmem>>, %arg12: memref<9x128x128xbf16, #tpu.memory_space<vmem>>, %arg13: memref<1x128xf32, #tpu.memory_space<vmem>>, %arg14: memref<1x128xf32, #tpu.memory_space<vmem>>, %arg15: memref<1x16x16x128xbf16, #tpu.memory_space<vmem>>, %arg16: memref<1x1x128xf32, #tpu.memory_space<vmem>>, %arg17: memref<288x128xf32, #tpu.memory_space<vmem>>) attributes {dimension_semantics = [#tpu.dimension_semantics<parallel>, #tpu.dimension_semantics<arbitrary>], iteration_bounds = array<i64: 2, 1>, scalar_prefetch = 0 : i64, scratch_operands = 1 : i64, tpu.core_type = #tpu.core_type<tc>, window_params = [{transform_indices = @transform_0, window_bounds = array<i64: 1, 16, 16, 8>}, {transform_indices = @transform_1, window_bounds = array<i64: 1, 2, 16, 8>}, {transform_indices = @transform_2, window_bounds = array<i64: 1, 2, 16, 8>}, {transform_indices = @transform_3, window_bounds = array<i64: 1, 16, 16, 128>}, {transform_indices = @transform_4, window_bounds = array<i64: 1, 2, 16, 128>}, {transform_indices = @transform_5, window_bounds = array<i64: 1, 2, 16, 128>}, {pipeline_mode = #tpu.pipeline_mode<synchronous>, transform_indices = @transform_6, window_bounds = array<i64: 9, 8, 128>}, {pipeline_mode = #tpu.pipeline_mode<synchronous>, transform_indices = @transform_7, window_bounds = array<i64: 9, 128, 128>}, {pipeline_mode = #tpu.pipeline_mode<synchronous>, transform_indices = @transform_8, window_bounds = array<i64: 1, 128>}, {pipeline_mode = #tpu.pipeline_mode<synchronous>, transform_indices = @transform_9, window_bounds = array<i64: 1, 128>}, {pipeline_mode = #tpu.pipeline_mode<synchronous>, transform_indices = @transform_10, window_bounds = array<i64: 9, 128, 128>}, {pipeline_mode = #tpu.pipeline_mode<synchronous>, transform_indices = @transform_11, window_bounds = array<i64: 1, 128>}, {pipeline_mode = #tpu.pipeline_mode<synchronous>, transform_indices = @transform_12, window_bounds = array<i64: 1, 128>}, {transform_indices = @transform_13, window_bounds = array<i64: 1, 16, 16, 128>}, {transform_indices = @transform_14, window_bounds = array<i64: 1, 1, 128>}]} {
    %c0_i32 = arith.constant 0 : i32
    %0 = arith.cmpi eq, %arg1, %c0_i32 : i32
    %c0_i32_0 = arith.constant 0 : i32
    %1 = arith.cmpi eq, %arg1, %c0_i32_0 : i32
    %2 = tpu.iota {dimensions = array<i32: 1>} : vector<1x16x1xi32>
    %cst = arith.constant 0.000000e+00 : bf16
    %3 = vector.broadcast %cst : bf16 to vector<1x16x8xbf16>
    %cst_1 = arith.constant 0.000000e+00 : bf16
    %4 = vector.broadcast %cst_1 : bf16 to vector<2x16x8xbf16>
    %c0 = arith.constant 0 : index
    %c0_2 = arith.constant 0 : index
    %c0_3 = arith.constant 0 : index
    %c0_4 = arith.constant 0 : index
    %5 = vector.load %arg3[%c0, %c0_2, %c0_3, %c0_4] : memref<1x2x16x8xbf16, #tpu.memory_space<vmem>>, vector<1x2x16x8xbf16>
    %6 = vector.shape_cast %5 : vector<1x2x16x8xbf16> to vector<2x16x8xbf16>
    %7 = arith.select %0, %4, %6 : vector<2x16x8xbf16>
    %c0_5 = arith.constant 0 : index
    %c0_6 = arith.constant 0 : index
    %c0_7 = arith.constant 0 : index
    %c0_8 = arith.constant 0 : index
    %8 = vector.load %arg4[%c0_5, %c0_6, %c0_7, %c0_8] : memref<1x2x16x8xbf16, #tpu.memory_space<vmem>>, vector<1x2x16x8xbf16>
    %9 = vector.shape_cast %8 : vector<1x2x16x8xbf16> to vector<2x16x8xbf16>
    %10 = arith.select %1, %4, %9 : vector<2x16x8xbf16>
    %c0_9 = arith.constant 0 : index
    %c0_10 = arith.constant 0 : index
    %c0_11 = arith.constant 0 : index
    %c0_12 = arith.constant 0 : index
    %11 = vector.load %arg2[%c0_9, %c0_10, %c0_11, %c0_12] : memref<1x16x16x8xbf16, #tpu.memory_space<vmem>>, vector<1x16x16x8xbf16>
    %12 = vector.shape_cast %11 : vector<1x16x16x8xbf16> to vector<16x16x8xbf16>
    %13 = tpu.concatenate %3, %7, %12, %10, %3 in 0 : vector<1x16x8xbf16>, vector<2x16x8xbf16>, vector<16x16x8xbf16>, vector<2x16x8xbf16>, vector<1x16x8xbf16> -> vector<22x16x8xbf16>
    %c15_i32 = arith.constant 15 : i32
    %14 = vector.broadcast %c15_i32 : i32 to vector<1x16x1xi32>
    %15 = arith.cmpi eq, %2, %14 : vector<1x16x1xi32>
    %cst_13 = arith.constant 0.000000e+00 : bf16
    %16 = vector.broadcast %cst_13 : bf16 to vector<22x16x8xbf16>
    %17 = vector.shape_cast %15 : vector<1x16x1xi1> to vector<1x16x1xi1>
    %18 = vector.broadcast %17 : vector<1x16x1xi1> to vector<22x16x8xi1>
    %19 = arith.select %18, %16, %13 : vector<22x16x8xi1>, vector<22x16x8xbf16>
    %c0_i32_14 = arith.constant 0 : i32
    %20 = vector.broadcast %c0_i32_14 : i32 to vector<1x16x1xi32>
    %21 = arith.cmpi eq, %2, %20 : vector<1x16x1xi32>
    %cst_15 = arith.constant 0.000000e+00 : bf16
    %22 = vector.broadcast %cst_15 : bf16 to vector<22x16x8xbf16>
    %23 = vector.shape_cast %21 : vector<1x16x1xi1> to vector<1x16x1xi1>
    %24 = vector.broadcast %23 : vector<1x16x1xi1> to vector<22x16x8xi1>
    %25 = arith.select %24, %22, %13 : vector<22x16x8xi1>, vector<22x16x8xbf16>
    %26 = vector.shape_cast %13 : vector<22x16x8xbf16> to vector<352x8xbf16>
    %27 = vector.shape_cast %19 : vector<22x16x8xbf16> to vector<352x8xbf16>
    %28 = vector.shape_cast %25 : vector<22x16x8xbf16> to vector<352x8xbf16>
    %cst_16 = arith.constant 0.000000e+00 : bf16
    %29 = vector.broadcast %cst_16 : bf16 to vector<1x16x128xbf16>
    %cst_17 = arith.constant 0.000000e+00 : bf16
    %30 = vector.broadcast %cst_17 : bf16 to vector<2x16x128xbf16>
    %c0_18 = arith.constant 0 : index
    %c0_19 = arith.constant 0 : index
    %c0_20 = arith.constant 0 : index
    %c0_21 = arith.constant 0 : index
    %31 = vector.load %arg6[%c0_18, %c0_19, %c0_20, %c0_21] : memref<1x2x16x128xbf16, #tpu.memory_space<vmem>>, vector<1x2x16x128xbf16>
    %32 = vector.shape_cast %31 : vector<1x2x16x128xbf16> to vector<2x16x128xbf16>
    %33 = arith.select %0, %30, %32 : vector<2x16x128xbf16>
    %c0_22 = arith.constant 0 : index
    %c0_23 = arith.constant 0 : index
    %c0_24 = arith.constant 0 : index
    %c0_25 = arith.constant 0 : index
    %34 = vector.load %arg7[%c0_22, %c0_23, %c0_24, %c0_25] : memref<1x2x16x128xbf16, #tpu.memory_space<vmem>>, vector<1x2x16x128xbf16>
    %35 = vector.shape_cast %34 : vector<1x2x16x128xbf16> to vector<2x16x128xbf16>
    %36 = arith.select %1, %30, %35 : vector<2x16x128xbf16>
    %c0_26 = arith.constant 0 : index
    %c0_27 = arith.constant 0 : index
    %c0_28 = arith.constant 0 : index
    %c0_29 = arith.constant 0 : index
    %37 = vector.load %arg5[%c0_26, %c0_27, %c0_28, %c0_29] : memref<1x16x16x128xbf16, #tpu.memory_space<vmem>>, vector<1x16x16x128xbf16>
    %38 = vector.shape_cast %37 : vector<1x16x16x128xbf16> to vector<16x16x128xbf16>
    %39 = tpu.concatenate %29, %33, %38, %36, %29 in 0 : vector<1x16x128xbf16>, vector<2x16x128xbf16>, vector<16x16x128xbf16>, vector<2x16x128xbf16>, vector<1x16x128xbf16> -> vector<22x16x128xbf16>
    %c15_i32_30 = arith.constant 15 : i32
    %40 = vector.broadcast %c15_i32_30 : i32 to vector<1x16x1xi32>
    %41 = arith.cmpi eq, %2, %40 : vector<1x16x1xi32>
    %cst_31 = arith.constant 0.000000e+00 : bf16
    %42 = vector.broadcast %cst_31 : bf16 to vector<22x16x128xbf16>
    %43 = vector.shape_cast %41 : vector<1x16x1xi1> to vector<1x16x1xi1>
    %44 = vector.broadcast %43 : vector<1x16x1xi1> to vector<22x16x128xi1>
    %45 = arith.select %44, %42, %39 : vector<22x16x128xi1>, vector<22x16x128xbf16>
    %c0_i32_32 = arith.constant 0 : i32
    %46 = vector.broadcast %c0_i32_32 : i32 to vector<1x16x1xi32>
    %47 = arith.cmpi eq, %2, %46 : vector<1x16x1xi32>
    %cst_33 = arith.constant 0.000000e+00 : bf16
    %48 = vector.broadcast %cst_33 : bf16 to vector<22x16x128xbf16>
    %49 = vector.shape_cast %47 : vector<1x16x1xi1> to vector<1x16x1xi1>
    %50 = vector.broadcast %49 : vector<1x16x1xi1> to vector<22x16x128xi1>
    %51 = arith.select %50, %48, %39 : vector<22x16x128xi1>, vector<22x16x128xbf16>
    %52 = vector.shape_cast %39 : vector<22x16x128xbf16> to vector<352x128xbf16>
    %53 = vector.shape_cast %45 : vector<22x16x128xbf16> to vector<352x128xbf16>
    %54 = vector.shape_cast %51 : vector<22x16x128xbf16> to vector<352x128xbf16>
    %55 = vector.extract_strided_slice %27 {offsets = [15, 0], sizes = [288, 8], strides = [1, 1]} : vector<352x8xbf16> to vector<288x8xbf16>
    %56 = vector.extract_strided_slice %53 {offsets = [15, 0], sizes = [288, 128], strides = [1, 1]} : vector<352x128xbf16> to vector<288x128xbf16>
    %c0_34 = arith.constant 0 : index
    %c0_35 = arith.constant 0 : index
    %c0_36 = arith.constant 0 : index
    %57 = vector.load %arg8[%c0_34, %c0_35, %c0_36] : memref<9x8x128xbf16, #tpu.memory_space<vmem>>, vector<1x8x128xbf16>
    %58 = vector.shape_cast %57 : vector<1x8x128xbf16> to vector<8x128xbf16>
    %cst_37 = arith.constant dense<0.000000e+00> : vector<288x128xf32>
    %59 = tpu.matmul %55, %58, %cst_37 {dimension_numbers = #tpu.dot_dimension_numbers<[1], [0], [0], [1], [0, 0, 1, 1], [], []>} : vector<288x8xbf16>, vector<8x128xbf16>, vector<288x128xf32> -> vector<288x128xf32>
    %c0_38 = arith.constant 0 : index
    %c0_39 = arith.constant 0 : index
    %c0_40 = arith.constant 0 : index
    %60 = vector.load %arg9[%c0_38, %c0_39, %c0_40] : memref<9x128x128xbf16, #tpu.memory_space<vmem>>, vector<1x128x128xbf16>
    %61 = vector.shape_cast %60 : vector<1x128x128xbf16> to vector<128x128xbf16>
    %cst_41 = arith.constant dense<0.000000e+00> : vector<288x128xf32>
    %62 = tpu.matmul %56, %61, %cst_41 {dimension_numbers = #tpu.dot_dimension_numbers<[1], [0], [0], [1], [0, 0, 1, 1], [], []>} : vector<288x128xbf16>, vector<128x128xbf16>, vector<288x128xf32> -> vector<288x128xf32>
    %63 = arith.addf %59, %62 : vector<288x128xf32>
    %c0_42 = arith.constant 0 : index
    %c0_43 = arith.constant 0 : index
    %64 = vector.load %arg17[%c0_42, %c0_43] : memref<288x128xf32, #tpu.memory_space<vmem>>, vector<288x128xf32>
    tpu.vector_store %arg17[%c0_42, %c0_43], %63 {strides = array<i32>} : memref<288x128xf32, #tpu.memory_space<vmem>>, vector<288x128xf32>,
    %65 = vector.extract_strided_slice %26 {offsets = [16, 0], sizes = [288, 8], strides = [1, 1]} : vector<352x8xbf16> to vector<288x8xbf16>
    %66 = vector.extract_strided_slice %52 {offsets = [16, 0], sizes = [288, 128], strides = [1, 1]} : vector<352x128xbf16> to vector<288x128xbf16>
    %c1 = arith.constant 1 : index
    %c0_44 = arith.constant 0 : index
    %c0_45 = arith.constant 0 : index
    %67 = vector.load %arg8[%c1, %c0_44, %c0_45] : memref<9x8x128xbf16, #tpu.memory_space<vmem>>, vector<1x8x128xbf16>
    %68 = vector.shape_cast %67 : vector<1x8x128xbf16> to vector<8x128xbf16>
    %cst_46 = arith.constant dense<0.000000e+00> : vector<288x128xf32>
    %69 = tpu.matmul %65, %68, %cst_46 {dimension_numbers = #tpu.dot_dimension_numbers<[1], [0], [0], [1], [0, 0, 1, 1], [], []>} : vector<288x8xbf16>, vector<8x128xbf16>, vector<288x128xf32> -> vector<288x128xf32>
    %c1_47 = arith.constant 1 : index
    %c0_48 = arith.constant 0 : index
    %c0_49 = arith.constant 0 : index
    %70 = vector.load %arg9[%c1_47, %c0_48, %c0_49] : memref<9x128x128xbf16, #tpu.memory_space<vmem>>, vector<1x128x128xbf16>
    %71 = vector.shape_cast %70 : vector<1x128x128xbf16> to vector<128x128xbf16>
    %cst_50 = arith.constant dense<0.000000e+00> : vector<288x128xf32>
    %72 = tpu.matmul %66, %71, %cst_50 {dimension_numbers = #tpu.dot_dimension_numbers<[1], [0], [0], [1], [0, 0, 1, 1], [], []>} : vector<288x128xbf16>, vector<128x128xbf16>, vector<288x128xf32> -> vector<288x128xf32>
    %73 = arith.addf %69, %72 : vector<288x128xf32>
    %c0_51 = arith.constant 0 : index
    %c0_52 = arith.constant 0 : index
    %74 = vector.load %arg17[%c0_51, %c0_52] : memref<288x128xf32, #tpu.memory_space<vmem>>, vector<288x128xf32>
    %75 = arith.addf %74, %73 : vector<288x128xf32>
    %c0_53 = arith.constant 0 : index
    %c0_54 = arith.constant 0 : index
    %76 = vector.load %arg17[%c0_53, %c0_54] : memref<288x128xf32, #tpu.memory_space<vmem>>, vector<288x128xf32>
    tpu.vector_store %arg17[%c0_53, %c0_54], %75 {strides = array<i32>} : memref<288x128xf32, #tpu.memory_space<vmem>>, vector<288x128xf32>,
    %77 = vector.extract_strided_slice %28 {offsets = [17, 0], sizes = [288, 8], strides = [1, 1]} : vector<352x8xbf16> to vector<288x8xbf16>
    %78 = vector.extract_strided_slice %54 {offsets = [17, 0], sizes = [288, 128], strides = [1, 1]} : vector<352x128xbf16> to vector<288x128xbf16>
    %c2 = arith.constant 2 : index
    %c0_55 = arith.constant 0 : index
    %c0_56 = arith.constant 0 : index
    %79 = vector.load %arg8[%c2, %c0_55, %c0_56] : memref<9x8x128xbf16, #tpu.memory_space<vmem>>, vector<1x8x128xbf16>
    %80 = vector.shape_cast %79 : vector<1x8x128xbf16> to vector<8x128xbf16>
    %cst_57 = arith.constant dense<0.000000e+00> : vector<288x128xf32>
    %81 = tpu.matmul %77, %80, %cst_57 {dimension_numbers = #tpu.dot_dimension_numbers<[1], [0], [0], [1], [0, 0, 1, 1], [], []>} : vector<288x8xbf16>, vector<8x128xbf16>, vector<288x128xf32> -> vector<288x128xf32>
    %c2_58 = arith.constant 2 : index
    %c0_59 = arith.constant 0 : index
    %c0_60 = arith.constant 0 : index
    %82 = vector.load %arg9[%c2_58, %c0_59, %c0_60] : memref<9x128x128xbf16, #tpu.memory_space<vmem>>, vector<1x128x128xbf16>
    %83 = vector.shape_cast %82 : vector<1x128x128xbf16> to vector<128x128xbf16>
    %cst_61 = arith.constant dense<0.000000e+00> : vector<288x128xf32>
    %84 = tpu.matmul %78, %83, %cst_61 {dimension_numbers = #tpu.dot_dimension_numbers<[1], [0], [0], [1], [0, 0, 1, 1], [], []>} : vector<288x128xbf16>, vector<128x128xbf16>, vector<288x128xf32> -> vector<288x128xf32>
    %85 = arith.addf %81, %84 : vector<288x128xf32>
    %c0_62 = arith.constant 0 : index
    %c0_63 = arith.constant 0 : index
    %86 = vector.load %arg17[%c0_62, %c0_63] : memref<288x128xf32, #tpu.memory_space<vmem>>, vector<288x128xf32>
    %87 = arith.addf %86, %85 : vector<288x128xf32>
    %c0_64 = arith.constant 0 : index
    %c0_65 = arith.constant 0 : index
    %88 = vector.load %arg17[%c0_64, %c0_65] : memref<288x128xf32, #tpu.memory_space<vmem>>, vector<288x128xf32>
    tpu.vector_store %arg17[%c0_64, %c0_65], %87 {strides = array<i32>} : memref<288x128xf32, #tpu.memory_space<vmem>>, vector<288x128xf32>,
    %89 = vector.extract_strided_slice %27 {offsets = [31, 0], sizes = [288, 8], strides = [1, 1]} : vector<352x8xbf16> to vector<288x8xbf16>
    %90 = vector.extract_strided_slice %53 {offsets = [31, 0], sizes = [288, 128], strides = [1, 1]} : vector<352x128xbf16> to vector<288x128xbf16>
    %c3 = arith.constant 3 : index
    %c0_66 = arith.constant 0 : index
    %c0_67 = arith.constant 0 : index
    %91 = vector.load %arg8[%c3, %c0_66, %c0_67] : memref<9x8x128xbf16, #tpu.memory_space<vmem>>, vector<1x8x128xbf16>
    %92 = vector.shape_cast %91 : vector<1x8x128xbf16> to vector<8x128xbf16>
    %cst_68 = arith.constant dense<0.000000e+00> : vector<288x128xf32>
    %93 = tpu.matmul %89, %92, %cst_68 {dimension_numbers = #tpu.dot_dimension_numbers<[1], [0], [0], [1], [0, 0, 1, 1], [], []>} : vector<288x8xbf16>, vector<8x128xbf16>, vector<288x128xf32> -> vector<288x128xf32>
    %c3_69 = arith.constant 3 : index
    %c0_70 = arith.constant 0 : index
    %c0_71 = arith.constant 0 : index
    %94 = vector.load %arg9[%c3_69, %c0_70, %c0_71] : memref<9x128x128xbf16, #tpu.memory_space<vmem>>, vector<1x128x128xbf16>
    %95 = vector.shape_cast %94 : vector<1x128x128xbf16> to vector<128x128xbf16>
    %cst_72 = arith.constant dense<0.000000e+00> : vector<288x128xf32>
    %96 = tpu.matmul %90, %95, %cst_72 {dimension_numbers = #tpu.dot_dimension_numbers<[1], [0], [0], [1], [0, 0, 1, 1], [], []>} : vector<288x128xbf16>, vector<128x128xbf16>, vector<288x128xf32> -> vector<288x128xf32>
    %97 = arith.addf %93, %96 : vector<288x128xf32>
    %c0_73 = arith.constant 0 : index
    %c0_74 = arith.constant 0 : index
    %98 = vector.load %arg17[%c0_73, %c0_74] : memref<288x128xf32, #tpu.memory_space<vmem>>, vector<288x128xf32>
    %99 = arith.addf %98, %97 : vector<288x128xf32>
    %c0_75 = arith.constant 0 : index
    %c0_76 = arith.constant 0 : index
    %100 = vector.load %arg17[%c0_75, %c0_76] : memref<288x128xf32, #tpu.memory_space<vmem>>, vector<288x128xf32>
    tpu.vector_store %arg17[%c0_75, %c0_76], %99 {strides = array<i32>} : memref<288x128xf32, #tpu.memory_space<vmem>>, vector<288x128xf32>,
    %101 = vector.extract_strided_slice %26 {offsets = [32, 0], sizes = [288, 8], strides = [1, 1]} : vector<352x8xbf16> to vector<288x8xbf16>
    %102 = vector.extract_strided_slice %52 {offsets = [32, 0], sizes = [288, 128], strides = [1, 1]} : vector<352x128xbf16> to vector<288x128xbf16>
    %c4 = arith.constant 4 : index
    %c0_77 = arith.constant 0 : index
    %c0_78 = arith.constant 0 : index
    %103 = vector.load %arg8[%c4, %c0_77, %c0_78] : memref<9x8x128xbf16, #tpu.memory_space<vmem>>, vector<1x8x128xbf16>
    %104 = vector.shape_cast %103 : vector<1x8x128xbf16> to vector<8x128xbf16>
    %cst_79 = arith.constant dense<0.000000e+00> : vector<288x128xf32>
    %105 = tpu.matmul %101, %104, %cst_79 {dimension_numbers = #tpu.dot_dimension_numbers<[1], [0], [0], [1], [0, 0, 1, 1], [], []>} : vector<288x8xbf16>, vector<8x128xbf16>, vector<288x128xf32> -> vector<288x128xf32>
    %c4_80 = arith.constant 4 : index
    %c0_81 = arith.constant 0 : index
    %c0_82 = arith.constant 0 : index
    %106 = vector.load %arg9[%c4_80, %c0_81, %c0_82] : memref<9x128x128xbf16, #tpu.memory_space<vmem>>, vector<1x128x128xbf16>
    %107 = vector.shape_cast %106 : vector<1x128x128xbf16> to vector<128x128xbf16>
    %cst_83 = arith.constant dense<0.000000e+00> : vector<288x128xf32>
    %108 = tpu.matmul %102, %107, %cst_83 {dimension_numbers = #tpu.dot_dimension_numbers<[1], [0], [0], [1], [0, 0, 1, 1], [], []>} : vector<288x128xbf16>, vector<128x128xbf16>, vector<288x128xf32> -> vector<288x128xf32>
    %109 = arith.addf %105, %108 : vector<288x128xf32>
    %c0_84 = arith.constant 0 : index
    %c0_85 = arith.constant 0 : index
    %110 = vector.load %arg17[%c0_84, %c0_85] : memref<288x128xf32, #tpu.memory_space<vmem>>, vector<288x128xf32>
    %111 = arith.addf %110, %109 : vector<288x128xf32>
    %c0_86 = arith.constant 0 : index
    %c0_87 = arith.constant 0 : index
    %112 = vector.load %arg17[%c0_86, %c0_87] : memref<288x128xf32, #tpu.memory_space<vmem>>, vector<288x128xf32>
    tpu.vector_store %arg17[%c0_86, %c0_87], %111 {strides = array<i32>} : memref<288x128xf32, #tpu.memory_space<vmem>>, vector<288x128xf32>,
    %113 = vector.extract_strided_slice %28 {offsets = [33, 0], sizes = [288, 8], strides = [1, 1]} : vector<352x8xbf16> to vector<288x8xbf16>
    %114 = vector.extract_strided_slice %54 {offsets = [33, 0], sizes = [288, 128], strides = [1, 1]} : vector<352x128xbf16> to vector<288x128xbf16>
    %c5 = arith.constant 5 : index
    %c0_88 = arith.constant 0 : index
    %c0_89 = arith.constant 0 : index
    %115 = vector.load %arg8[%c5, %c0_88, %c0_89] : memref<9x8x128xbf16, #tpu.memory_space<vmem>>, vector<1x8x128xbf16>
    %116 = vector.shape_cast %115 : vector<1x8x128xbf16> to vector<8x128xbf16>
    %cst_90 = arith.constant dense<0.000000e+00> : vector<288x128xf32>
    %117 = tpu.matmul %113, %116, %cst_90 {dimension_numbers = #tpu.dot_dimension_numbers<[1], [0], [0], [1], [0, 0, 1, 1], [], []>} : vector<288x8xbf16>, vector<8x128xbf16>, vector<288x128xf32> -> vector<288x128xf32>
    %c5_91 = arith.constant 5 : index
    %c0_92 = arith.constant 0 : index
    %c0_93 = arith.constant 0 : index
    %118 = vector.load %arg9[%c5_91, %c0_92, %c0_93] : memref<9x128x128xbf16, #tpu.memory_space<vmem>>, vector<1x128x128xbf16>
    %119 = vector.shape_cast %118 : vector<1x128x128xbf16> to vector<128x128xbf16>
    %cst_94 = arith.constant dense<0.000000e+00> : vector<288x128xf32>
    %120 = tpu.matmul %114, %119, %cst_94 {dimension_numbers = #tpu.dot_dimension_numbers<[1], [0], [0], [1], [0, 0, 1, 1], [], []>} : vector<288x128xbf16>, vector<128x128xbf16>, vector<288x128xf32> -> vector<288x128xf32>
    %121 = arith.addf %117, %120 : vector<288x128xf32>
    %c0_95 = arith.constant 0 : index
    %c0_96 = arith.constant 0 : index
    %122 = vector.load %arg17[%c0_95, %c0_96] : memref<288x128xf32, #tpu.memory_space<vmem>>, vector<288x128xf32>
    %123 = arith.addf %122, %121 : vector<288x128xf32>
    %c0_97 = arith.constant 0 : index
    %c0_98 = arith.constant 0 : index
    %124 = vector.load %arg17[%c0_97, %c0_98] : memref<288x128xf32, #tpu.memory_space<vmem>>, vector<288x128xf32>
    tpu.vector_store %arg17[%c0_97, %c0_98], %123 {strides = array<i32>} : memref<288x128xf32, #tpu.memory_space<vmem>>, vector<288x128xf32>,
    %125 = vector.extract_strided_slice %27 {offsets = [47, 0], sizes = [288, 8], strides = [1, 1]} : vector<352x8xbf16> to vector<288x8xbf16>
    %126 = vector.extract_strided_slice %53 {offsets = [47, 0], sizes = [288, 128], strides = [1, 1]} : vector<352x128xbf16> to vector<288x128xbf16>
    %c6 = arith.constant 6 : index
    %c0_99 = arith.constant 0 : index
    %c0_100 = arith.constant 0 : index
    %127 = vector.load %arg8[%c6, %c0_99, %c0_100] : memref<9x8x128xbf16, #tpu.memory_space<vmem>>, vector<1x8x128xbf16>
    %128 = vector.shape_cast %127 : vector<1x8x128xbf16> to vector<8x128xbf16>
    %cst_101 = arith.constant dense<0.000000e+00> : vector<288x128xf32>
    %129 = tpu.matmul %125, %128, %cst_101 {dimension_numbers = #tpu.dot_dimension_numbers<[1], [0], [0], [1], [0, 0, 1, 1], [], []>} : vector<288x8xbf16>, vector<8x128xbf16>, vector<288x128xf32> -> vector<288x128xf32>
    %c6_102 = arith.constant 6 : index
    %c0_103 = arith.constant 0 : index
    %c0_104 = arith.constant 0 : index
    %130 = vector.load %arg9[%c6_102, %c0_103, %c0_104] : memref<9x128x128xbf16, #tpu.memory_space<vmem>>, vector<1x128x128xbf16>
    %131 = vector.shape_cast %130 : vector<1x128x128xbf16> to vector<128x128xbf16>
    %cst_105 = arith.constant dense<0.000000e+00> : vector<288x128xf32>
    %132 = tpu.matmul %126, %131, %cst_105 {dimension_numbers = #tpu.dot_dimension_numbers<[1], [0], [0], [1], [0, 0, 1, 1], [], []>} : vector<288x128xbf16>, vector<128x128xbf16>, vector<288x128xf32> -> vector<288x128xf32>
    %133 = arith.addf %129, %132 : vector<288x128xf32>
    %c0_106 = arith.constant 0 : index
    %c0_107 = arith.constant 0 : index
    %134 = vector.load %arg17[%c0_106, %c0_107] : memref<288x128xf32, #tpu.memory_space<vmem>>, vector<288x128xf32>
    %135 = arith.addf %134, %133 : vector<288x128xf32>
    %c0_108 = arith.constant 0 : index
    %c0_109 = arith.constant 0 : index
    %136 = vector.load %arg17[%c0_108, %c0_109] : memref<288x128xf32, #tpu.memory_space<vmem>>, vector<288x128xf32>
    tpu.vector_store %arg17[%c0_108, %c0_109], %135 {strides = array<i32>} : memref<288x128xf32, #tpu.memory_space<vmem>>, vector<288x128xf32>,
    %137 = vector.extract_strided_slice %26 {offsets = [48, 0], sizes = [288, 8], strides = [1, 1]} : vector<352x8xbf16> to vector<288x8xbf16>
    %138 = vector.extract_strided_slice %52 {offsets = [48, 0], sizes = [288, 128], strides = [1, 1]} : vector<352x128xbf16> to vector<288x128xbf16>
    %c7 = arith.constant 7 : index
    %c0_110 = arith.constant 0 : index
    %c0_111 = arith.constant 0 : index
    %139 = vector.load %arg8[%c7, %c0_110, %c0_111] : memref<9x8x128xbf16, #tpu.memory_space<vmem>>, vector<1x8x128xbf16>
    %140 = vector.shape_cast %139 : vector<1x8x128xbf16> to vector<8x128xbf16>
    %cst_112 = arith.constant dense<0.000000e+00> : vector<288x128xf32>
    %141 = tpu.matmul %137, %140, %cst_112 {dimension_numbers = #tpu.dot_dimension_numbers<[1], [0], [0], [1], [0, 0, 1, 1], [], []>} : vector<288x8xbf16>, vector<8x128xbf16>, vector<288x128xf32> -> vector<288x128xf32>
    %c7_113 = arith.constant 7 : index
    %c0_114 = arith.constant 0 : index
    %c0_115 = arith.constant 0 : index
    %142 = vector.load %arg9[%c7_113, %c0_114, %c0_115] : memref<9x128x128xbf16, #tpu.memory_space<vmem>>, vector<1x128x128xbf16>
    %143 = vector.shape_cast %142 : vector<1x128x128xbf16> to vector<128x128xbf16>
    %cst_116 = arith.constant dense<0.000000e+00> : vector<288x128xf32>
    %144 = tpu.matmul %138, %143, %cst_116 {dimension_numbers = #tpu.dot_dimension_numbers<[1], [0], [0], [1], [0, 0, 1, 1], [], []>} : vector<288x128xbf16>, vector<128x128xbf16>, vector<288x128xf32> -> vector<288x128xf32>
    %145 = arith.addf %141, %144 : vector<288x128xf32>
    %c0_117 = arith.constant 0 : index
    %c0_118 = arith.constant 0 : index
    %146 = vector.load %arg17[%c0_117, %c0_118] : memref<288x128xf32, #tpu.memory_space<vmem>>, vector<288x128xf32>
    %147 = arith.addf %146, %145 : vector<288x128xf32>
    %c0_119 = arith.constant 0 : index
    %c0_120 = arith.constant 0 : index
    %148 = vector.load %arg17[%c0_119, %c0_120] : memref<288x128xf32, #tpu.memory_space<vmem>>, vector<288x128xf32>
    tpu.vector_store %arg17[%c0_119, %c0_120], %147 {strides = array<i32>} : memref<288x128xf32, #tpu.memory_space<vmem>>, vector<288x128xf32>,
    %149 = vector.extract_strided_slice %28 {offsets = [49, 0], sizes = [288, 8], strides = [1, 1]} : vector<352x8xbf16> to vector<288x8xbf16>
    %150 = vector.extract_strided_slice %54 {offsets = [49, 0], sizes = [288, 128], strides = [1, 1]} : vector<352x128xbf16> to vector<288x128xbf16>
    %c8 = arith.constant 8 : index
    %c0_121 = arith.constant 0 : index
    %c0_122 = arith.constant 0 : index
    %151 = vector.load %arg8[%c8, %c0_121, %c0_122] : memref<9x8x128xbf16, #tpu.memory_space<vmem>>, vector<1x8x128xbf16>
    %152 = vector.shape_cast %151 : vector<1x8x128xbf16> to vector<8x128xbf16>
    %cst_123 = arith.constant dense<0.000000e+00> : vector<288x128xf32>
    %153 = tpu.matmul %149, %152, %cst_123 {dimension_numbers = #tpu.dot_dimension_numbers<[1], [0], [0], [1], [0, 0, 1, 1], [], []>} : vector<288x8xbf16>, vector<8x128xbf16>, vector<288x128xf32> -> vector<288x128xf32>
    %c8_124 = arith.constant 8 : index
    %c0_125 = arith.constant 0 : index
    %c0_126 = arith.constant 0 : index
    %154 = vector.load %arg9[%c8_124, %c0_125, %c0_126] : memref<9x128x128xbf16, #tpu.memory_space<vmem>>, vector<1x128x128xbf16>
    %155 = vector.shape_cast %154 : vector<1x128x128xbf16> to vector<128x128xbf16>
    %cst_127 = arith.constant dense<0.000000e+00> : vector<288x128xf32>
    %156 = tpu.matmul %150, %155, %cst_127 {dimension_numbers = #tpu.dot_dimension_numbers<[1], [0], [0], [1], [0, 0, 1, 1], [], []>} : vector<288x128xbf16>, vector<128x128xbf16>, vector<288x128xf32> -> vector<288x128xf32>
    %157 = arith.addf %153, %156 : vector<288x128xf32>
    %c0_128 = arith.constant 0 : index
    %c0_129 = arith.constant 0 : index
    %158 = vector.load %arg17[%c0_128, %c0_129] : memref<288x128xf32, #tpu.memory_space<vmem>>, vector<288x128xf32>
    %159 = arith.addf %158, %157 : vector<288x128xf32>
    %c0_130 = arith.constant 0 : index
    %c0_131 = arith.constant 0 : index
    %160 = vector.load %arg17[%c0_130, %c0_131] : memref<288x128xf32, #tpu.memory_space<vmem>>, vector<288x128xf32>
    tpu.vector_store %arg17[%c0_130, %c0_131], %159 {strides = array<i32>} : memref<288x128xf32, #tpu.memory_space<vmem>>, vector<288x128xf32>,
    %c0_132 = arith.constant 0 : index
    %c0_133 = arith.constant 0 : index
    %161 = vector.load %arg17[%c0_132, %c0_133] : memref<288x128xf32, #tpu.memory_space<vmem>>, vector<288x128xf32>
    %c0_134 = arith.constant 0 : index
    %c0_135 = arith.constant 0 : index
    %162 = vector.load %arg10[%c0_134, %c0_135] : memref<1x128xf32, #tpu.memory_space<vmem>>, vector<1x128xf32>
    %163 = vector.broadcast %162 : vector<1x128xf32> to vector<288x128xf32>
    %164 = arith.mulf %161, %163 : vector<288x128xf32>
    %c0_136 = arith.constant 0 : index
    %c0_137 = arith.constant 0 : index
    %165 = vector.load %arg11[%c0_136, %c0_137] : memref<1x128xf32, #tpu.memory_space<vmem>>, vector<1x128xf32>
    %166 = vector.broadcast %165 : vector<1x128xf32> to vector<288x128xf32>
    %167 = arith.addf %164, %166 : vector<288x128xf32>
    %cst_138 = arith.constant 0.000000e+00 : f32
    %168 = vector.broadcast %cst_138 : f32 to vector<288x128xf32>
    %169 = arith.maximumf %167, %168 : vector<288x128xf32>
    %170 = tpu.iota {dimensions = array<i32: 0>} : vector<288x1xi32>
    %c16_i32 = arith.constant 16 : i32
    %171 = vector.broadcast %c16_i32 : i32 to vector<288x1xi32>
    %172 = arith.cmpi slt, %170, %171 : vector<288x1xi32>
    %173 = vector.broadcast %0 : i1 to vector<288x1xi1>
    %174 = arith.andi %173, %172 : vector<288x1xi1>
    %c272_i32 = arith.constant 272 : i32
    %175 = vector.broadcast %c272_i32 : i32 to vector<288x1xi32>
    %176 = arith.cmpi sge, %170, %175 : vector<288x1xi32>
    %177 = vector.broadcast %1 : i1 to vector<288x1xi1>
    %178 = arith.andi %177, %176 : vector<288x1xi1>
    %179 = arith.ori %174, %178 : vector<288x1xi1>
    %cst_139 = arith.constant 0.000000e+00 : f32
    %180 = vector.shape_cast %179 : vector<288x1xi1> to vector<288x1xi1>
    %181 = vector.broadcast %180 : vector<288x1xi1> to vector<288x128xi1>
    %182 = vector.broadcast %cst_139 : f32 to vector<288x128xf32>
    %183 = arith.select %181, %182, %169 : vector<288x128xi1>, vector<288x128xf32>
    %184 = arith.truncf %183 : vector<288x128xf32> to vector<288x128xbf16>
    %cst_140 = arith.constant 0.000000e+00 : bf16
    %185 = vector.broadcast %cst_140 : bf16 to vector<16x128xbf16>
    %186 = tpu.concatenate %185, %184, %185 in 0 : vector<16x128xbf16>, vector<288x128xbf16>, vector<16x128xbf16> -> vector<320x128xbf16>
    %187 = vector.shape_cast %186 : vector<320x128xbf16> to vector<20x16x128xbf16>
    %c15_i32_141 = arith.constant 15 : i32
    %188 = vector.broadcast %c15_i32_141 : i32 to vector<1x16x1xi32>
    %189 = arith.cmpi eq, %2, %188 : vector<1x16x1xi32>
    %cst_142 = arith.constant 0.000000e+00 : bf16
    %190 = vector.broadcast %cst_142 : bf16 to vector<20x16x128xbf16>
    %191 = vector.shape_cast %189 : vector<1x16x1xi1> to vector<1x16x1xi1>
    %192 = vector.broadcast %191 : vector<1x16x1xi1> to vector<20x16x128xi1>
    %193 = arith.select %192, %190, %187 : vector<20x16x128xi1>, vector<20x16x128xbf16>
    %c0_i32_143 = arith.constant 0 : i32
    %194 = vector.broadcast %c0_i32_143 : i32 to vector<1x16x1xi32>
    %195 = arith.cmpi eq, %2, %194 : vector<1x16x1xi32>
    %cst_144 = arith.constant 0.000000e+00 : bf16
    %196 = vector.broadcast %cst_144 : bf16 to vector<20x16x128xbf16>
    %197 = vector.shape_cast %195 : vector<1x16x1xi1> to vector<1x16x1xi1>
    %198 = vector.broadcast %197 : vector<1x16x1xi1> to vector<20x16x128xi1>
    %199 = arith.select %198, %196, %187 : vector<20x16x128xi1>, vector<20x16x128xbf16>
    %200 = vector.shape_cast %187 : vector<20x16x128xbf16> to vector<320x128xbf16>
    %201 = vector.shape_cast %193 : vector<20x16x128xbf16> to vector<320x128xbf16>
    %202 = vector.shape_cast %199 : vector<20x16x128xbf16> to vector<320x128xbf16>
    %203 = vector.extract_strided_slice %201 {offsets = [15, 0], sizes = [256, 128], strides = [1, 1]} : vector<320x128xbf16> to vector<256x128xbf16>
    %c0_145 = arith.constant 0 : index
    %c0_146 = arith.constant 0 : index
    %c0_147 = arith.constant 0 : index
    %204 = vector.load %arg12[%c0_145, %c0_146, %c0_147] : memref<9x128x128xbf16, #tpu.memory_space<vmem>>, vector<1x128x128xbf16>
    %205 = vector.shape_cast %204 : vector<1x128x128xbf16> to vector<128x128xbf16>
    %cst_148 = arith.constant dense<0.000000e+00> : vector<256x128xf32>
    %206 = tpu.matmul %203, %205, %cst_148 {dimension_numbers = #tpu.dot_dimension_numbers<[1], [0], [0], [1], [0, 0, 1, 1], [], []>} : vector<256x128xbf16>, vector<128x128xbf16>, vector<256x128xf32> -> vector<256x128xf32>
    %c0_149 = arith.constant 0 : index
    %c0_150 = arith.constant 0 : index
    %207 = vector.load %arg17[%c0_149, %c0_150] : memref<288x128xf32, #tpu.memory_space<vmem>>, vector<256x128xf32>
    tpu.vector_store %arg17[%c0_149, %c0_150], %206 {strides = array<i32>} : memref<288x128xf32, #tpu.memory_space<vmem>>, vector<256x128xf32>,
    %208 = vector.extract_strided_slice %200 {offsets = [16, 0], sizes = [256, 128], strides = [1, 1]} : vector<320x128xbf16> to vector<256x128xbf16>
    %c1_151 = arith.constant 1 : index
    %c0_152 = arith.constant 0 : index
    %c0_153 = arith.constant 0 : index
    %209 = vector.load %arg12[%c1_151, %c0_152, %c0_153] : memref<9x128x128xbf16, #tpu.memory_space<vmem>>, vector<1x128x128xbf16>
    %210 = vector.shape_cast %209 : vector<1x128x128xbf16> to vector<128x128xbf16>
    %cst_154 = arith.constant dense<0.000000e+00> : vector<256x128xf32>
    %211 = tpu.matmul %208, %210, %cst_154 {dimension_numbers = #tpu.dot_dimension_numbers<[1], [0], [0], [1], [0, 0, 1, 1], [], []>} : vector<256x128xbf16>, vector<128x128xbf16>, vector<256x128xf32> -> vector<256x128xf32>
    %c0_155 = arith.constant 0 : index
    %c0_156 = arith.constant 0 : index
    %212 = vector.load %arg17[%c0_155, %c0_156] : memref<288x128xf32, #tpu.memory_space<vmem>>, vector<256x128xf32>
    %213 = arith.addf %212, %211 : vector<256x128xf32>
    %c0_157 = arith.constant 0 : index
    %c0_158 = arith.constant 0 : index
    %214 = vector.load %arg17[%c0_157, %c0_158] : memref<288x128xf32, #tpu.memory_space<vmem>>, vector<256x128xf32>
    tpu.vector_store %arg17[%c0_157, %c0_158], %213 {strides = array<i32>} : memref<288x128xf32, #tpu.memory_space<vmem>>, vector<256x128xf32>,
    %215 = vector.extract_strided_slice %202 {offsets = [17, 0], sizes = [256, 128], strides = [1, 1]} : vector<320x128xbf16> to vector<256x128xbf16>
    %c2_159 = arith.constant 2 : index
    %c0_160 = arith.constant 0 : index
    %c0_161 = arith.constant 0 : index
    %216 = vector.load %arg12[%c2_159, %c0_160, %c0_161] : memref<9x128x128xbf16, #tpu.memory_space<vmem>>, vector<1x128x128xbf16>
    %217 = vector.shape_cast %216 : vector<1x128x128xbf16> to vector<128x128xbf16>
    %cst_162 = arith.constant dense<0.000000e+00> : vector<256x128xf32>
    %218 = tpu.matmul %215, %217, %cst_162 {dimension_numbers = #tpu.dot_dimension_numbers<[1], [0], [0], [1], [0, 0, 1, 1], [], []>} : vector<256x128xbf16>, vector<128x128xbf16>, vector<256x128xf32> -> vector<256x128xf32>
    %c0_163 = arith.constant 0 : index
    %c0_164 = arith.constant 0 : index
    %219 = vector.load %arg17[%c0_163, %c0_164] : memref<288x128xf32, #tpu.memory_space<vmem>>, vector<256x128xf32>
    %220 = arith.addf %219, %218 : vector<256x128xf32>
    %c0_165 = arith.constant 0 : index
    %c0_166 = arith.constant 0 : index
    %221 = vector.load %arg17[%c0_165, %c0_166] : memref<288x128xf32, #tpu.memory_space<vmem>>, vector<256x128xf32>
    tpu.vector_store %arg17[%c0_165, %c0_166], %220 {strides = array<i32>} : memref<288x128xf32, #tpu.memory_space<vmem>>, vector<256x128xf32>,
    %222 = vector.extract_strided_slice %201 {offsets = [31, 0], sizes = [256, 128], strides = [1, 1]} : vector<320x128xbf16> to vector<256x128xbf16>
    %c3_167 = arith.constant 3 : index
    %c0_168 = arith.constant 0 : index
    %c0_169 = arith.constant 0 : index
    %223 = vector.load %arg12[%c3_167, %c0_168, %c0_169] : memref<9x128x128xbf16, #tpu.memory_space<vmem>>, vector<1x128x128xbf16>
    %224 = vector.shape_cast %223 : vector<1x128x128xbf16> to vector<128x128xbf16>
    %cst_170 = arith.constant dense<0.000000e+00> : vector<256x128xf32>
    %225 = tpu.matmul %222, %224, %cst_170 {dimension_numbers = #tpu.dot_dimension_numbers<[1], [0], [0], [1], [0, 0, 1, 1], [], []>} : vector<256x128xbf16>, vector<128x128xbf16>, vector<256x128xf32> -> vector<256x128xf32>
    %c0_171 = arith.constant 0 : index
    %c0_172 = arith.constant 0 : index
    %226 = vector.load %arg17[%c0_171, %c0_172] : memref<288x128xf32, #tpu.memory_space<vmem>>, vector<256x128xf32>
    %227 = arith.addf %226, %225 : vector<256x128xf32>
    %c0_173 = arith.constant 0 : index
    %c0_174 = arith.constant 0 : index
    %228 = vector.load %arg17[%c0_173, %c0_174] : memref<288x128xf32, #tpu.memory_space<vmem>>, vector<256x128xf32>
    tpu.vector_store %arg17[%c0_173, %c0_174], %227 {strides = array<i32>} : memref<288x128xf32, #tpu.memory_space<vmem>>, vector<256x128xf32>,
    %229 = vector.extract_strided_slice %200 {offsets = [32, 0], sizes = [256, 128], strides = [1, 1]} : vector<320x128xbf16> to vector<256x128xbf16>
    %c4_175 = arith.constant 4 : index
    %c0_176 = arith.constant 0 : index
    %c0_177 = arith.constant 0 : index
    %230 = vector.load %arg12[%c4_175, %c0_176, %c0_177] : memref<9x128x128xbf16, #tpu.memory_space<vmem>>, vector<1x128x128xbf16>
    %231 = vector.shape_cast %230 : vector<1x128x128xbf16> to vector<128x128xbf16>
    %cst_178 = arith.constant dense<0.000000e+00> : vector<256x128xf32>
    %232 = tpu.matmul %229, %231, %cst_178 {dimension_numbers = #tpu.dot_dimension_numbers<[1], [0], [0], [1], [0, 0, 1, 1], [], []>} : vector<256x128xbf16>, vector<128x128xbf16>, vector<256x128xf32> -> vector<256x128xf32>
    %c0_179 = arith.constant 0 : index
    %c0_180 = arith.constant 0 : index
    %233 = vector.load %arg17[%c0_179, %c0_180] : memref<288x128xf32, #tpu.memory_space<vmem>>, vector<256x128xf32>
    %234 = arith.addf %233, %232 : vector<256x128xf32>
    %c0_181 = arith.constant 0 : index
    %c0_182 = arith.constant 0 : index
    %235 = vector.load %arg17[%c0_181, %c0_182] : memref<288x128xf32, #tpu.memory_space<vmem>>, vector<256x128xf32>
    tpu.vector_store %arg17[%c0_181, %c0_182], %234 {strides = array<i32>} : memref<288x128xf32, #tpu.memory_space<vmem>>, vector<256x128xf32>,
    %236 = vector.extract_strided_slice %202 {offsets = [33, 0], sizes = [256, 128], strides = [1, 1]} : vector<320x128xbf16> to vector<256x128xbf16>
    %c5_183 = arith.constant 5 : index
    %c0_184 = arith.constant 0 : index
    %c0_185 = arith.constant 0 : index
    %237 = vector.load %arg12[%c5_183, %c0_184, %c0_185] : memref<9x128x128xbf16, #tpu.memory_space<vmem>>, vector<1x128x128xbf16>
    %238 = vector.shape_cast %237 : vector<1x128x128xbf16> to vector<128x128xbf16>
    %cst_186 = arith.constant dense<0.000000e+00> : vector<256x128xf32>
    %239 = tpu.matmul %236, %238, %cst_186 {dimension_numbers = #tpu.dot_dimension_numbers<[1], [0], [0], [1], [0, 0, 1, 1], [], []>} : vector<256x128xbf16>, vector<128x128xbf16>, vector<256x128xf32> -> vector<256x128xf32>
    %c0_187 = arith.constant 0 : index
    %c0_188 = arith.constant 0 : index
    %240 = vector.load %arg17[%c0_187, %c0_188] : memref<288x128xf32, #tpu.memory_space<vmem>>, vector<256x128xf32>
    %241 = arith.addf %240, %239 : vector<256x128xf32>
    %c0_189 = arith.constant 0 : index
    %c0_190 = arith.constant 0 : index
    %242 = vector.load %arg17[%c0_189, %c0_190] : memref<288x128xf32, #tpu.memory_space<vmem>>, vector<256x128xf32>
    tpu.vector_store %arg17[%c0_189, %c0_190], %241 {strides = array<i32>} : memref<288x128xf32, #tpu.memory_space<vmem>>, vector<256x128xf32>,
    %243 = vector.extract_strided_slice %201 {offsets = [47, 0], sizes = [256, 128], strides = [1, 1]} : vector<320x128xbf16> to vector<256x128xbf16>
    %c6_191 = arith.constant 6 : index
    %c0_192 = arith.constant 0 : index
    %c0_193 = arith.constant 0 : index
    %244 = vector.load %arg12[%c6_191, %c0_192, %c0_193] : memref<9x128x128xbf16, #tpu.memory_space<vmem>>, vector<1x128x128xbf16>
    %245 = vector.shape_cast %244 : vector<1x128x128xbf16> to vector<128x128xbf16>
    %cst_194 = arith.constant dense<0.000000e+00> : vector<256x128xf32>
    %246 = tpu.matmul %243, %245, %cst_194 {dimension_numbers = #tpu.dot_dimension_numbers<[1], [0], [0], [1], [0, 0, 1, 1], [], []>} : vector<256x128xbf16>, vector<128x128xbf16>, vector<256x128xf32> -> vector<256x128xf32>
    %c0_195 = arith.constant 0 : index
    %c0_196 = arith.constant 0 : index
    %247 = vector.load %arg17[%c0_195, %c0_196] : memref<288x128xf32, #tpu.memory_space<vmem>>, vector<256x128xf32>
    %248 = arith.addf %247, %246 : vector<256x128xf32>
    %c0_197 = arith.constant 0 : index
    %c0_198 = arith.constant 0 : index
    %249 = vector.load %arg17[%c0_197, %c0_198] : memref<288x128xf32, #tpu.memory_space<vmem>>, vector<256x128xf32>
    tpu.vector_store %arg17[%c0_197, %c0_198], %248 {strides = array<i32>} : memref<288x128xf32, #tpu.memory_space<vmem>>, vector<256x128xf32>,
    %250 = vector.extract_strided_slice %200 {offsets = [48, 0], sizes = [256, 128], strides = [1, 1]} : vector<320x128xbf16> to vector<256x128xbf16>
    %c7_199 = arith.constant 7 : index
    %c0_200 = arith.constant 0 : index
    %c0_201 = arith.constant 0 : index
    %251 = vector.load %arg12[%c7_199, %c0_200, %c0_201] : memref<9x128x128xbf16, #tpu.memory_space<vmem>>, vector<1x128x128xbf16>
    %252 = vector.shape_cast %251 : vector<1x128x128xbf16> to vector<128x128xbf16>
    %cst_202 = arith.constant dense<0.000000e+00> : vector<256x128xf32>
    %253 = tpu.matmul %250, %252, %cst_202 {dimension_numbers = #tpu.dot_dimension_numbers<[1], [0], [0], [1], [0, 0, 1, 1], [], []>} : vector<256x128xbf16>, vector<128x128xbf16>, vector<256x128xf32> -> vector<256x128xf32>
    %c0_203 = arith.constant 0 : index
    %c0_204 = arith.constant 0 : index
    %254 = vector.load %arg17[%c0_203, %c0_204] : memref<288x128xf32, #tpu.memory_space<vmem>>, vector<256x128xf32>
    %255 = arith.addf %254, %253 : vector<256x128xf32>
    %c0_205 = arith.constant 0 : index
    %c0_206 = arith.constant 0 : index
    %256 = vector.load %arg17[%c0_205, %c0_206] : memref<288x128xf32, #tpu.memory_space<vmem>>, vector<256x128xf32>
    tpu.vector_store %arg17[%c0_205, %c0_206], %255 {strides = array<i32>} : memref<288x128xf32, #tpu.memory_space<vmem>>, vector<256x128xf32>,
    %257 = vector.extract_strided_slice %202 {offsets = [49, 0], sizes = [256, 128], strides = [1, 1]} : vector<320x128xbf16> to vector<256x128xbf16>
    %c8_207 = arith.constant 8 : index
    %c0_208 = arith.constant 0 : index
    %c0_209 = arith.constant 0 : index
    %258 = vector.load %arg12[%c8_207, %c0_208, %c0_209] : memref<9x128x128xbf16, #tpu.memory_space<vmem>>, vector<1x128x128xbf16>
    %259 = vector.shape_cast %258 : vector<1x128x128xbf16> to vector<128x128xbf16>
    %cst_210 = arith.constant dense<0.000000e+00> : vector<256x128xf32>
    %260 = tpu.matmul %257, %259, %cst_210 {dimension_numbers = #tpu.dot_dimension_numbers<[1], [0], [0], [1], [0, 0, 1, 1], [], []>} : vector<256x128xbf16>, vector<128x128xbf16>, vector<256x128xf32> -> vector<256x128xf32>
    %c0_211 = arith.constant 0 : index
    %c0_212 = arith.constant 0 : index
    %261 = vector.load %arg17[%c0_211, %c0_212] : memref<288x128xf32, #tpu.memory_space<vmem>>, vector<256x128xf32>
    %262 = arith.addf %261, %260 : vector<256x128xf32>
    %c0_213 = arith.constant 0 : index
    %c0_214 = arith.constant 0 : index
    %263 = vector.load %arg17[%c0_213, %c0_214] : memref<288x128xf32, #tpu.memory_space<vmem>>, vector<256x128xf32>
    tpu.vector_store %arg17[%c0_213, %c0_214], %262 {strides = array<i32>} : memref<288x128xf32, #tpu.memory_space<vmem>>, vector<256x128xf32>,
    %c0_215 = arith.constant 0 : index
    %c0_216 = arith.constant 0 : index
    %264 = vector.load %arg17[%c0_215, %c0_216] : memref<288x128xf32, #tpu.memory_space<vmem>>, vector<256x128xf32>
    %c0_217 = arith.constant 0 : index
    %c0_218 = arith.constant 0 : index
    %265 = vector.load %arg13[%c0_217, %c0_218] : memref<1x128xf32, #tpu.memory_space<vmem>>, vector<1x128xf32>
    %266 = vector.broadcast %265 : vector<1x128xf32> to vector<256x128xf32>
    %267 = arith.mulf %264, %266 : vector<256x128xf32>
    %c0_219 = arith.constant 0 : index
    %c0_220 = arith.constant 0 : index
    %268 = vector.load %arg14[%c0_219, %c0_220] : memref<1x128xf32, #tpu.memory_space<vmem>>, vector<1x128xf32>
    %269 = vector.broadcast %268 : vector<1x128xf32> to vector<256x128xf32>
    %270 = arith.addf %267, %269 : vector<256x128xf32>
    %cst_221 = arith.constant 0.000000e+00 : f32
    %271 = vector.broadcast %cst_221 : f32 to vector<256x128xf32>
    %272 = arith.maximumf %270, %271 : vector<256x128xf32>
    %273 = vector.shape_cast %272 : vector<256x128xf32> to vector<16x16x128xf32>
    %274 = arith.truncf %273 : vector<16x16x128xf32> to vector<16x16x128xbf16>
    %c0_222 = arith.constant 0 : index
    %c0_223 = arith.constant 0 : index
    %c0_224 = arith.constant 0 : index
    %c0_225 = arith.constant 0 : index
    %275 = vector.load %arg15[%c0_222, %c0_223, %c0_224, %c0_225] : memref<1x16x16x128xbf16, #tpu.memory_space<vmem>>, vector<1x16x16x128xbf16>
    %276 = vector.shape_cast %275 : vector<1x16x16x128xbf16> to vector<16x16x128xbf16>
    %277 = vector.shape_cast %274 : vector<16x16x128xbf16> to vector<1x16x16x128xbf16>
    tpu.vector_store %arg15[%c0_222, %c0_223, %c0_224, %c0_225], %277 {strides = array<i32>} : memref<1x16x16x128xbf16, #tpu.memory_space<vmem>>, vector<1x16x16x128xbf16>,
    %278 = arith.extui %0 : i1 to i32
    %c0_i32_226 = arith.constant 0 : i32
    %279 = arith.cmpi ne, %278, %c0_i32_226 : i32
    scf.if %279 {
      %cst_234 = arith.constant 0.000000e+00 : f32
      %288 = vector.broadcast %cst_234 : f32 to vector<1x128xf32>
      %c0_235 = arith.constant 0 : index
      %c0_236 = arith.constant 0 : index
      %c0_237 = arith.constant 0 : index
      %289 = vector.load %arg16[%c0_235, %c0_236, %c0_237] : memref<1x1x128xf32, #tpu.memory_space<vmem>>, vector<1x1x128xf32>
      %290 = vector.shape_cast %289 : vector<1x1x128xf32> to vector<1x128xf32>
      %291 = vector.shape_cast %288 : vector<1x128xf32> to vector<1x1x128xf32>
      tpu.vector_store %arg16[%c0_235, %c0_236, %c0_237], %291 {strides = array<i32>} : memref<1x1x128xf32, #tpu.memory_space<vmem>>, vector<1x1x128xf32>,
    } else {
    }
    %c0_227 = arith.constant 0 : index
    %c0_228 = arith.constant 0 : index
    %c0_229 = arith.constant 0 : index
    %280 = vector.load %arg16[%c0_227, %c0_228, %c0_229] : memref<1x1x128xf32, #tpu.memory_space<vmem>>, vector<1x1x128xf32>
    %281 = vector.shape_cast %280 : vector<1x1x128xf32> to vector<1x128xf32>
    %cst_230 = arith.constant dense<0.000000e+00> : vector<128xf32>
    %282 = vector.multi_reduction <add>, %272, %cst_230 [0] : vector<256x128xf32> to vector<128xf32>
    %283 = vector.shape_cast %282 : vector<128xf32> to vector<1x128xf32>
    %284 = arith.addf %281, %283 : vector<1x128xf32>
    %c0_231 = arith.constant 0 : index
    %c0_232 = arith.constant 0 : index
    %c0_233 = arith.constant 0 : index
    %285 = vector.load %arg16[%c0_231, %c0_232, %c0_233] : memref<1x1x128xf32, #tpu.memory_space<vmem>>, vector<1x1x128xf32>
    %286 = vector.shape_cast %285 : vector<1x1x128xf32> to vector<1x128xf32>
    %287 = vector.shape_cast %284 : vector<1x128xf32> to vector<1x1x128xf32>
    tpu.vector_store %arg16[%c0_231, %c0_232, %c0_233], %287 {strides = array<i32>} : memref<1x1x128xf32, #tpu.memory_space<vmem>>, vector<1x1x128xf32>,
    return
  }
  func.func @transform_0(%arg0: i32, %arg1: i32) -> (i32, i32, i32, i32) {
    %c0_i32 = arith.constant 0 : i32
    %c0_i32_0 = arith.constant 0 : i32
    %c0_i32_1 = arith.constant 0 : i32
    return %arg0, %arg1, %c0_i32, %c0_i32_0 : i32, i32, i32, i32
  }
  func.func @transform_1(%arg0: i32, %arg1: i32) -> (i32, i32, i32, i32) {
    %c8_i32 = arith.constant 8 : i32
    %0 = arith.muli %arg1, %c8_i32 : i32
    %c1_i32 = arith.constant 1 : i32
    %1 = arith.subi %0, %c1_i32 : i32
    %c0_i32 = arith.constant 0 : i32
    %2 = arith.maxsi %1, %c0_i32 : i32
    %c0_i32_0 = arith.constant 0 : i32
    %c0_i32_1 = arith.constant 0 : i32
    %c0_i32_2 = arith.constant 0 : i32
    return %arg0, %2, %c0_i32_0, %c0_i32_1 : i32, i32, i32, i32
  }
  func.func @transform_2(%arg0: i32, %arg1: i32) -> (i32, i32, i32, i32) {
    %c1_i32 = arith.constant 1 : i32
    %0 = arith.addi %arg1, %c1_i32 : i32
    %c8_i32 = arith.constant 8 : i32
    %1 = arith.muli %0, %c8_i32 : i32
    %c7_i32 = arith.constant 7 : i32
    %2 = arith.minsi %1, %c7_i32 : i32
    %c0_i32 = arith.constant 0 : i32
    %c0_i32_0 = arith.constant 0 : i32
    %c0_i32_1 = arith.constant 0 : i32
    return %arg0, %2, %c0_i32, %c0_i32_0 : i32, i32, i32, i32
  }
  func.func @transform_3(%arg0: i32, %arg1: i32) -> (i32, i32, i32, i32) {
    %c0_i32 = arith.constant 0 : i32
    %c0_i32_0 = arith.constant 0 : i32
    %c0_i32_1 = arith.constant 0 : i32
    return %arg0, %arg1, %c0_i32, %c0_i32_0 : i32, i32, i32, i32
  }
  func.func @transform_4(%arg0: i32, %arg1: i32) -> (i32, i32, i32, i32) {
    %c8_i32 = arith.constant 8 : i32
    %0 = arith.muli %arg1, %c8_i32 : i32
    %c1_i32 = arith.constant 1 : i32
    %1 = arith.subi %0, %c1_i32 : i32
    %c0_i32 = arith.constant 0 : i32
    %2 = arith.maxsi %1, %c0_i32 : i32
    %c0_i32_0 = arith.constant 0 : i32
    %c0_i32_1 = arith.constant 0 : i32
    %c0_i32_2 = arith.constant 0 : i32
    return %arg0, %2, %c0_i32_0, %c0_i32_1 : i32, i32, i32, i32
  }
  func.func @transform_5(%arg0: i32, %arg1: i32) -> (i32, i32, i32, i32) {
    %c1_i32 = arith.constant 1 : i32
    %0 = arith.addi %arg1, %c1_i32 : i32
    %c8_i32 = arith.constant 8 : i32
    %1 = arith.muli %0, %c8_i32 : i32
    %c7_i32 = arith.constant 7 : i32
    %2 = arith.minsi %1, %c7_i32 : i32
    %c0_i32 = arith.constant 0 : i32
    %c0_i32_0 = arith.constant 0 : i32
    %c0_i32_1 = arith.constant 0 : i32
    return %arg0, %2, %c0_i32, %c0_i32_0 : i32, i32, i32, i32
  }
  func.func @transform_6(%arg0: i32, %arg1: i32) -> (i32, i32, i32) {
    %c0_i32 = arith.constant 0 : i32
    %c0_i32_0 = arith.constant 0 : i32
    %c0_i32_1 = arith.constant 0 : i32
    %c0_i32_2 = arith.constant 0 : i32
    return %c0_i32, %c0_i32_0, %c0_i32_1 : i32, i32, i32
  }
  func.func @transform_7(%arg0: i32, %arg1: i32) -> (i32, i32, i32) {
    %c0_i32 = arith.constant 0 : i32
    %c0_i32_0 = arith.constant 0 : i32
    %c0_i32_1 = arith.constant 0 : i32
    %c0_i32_2 = arith.constant 0 : i32
    return %c0_i32, %c0_i32_0, %c0_i32_1 : i32, i32, i32
  }
  func.func @transform_8(%arg0: i32, %arg1: i32) -> (i32, i32) {
    %c0_i32 = arith.constant 0 : i32
    %c0_i32_0 = arith.constant 0 : i32
    %c0_i32_1 = arith.constant 0 : i32
    return %c0_i32, %c0_i32_0 : i32, i32
  }
  func.func @transform_9(%arg0: i32, %arg1: i32) -> (i32, i32) {
    %c0_i32 = arith.constant 0 : i32
    %c0_i32_0 = arith.constant 0 : i32
    %c0_i32_1 = arith.constant 0 : i32
    return %c0_i32, %c0_i32_0 : i32, i32
  }
  func.func @transform_10(%arg0: i32, %arg1: i32) -> (i32, i32, i32) {
    %c0_i32 = arith.constant 0 : i32
    %c0_i32_0 = arith.constant 0 : i32
    %c0_i32_1 = arith.constant 0 : i32
    %c0_i32_2 = arith.constant 0 : i32
    return %c0_i32, %c0_i32_0, %c0_i32_1 : i32, i32, i32
  }
  func.func @transform_11(%arg0: i32, %arg1: i32) -> (i32, i32) {
    %c0_i32 = arith.constant 0 : i32
    %c0_i32_0 = arith.constant 0 : i32
    %c0_i32_1 = arith.constant 0 : i32
    return %c0_i32, %c0_i32_0 : i32, i32
  }
  func.func @transform_12(%arg0: i32, %arg1: i32) -> (i32, i32) {
    %c0_i32 = arith.constant 0 : i32
    %c0_i32_0 = arith.constant 0 : i32
    %c0_i32_1 = arith.constant 0 : i32
    return %c0_i32, %c0_i32_0 : i32, i32
  }
  func.func @transform_13(%arg0: i32, %arg1: i32) -> (i32, i32, i32, i32) {
    %c0_i32 = arith.constant 0 : i32
    %c0_i32_0 = arith.constant 0 : i32
    %c0_i32_1 = arith.constant 0 : i32
    return %arg0, %arg1, %c0_i32, %c0_i32_0 : i32, i32, i32, i32
  }
  func.func @transform_14(%arg0: i32, %arg1: i32) -> (i32, i32, i32) {
    %c0_i32 = arith.constant 0 : i32
    %c0_i32_0 = arith.constant 0 : i32
    %c0_i32_1 = arith.constant 0 : i32
    return %arg0, %c0_i32, %c0_i32_0 : i32, i32, i32
  }
}

module attributes {stable_mosaic.version = 11 : i64} {
  func.func @scse_kernel(%arg0: i32, %arg1: i32, %arg2: memref<1x16x16x128xbf16, #tpu.memory_space<vmem>>, %arg3: memref<1x1x128xf32, #tpu.memory_space<vmem>>, %arg4: memref<1x128xf32, #tpu.memory_space<vmem>>, %arg5: memref<1x1xf32, #tpu.memory_space<smem>>, %arg6: memref<1x16x16x128xf32, #tpu.memory_space<vmem>>) attributes {dimension_semantics = [#tpu.dimension_semantics<parallel>, #tpu.dimension_semantics<parallel>], iteration_bounds = array<i64: 2, 1>, scalar_prefetch = 0 : i64, scratch_operands = 0 : i64, tpu.core_type = #tpu.core_type<tc>, window_params = [{transform_indices = @transform_0, window_bounds = array<i64: 1, 16, 16, 128>}, {transform_indices = @transform_1, window_bounds = array<i64: 1, 1, 128>}, {pipeline_mode = #tpu.pipeline_mode<synchronous>, transform_indices = @transform_2, window_bounds = array<i64: 1, 128>}, {transform_indices = @transform_3, window_bounds = array<i64: 1, 1>}, {transform_indices = @transform_4, window_bounds = array<i64: 1, 16, 16, 128>}]} {
    %c0 = arith.constant 0 : index
    %c0_0 = arith.constant 0 : index
    %c0_1 = arith.constant 0 : index
    %c0_2 = arith.constant 0 : index
    %0 = vector.load %arg2[%c0, %c0_0, %c0_1, %c0_2] : memref<1x16x16x128xbf16, #tpu.memory_space<vmem>>, vector<1x16x16x128xbf16>
    %1 = vector.shape_cast %0 : vector<1x16x16x128xbf16> to vector<16x16x128xbf16>
    %2 = arith.extf %1 : vector<16x16x128xbf16> to vector<16x16x128xf32>
    %c0_3 = arith.constant 0 : index
    %c0_4 = arith.constant 0 : index
    %3 = vector.load %arg4[%c0_3, %c0_4] : memref<1x128xf32, #tpu.memory_space<vmem>>, vector<1x128xf32>
    %4 = vector.shape_cast %3 : vector<1x128xf32> to vector<1x1x128xf32>
    %5 = vector.broadcast %4 : vector<1x1x128xf32> to vector<16x16x128xf32>
    %6 = arith.mulf %2, %5 : vector<16x16x128xf32>
    %cst = arith.constant dense<0.000000e+00> : vector<16x16xf32>
    %7 = vector.multi_reduction <add>, %6, %cst [2] : vector<16x16x128xf32> to vector<16x16xf32>
    %8 = vector.shape_cast %7 : vector<16x16xf32> to vector<16x16x1xf32>
    %c0_5 = arith.constant 0 : index
    %c0_6 = arith.constant 0 : index
    %9 = memref.load %arg5[%c0_5, %c0_6] : memref<1x1xf32, #tpu.memory_space<smem>>
    %10 = vector.broadcast %9 : f32 to vector<16x16x1xf32>
    %11 = arith.addf %8, %10 : vector<16x16x1xf32>
    %cst_7 = arith.constant 5.000000e-01 : f32
    %12 = vector.broadcast %cst_7 : f32 to vector<16x16x1xf32>
    %13 = arith.mulf %12, %11 : vector<16x16x1xf32>
    %14 = math.tanh %13 : vector<16x16x1xf32>
    %cst_8 = arith.constant 1.000000e+00 : f32
    %15 = vector.broadcast %cst_8 : f32 to vector<16x16x1xf32>
    %16 = arith.addf %14, %15 : vector<16x16x1xf32>
    %cst_9 = arith.constant 5.000000e-01 : f32
    %17 = vector.broadcast %cst_9 : f32 to vector<16x16x1xf32>
    %18 = arith.mulf %17, %16 : vector<16x16x1xf32>
    %c0_10 = arith.constant 0 : index
    %c0_11 = arith.constant 0 : index
    %c0_12 = arith.constant 0 : index
    %19 = vector.load %arg3[%c0_10, %c0_11, %c0_12] : memref<1x1x128xf32, #tpu.memory_space<vmem>>, vector<1x1x128xf32>
    %20 = vector.shape_cast %19 : vector<1x1x128xf32> to vector<1x128xf32>
    %21 = vector.shape_cast %20 : vector<1x128xf32> to vector<1x1x128xf32>
    %22 = vector.broadcast %21 : vector<1x1x128xf32> to vector<16x16x128xf32>
    %23 = vector.broadcast %18 : vector<16x16x1xf32> to vector<16x16x128xf32>
    %24 = arith.addf %22, %23 : vector<16x16x128xf32>
    %25 = arith.mulf %2, %24 : vector<16x16x128xf32>
    %c0_13 = arith.constant 0 : index
    %c0_14 = arith.constant 0 : index
    %c0_15 = arith.constant 0 : index
    %c0_16 = arith.constant 0 : index
    %26 = vector.load %arg6[%c0_13, %c0_14, %c0_15, %c0_16] : memref<1x16x16x128xf32, #tpu.memory_space<vmem>>, vector<1x16x16x128xf32>
    %27 = vector.shape_cast %26 : vector<1x16x16x128xf32> to vector<16x16x128xf32>
    %28 = vector.shape_cast %25 : vector<16x16x128xf32> to vector<1x16x16x128xf32>
    tpu.vector_store %arg6[%c0_13, %c0_14, %c0_15, %c0_16], %28 {strides = array<i32>} : memref<1x16x16x128xf32, #tpu.memory_space<vmem>>, vector<1x16x16x128xf32>,
    return
  }
  func.func @transform_0(%arg0: i32, %arg1: i32) -> (i32, i32, i32, i32) {
    %c0_i32 = arith.constant 0 : i32
    %c0_i32_0 = arith.constant 0 : i32
    %c0_i32_1 = arith.constant 0 : i32
    return %arg0, %arg1, %c0_i32, %c0_i32_0 : i32, i32, i32, i32
  }
  func.func @transform_1(%arg0: i32, %arg1: i32) -> (i32, i32, i32) {
    %c0_i32 = arith.constant 0 : i32
    %c0_i32_0 = arith.constant 0 : i32
    %c0_i32_1 = arith.constant 0 : i32
    return %arg0, %c0_i32, %c0_i32_0 : i32, i32, i32
  }
  func.func @transform_2(%arg0: i32, %arg1: i32) -> (i32, i32) {
    %c0_i32 = arith.constant 0 : i32
    %c0_i32_0 = arith.constant 0 : i32
    %c0_i32_1 = arith.constant 0 : i32
    return %c0_i32, %c0_i32_0 : i32, i32
  }
  func.func @transform_3(%arg0: i32, %arg1: i32) -> (i32, i32) {
    %c0_i32 = arith.constant 0 : i32
    %c0_i32_0 = arith.constant 0 : i32
    %c0_i32_1 = arith.constant 0 : i32
    return %c0_i32, %c0_i32_0 : i32, i32
  }
  func.func @transform_4(%arg0: i32, %arg1: i32) -> (i32, i32, i32, i32) {
    %c0_i32 = arith.constant 0 : i32
    %c0_i32_0 = arith.constant 0 : i32
    %c0_i32_1 = arith.constant 0 : i32
    return %arg0, %arg1, %c0_i32, %c0_i32_0 : i32, i32, i32, i32
  }
}

</mosaic_0001>

<bundles_post_ra>
// kernel: tile.8
= control target key start
LH: loop header
LB: loop body
LE: loop exit
PB: predicated region body
PF: predicated region fallthrough
CT: control target
= control target key end

     0   :  { %s22_s0 = inlined_call_operand.vmem [shape: f32[128], index: 0, kind: input, shape index: {}]   ;;  %s23_s1 = inlined_call_operand.vmem [shape: f32[2,128], index: 1, kind: output, shape index: {}]  }
   0x1   :  { %v4_v0 = vld [vmem:[%s22_s0] ss:$0 sm:$0xff] }
   0x2   :  { %5 = vst [vmem:[%s23_s1] sm:$0x3] %v4_v0 }

// kernel: upblock_forward.3
= control target key start
LH: loop header
LB: loop body
LE: loop exit
PB: predicated region body
PF: predicated region fallthrough
CT: control target
= control target key end

     0   :  { %s817_s12 = smov 0   ;;  %s819_s13 = smov 0   ;;  %s925_s0 = inlined_call_operand.vmem [shape: bf16[2,8,8,8], index: 0, kind: input, shape index: {}]   ;;  %s926_s1 = inlined_call_operand.vmem [shape: bf16[2,8,256], index: 1, kind: input, shape index: {}]   ;;  %s927_s2 = inlined_call_operand.vmem [shape: f32[1,256], index: 2, kind: input, shape index: {}]   ;;  %s928_s3 = inlined_call_operand.vmem [shape: bf16[2,8,2,8,256], index: 3, kind: output, shape index: {}]  }
   0x1   :  { %s821_s14 = smov 0  }
   0x2 LB: > { %s25_s15 = sadd.s32 1, %s790_s13  ;;  %p679_p0 = scmp.ge.s32.totalorder %s794_s14, 1  ;;  %s794_s14 = sphi %s821_s14, %s13_s14   ;;  %s790_s13 = sphi %s819_s13, %s930_s13   ;;  %s786_s12 = sphi %s817_s12, %s929_s12  }
   0x3   : > { %p27_p1 = scmp.ge.s32.totalorder %s25_s15, 2  ;;  %p158_p2 = scmp.lt.s32.totalorder %s794_s14, 3 }
   0x5   : > { %s932_s15 = smov (%p27_p1, %s25_s15), 0  ;;  %p159_p3 = pnand %p679_p0, %p158_p2 }
   0x6   : > { %v221_v0 = vld [vmem:[%s926_s1] sm:$0xff] (!%p159_p3)  ;;  %vm272_vm0 = vcmask (!%p159_p3), 1043456   ;;  %v695_v1 = vld [vmem:[%s926_s1 + $0x8] sm:$0xff] (!%p159_p3)  ;;  %p192_p4 = scmp.lt.s32.totalorder (!%p159_p3), %s786_s12, 1  ;;  %v796_v6 = vmov (!%p159_p3), 0   ;;  %vm259_vm1 = vcmask (!%p159_p3), 64512   ;;  %v224_v13 = vlaneseq (!%p159_p3) }
   0x7   : > { %162 = sbr.rel (%p159_p3) target bundleno = 262 (0x106), region = 32  ;;  %v689_v2 = vcombine.high (!%p159_p3), %v221_v0, %v221_v0  ;;  %v697_v3 = vcombine.high (!%p159_p3), %v695_v1, %v695_v1  ;;  %v688_v4 = vcombine.low (!%p159_p3), %v221_v0, %v221_v0  ;;  %v696_v5 = vcombine.low (!%p159_p3), %v695_v1, %v695_v1  ;;  %311 = vmatprep.mubr.bf16.mxu0 (!%p159_p3), %v796_v6  ;;  %v222_v16 = vld [vmem:[%s927_s2] sm:$0x3] (!%p159_p3) }
   0x8   : > { %397 = vmatprep.mubr.bf16.mxu1 (!%p159_p3), %v796_v6  ;;  %v225_v14 = vshrl.u32 (!%p159_p3), %v224_v13, 7 }
   0x9   : > { %690 = vmatprep.subr.msk.bf16.mxu0 (!%p159_p3), %vm272_vm0, %v689_v2  ;;  %698 = vmatprep.subr.msk.bf16.mxu1 (!%p159_p3), %vm272_vm0, %v697_v3  ;;  %v274_v7 = vsel (!%p159_p3), %vm272_vm0, %v688_v4, 0  ;;  %v360_v8 = vsel (!%p159_p3), %vm272_vm0, %v696_v5, 0 }
   0xa   : > { %280 = vmatpush1.bf16.msra.mxu0 (!%p159_p3), %v274_v7  ;;  %366 = vmatpush1.bf16.msra.mxu1 (!%p159_p3), %v360_v8  ;;  %v226_v15 = vsub.s32 (!%p159_p3), 0, %v225_v14  ;;  %v230_v17 = vsub.s32 (!%p159_p3), 1, %v225_v14 }
   0xc   : > { %v858_v18 = vrot.slane (!%p159_p3), %v222_v16, %v226_v15  ;;  %v860_v19 = vrot.slane (!%p159_p3), %v222_v16, %v230_v17 }
   0xe   : > { %s934_s12 = smov (!%p192_p4, %s786_s12), 1 }
   0xf   : > { %s721_s20 = sshll.u32 %s934_s12, 5  ;;  %s722_s26 = sshll.u32 %s934_s12, 7 }
  0x10   : > { %s199_s23 = scalar_lea.vmem %s925_s0, %s721_s20  ;;  %s870_s29 = scalar_lea.vmem %s928_s3, %s722_s26 }
  0x11   : > { %v768_v9 = vld [vmem:[%s199_s23] sm:$0xff]   ;;  %v769_v10 = vld [vmem:[%s199_s23 + $0x8] sm:$0xff]   ;;  %v770_v11 = vld [vmem:[%s199_s23 + $0x10] sm:$0xff]  }
  0x12   : > { %691 = vmatmul.mubr.msk.bf16.vlgmr.msra.gmra.mrb[0].mxu0 %vm259_vm1, %v768_v9  ;;  %699 = vmatmul.mubr.msk.bf16.vlgmr.msra.gmra.mrb[0].mxu1 %vm259_vm1, %v768_v9  ;;  %v771_v12 = vld [vmem:[%s199_s23 + $0x18] sm:$0xff]  }
  0x13   : > { %321 = vmatprep.mubr.bf16.mxu0 %v796_v6  ;;  %407 = vmatprep.mubr.bf16.mxu1 %v796_v6 }
  0x1a   : > { %692 = vmatmul.mubr.msk.bf16.gmra.mrb[4].mxu0 %vm259_vm1, %v769_v10  ;;  %700 = vmatmul.mubr.msk.bf16.gmra.mrb[4].mxu1 %vm259_vm1, %v769_v10 }
  0x1b   : > { %331 = vmatprep.mubr.bf16.mxu0 %v796_v6  ;;  %417 = vmatprep.mubr.bf16.mxu1 %v796_v6 }
  0x22   : > { %693 = vmatmul.mubr.msk.bf16.gmra.mrb[8].mxu0 %vm259_vm1, %v770_v11  ;;  %701 = vmatmul.mubr.msk.bf16.gmra.mrb[8].mxu1 %vm259_vm1, %v770_v11 }
  0x23   : > { %341 = vmatprep.mubr.bf16.mxu0 %v796_v6  ;;  %427 = vmatprep.mubr.bf16.mxu1 %v796_v6 }
  0x2a   : > { %694 = vmatmul.mubr.msk.bf16.gmra.mrb[12].mxu0 %vm259_vm1, %v771_v12  ;;  %702 = vmatmul.mubr.msk.bf16.gmra.mrb[12].mxu1 %vm259_vm1, %v771_v12 }
  0xe5   : > { %v313_v20 = vpop.f32.mrb[0].mxu0  ;;  %v399_v21 = vpop.f32.mrb[0].mxu1 }
  0xe6   : > { %v314_v22 = vadd.f32 %v313_v20, %v858_v18  ;;  %v400_v23 = vadd.f32 %v399_v21, %v858_v18  ;;  %v315_v24 = vpop.f32.mrb[1].mxu0  ;;  %v401_v25 = vpop.f32.mrb[1].mxu1 }
  0xe7   : > { %v316_v26 = vadd.f32 %v315_v24, %v860_v19  ;;  %v402_v27 = vadd.f32 %v401_v25, %v860_v19  ;;  %v317_v28 = vpop.f32.mrb[2].mxu0  ;;  %v403_v29 = vpop.f32.mrb[2].mxu1 }
  0xe8   : > { %v318_v30 = vadd.f32 %v317_v28, %v858_v18  ;;  %v404_v31 = vadd.f32 %v403_v29, %v858_v18  ;;  %v319_v32 = vpop.f32.mrb[3].mxu0  ;;  %v405_v33 = vpop.f32.mrb[3].mxu1 }
  0xe9   : > { %v723_v34 = vpack.c.bf16 %v316_v26, %v314_v22  ;;  %v724_v35 = vpack.c.bf16 %v402_v27, %v400_v23  ;;  %v320_v36 = vadd.f32 %v319_v32, %v860_v19  ;;  %v406_v37 = vadd.f32 %v405_v33, %v860_v19 }
  0xeb   : > { %566 = vst [vmem:[%s870_s29] sm:$0xff] %v723_v34  ;;  %567 = vst [vmem:[%s870_s29 + $0x8] sm:$0xff] %v724_v35  ;;  %v725_v38 = vpack.c.bf16 %v320_v36, %v318_v30  ;;  %v726_v39 = vpack.c.bf16 %v406_v37, %v404_v31 }
  0xed   : > { %568 = vst [vmem:[%s870_s29 + $0x10] sm:$0xff] %v725_v38  ;;  %569 = vst [vmem:[%s870_s29 + $0x18] sm:$0xff] %v726_v39  ;;  %v323_v40 = vpop.f32.mrb[4].mxu0  ;;  %v409_v41 = vpop.f32.mrb[4].mxu1 }
  0xee   : > { %v324_v42 = vadd.f32 %v323_v40, %v858_v18  ;;  %v410_v43 = vadd.f32 %v409_v41, %v858_v18  ;;  %v325_v44 = vpop.f32.mrb[5].mxu0  ;;  %v411_v45 = vpop.f32.mrb[5].mxu1 }
  0xef   : > { %v326_v46 = vadd.f32 %v325_v44, %v860_v19  ;;  %v412_v47 = vadd.f32 %v411_v45, %v860_v19  ;;  %v327_v48 = vpop.f32.mrb[6].mxu0  ;;  %v413_v49 = vpop.f32.mrb[6].mxu1 }
  0xf0   : > { %v328_v50 = vadd.f32 %v327_v48, %v858_v18  ;;  %v414_v51 = vadd.f32 %v413_v49, %v858_v18  ;;  %v329_v52 = vpop.f32.mrb[7].mxu0  ;;  %v415_v53 = vpop.f32.mrb[7].mxu1 }
  0xf1   : > { %v727_v54 = vpack.c.bf16 %v326_v46, %v324_v42  ;;  %v728_v55 = vpack.c.bf16 %v412_v47, %v410_v43  ;;  %v330_v56 = vadd.f32 %v329_v52, %v860_v19  ;;  %v416_v57 = vadd.f32 %v415_v53, %v860_v19 }
  0xf3   : > { %570 = vst [vmem:[%s870_s29 + $0x20] sm:$0xff] %v727_v54  ;;  %571 = vst [vmem:[%s870_s29 + $0x28] sm:$0xff] %v728_v55  ;;  %v729_v58 = vpack.c.bf16 %v330_v56, %v328_v50  ;;  %v730_v59 = vpack.c.bf16 %v416_v57, %v414_v51 }
  0xf5   : > { %572 = vst [vmem:[%s870_s29 + $0x30] sm:$0xff] %v729_v58  ;;  %573 = vst [vmem:[%s870_s29 + $0x38] sm:$0xff] %v730_v59  ;;  %v333_v60 = vpop.f32.mrb[8].mxu0  ;;  %v419_v61 = vpop.f32.mrb[8].mxu1 }
  0xf6   : > { %v334_v62 = vadd.f32 %v333_v60, %v858_v18  ;;  %v420_v63 = vadd.f32 %v419_v61, %v858_v18  ;;  %v335_v0 = vpop.f32.mrb[9].mxu0  ;;  %v421_v1 = vpop.f32.mrb[9].mxu1 }
  0xf7   : > { %v336_v2 = vadd.f32 %v335_v0, %v860_v19  ;;  %v422_v3 = vadd.f32 %v421_v1, %v860_v19  ;;  %v337_v4 = vpop.f32.mrb[10].mxu0  ;;  %v423_v5 = vpop.f32.mrb[10].mxu1 }
  0xf8   : > { %v338_v6 = vadd.f32 %v337_v4, %v858_v18  ;;  %v424_v7 = vadd.f32 %v423_v5, %v858_v18  ;;  %v339_v8 = vpop.f32.mrb[11].mxu0  ;;  %v425_v9 = vpop.f32.mrb[11].mxu1 }
  0xf9   : > { %v731_v10 = vpack.c.bf16 %v336_v2, %v334_v62  ;;  %v732_v11 = vpack.c.bf16 %v422_v3, %v420_v63  ;;  %v340_v12 = vadd.f32 %v339_v8, %v860_v19  ;;  %v426_v13 = vadd.f32 %v425_v9, %v860_v19 }
  0xfb   : > { %574 = vst [vmem:[%s870_s29 + $0x40] sm:$0xff] %v731_v10  ;;  %575 = vst [vmem:[%s870_s29 + $0x48] sm:$0xff] %v732_v11  ;;  %v733_v14 = vpack.c.bf16 %v340_v12, %v338_v6  ;;  %v734_v15 = vpack.c.bf16 %v426_v13, %v424_v7 }
  0xfd   : > { %576 = vst [vmem:[%s870_s29 + $0x50] sm:$0xff] %v733_v14  ;;  %577 = vst [vmem:[%s870_s29 + $0x58] sm:$0xff] %v734_v15  ;;  %v343_v16 = vpop.f32.mrb[12].mxu0  ;;  %v429_v17 = vpop.f32.mrb[12].mxu1 }
  0xfe   : > { %v344_v20 = vadd.f32 %v343_v16, %v858_v18  ;;  %v430_v21 = vadd.f32 %v429_v17, %v858_v18  ;;  %v345_v22 = vpop.f32.mrb[13].mxu0  ;;  %v431_v23 = vpop.f32.mrb[13].mxu1 }
  0xff   : > { %v346_v24 = vadd.f32 %v345_v22, %v860_v19  ;;  %v432_v25 = vadd.f32 %v431_v23, %v860_v19  ;;  %v347_v26 = vpop.f32.mrb[14].mxu0  ;;  %v433_v27 = vpop.f32.mrb[14].mxu1 }
 0x100   : > { %v348_v28 = vadd.f32 %v347_v26, %v858_v18  ;;  %v434_v29 = vadd.f32 %v433_v27, %v858_v18  ;;  %v349_v30 = vpop.f32.mrb[15].mxu0  ;;  %v435_v31 = vpop.f32.mrb[15].mxu1 }
 0x101   : > { %v735_v32 = vpack.c.bf16 %v346_v24, %v344_v20  ;;  %v736_v33 = vpack.c.bf16 %v432_v25, %v430_v21  ;;  %v350_v34 = vadd.f32 %v349_v30, %v860_v19  ;;  %v436_v35 = vadd.f32 %v435_v31, %v860_v19 }
 0x103   : > { %578 = vst [vmem:[%s870_s29 + $0x60] sm:$0xff] %v735_v32  ;;  %579 = vst [vmem:[%s870_s29 + $0x68] sm:$0xff] %v736_v33  ;;  %v737_v36 = vpack.c.bf16 %v350_v34, %v348_v28  ;;  %v738_v37 = vpack.c.bf16 %v436_v35, %v434_v29 }
 0x105   : > { %580 = vst [vmem:[%s870_s29 + $0x70] sm:$0xff] %v737_v36  ;;  %581 = vst [vmem:[%s870_s29 + $0x78] sm:$0xff] %v738_v37 }
 0x106 PF: > { %s13_s14 = sadd.s32 1, %s794_s14   ;;  %s929_s12 = smov %s790_s13 }
 0x107   : > { %p10_p5 = scmp.ge.s32.totalorder %s13_s14, 4   ;;  %s930_s13 = smov %s932_s15 }
 0x109   :  { %12 = sbr.rel (!%p10_p5) target bundleno = 2 (0x2), region = 63 }

// kernel: upblock_forward.5
= control target key start
LH: loop header
LB: loop body
LE: loop exit
PB: predicated region body
PF: predicated region fallthrough
CT: control target
= control target key end

     0   :  { %s1028_s17 = smov 0   ;;  %s1030_s18 = smov 0   ;;  %s1418_s0 = inlined_call_operand.vmem [shape: bf16[2,16,16,128], index: 0, kind: input, shape index: {}]   ;;  %s1419_s1 = inlined_call_operand.vmem [shape: f32[2,1,128], index: 1, kind: input, shape index: {}]   ;;  %s1420_s2 = inlined_call_operand.vmem [shape: f32[1,128], index: 2, kind: input, shape index: {}]   ;;  %s1421_s3 = inlined_call_operand.<no memory space> [shape: f32[1,1], index: 3, kind: input, shape index: {}]   ;;  %s1422_s4 = inlined_call_operand.vmem [shape: f32[2,16,16,128], index: 4, kind: output, shape index: {}]  }
   0x1   :  { %9 = sst [smem:[#allocation2]] %s1421_s3  ;;  %s1032_s19 = smov 0  }
   0x2 LB: > { %s27_s3 = sadd.s32 1, %s994_s18  ;;  %p798_p0 = scmp.ge.s32.totalorder %s998_s19, 1  ;;  %s998_s19 = sphi %s1032_s19, %s15_s19   ;;  %s994_s18 = sphi %s1030_s18, %s1436_s18   ;;  %s990_s17 = sphi %s1028_s17, %s1435_s17  }
   0x3   : > { %p29_p1 = scmp.ge.s32.totalorder %s27_s3, 2  ;;  %p193_p2 = scmp.lt.s32.totalorder %s998_s19, 3 }
   0x5   : > { %s1438_s3 = smov (%p29_p1, %s27_s3), 0  ;;  %p194_p3 = pnand %p798_p0, %p193_p2 }
   0x6   : > { %p233_p4 = scmp.lt.s32.totalorder (!%p194_p3), %s990_s17, 1  ;;  %v1060_v1 = vld [vmem:[%s1420_s2] ss:$0 sm:$0xff] (!%p194_p3)  ;;  %s424_s26 = sld [smem:[#allocation2]] (!%p194_p3) }
   0x7   : > { %197 = sbr.rel (%p194_p3) target bundleno = 249 (0xf9), region = 36 }
   0xe   : > { %s1440_s17 = smov (!%p233_p4, %s990_s17), 1 }
   0xf   : > { %s807_s20 = sshll.u32 %s1440_s17, 7  ;;  %s245_s29 = scalar_lea.vmem %s1419_s1, %s1440_s17 }
  0x10   : > { %s1052_s23 = scalar_lea.vmem %s1418_s0, %s807_s20  ;;  %s808_s30 = sshll.u32 %s1440_s17, 8 }
  0x11   : > { %v1055_v0 = vld [vmem:[%s1052_s23 + $0x8] sm:$0xff]   ;;  %v1063_v2 = vld [vmem:[%s1052_s23] sm:$0xff]   ;;  %v1070_v7 = vld [vmem:[%s1052_s23 + $0x10] sm:$0xff]   ;;  %s1258_s7 = scalar_lea.vmem %s1422_s4, %s808_s30 }
  0x12   : > { %v815_v3 = vunpack.c.l.bf16 %v1055_v0  ;;  %v811_v4 = vunpack.c.l.bf16 %v1063_v2  ;;  %v816_v5 = vunpack.c.h.bf16 %v1055_v0  ;;  %v812_v6 = vunpack.c.h.bf16 %v1063_v2  ;;  %v1087_v14 = vld [vmem:[%s1052_s23 + $0x18] sm:$0xff]   ;;  %v1098_v19 = vld [vmem:[%s1052_s23 + $0x20] sm:$0xff]   ;;  %v1109_v24 = vld [vmem:[%s1052_s23 + $0x28] sm:$0xff]  }
  0x13   : > { %v820_v12 = vunpack.c.h.bf16 %v1070_v7  ;;  %v819_v13 = vunpack.c.l.bf16 %v1070_v7  ;;  %v824_v17 = vunpack.c.h.bf16 %v1087_v14  ;;  %v823_v18 = vunpack.c.l.bf16 %v1087_v14  ;;  %v1120_v29 = vld [vmem:[%s1052_s23 + $0x30] sm:$0xff]   ;;  %v1131_v34 = vld [vmem:[%s1052_s23 + $0x38] sm:$0xff]   ;;  %v1142_v39 = vld [vmem:[%s1052_s23 + $0x40] sm:$0xff]  }
  0x14   : > { %v330_v8 = vmul.f32 %v815_v3, %v1060_v1  ;;  %v328_v9 = vmul.f32 %v811_v4, %v1060_v1  ;;  %v331_v10 = vmul.f32 %v816_v5, %v1060_v1  ;;  %v329_v11 = vmul.f32 %v812_v6, %v1060_v1  ;;  %v1153_v44 = vld [vmem:[%s1052_s23 + $0x48] sm:$0xff]   ;;  %v1164_v49 = vld [vmem:[%s1052_s23 + $0x50] sm:$0xff]   ;;  %v1175_v54 = vld [vmem:[%s1052_s23 + $0x58] sm:$0xff]  }
  0x15   : > { %v333_v15 = vmul.f32 %v820_v12, %v1060_v1  ;;  %v332_v16 = vmul.f32 %v819_v13, %v1060_v1  ;;  %v335_v20 = vmul.f32 %v824_v17, %v1060_v1  ;;  %v334_v21 = vmul.f32 %v823_v18, %v1060_v1  ;;  %v1186_v59 = vld [vmem:[%s1052_s23 + $0x60] sm:$0xff]  }
  0x16   : > { %364 = vadd.xlane.f32.xlu1 %v330_v8  ;;  %360 = vadd.xlane.f32.xlu0 %v328_v9  ;;  %v828_v22 = vunpack.c.h.bf16 %v1098_v19  ;;  %v827_v23 = vunpack.c.l.bf16 %v1098_v19  ;;  %v832_v27 = vunpack.c.h.bf16 %v1109_v24  ;;  %v831_v28 = vunpack.c.l.bf16 %v1109_v24  ;;  %v1197_v8 = vld [vmem:[%s1052_s23 + $0x68] sm:$0xff]  }
  0x17   : > { %v836_v32 = vunpack.c.h.bf16 %v1120_v29  ;;  %v835_v33 = vunpack.c.l.bf16 %v1120_v29  ;;  %v840_v37 = vunpack.c.h.bf16 %v1131_v34  ;;  %v839_v38 = vunpack.c.l.bf16 %v1131_v34 }
  0x18   : > { %v337_v25 = vmul.f32 %v828_v22, %v1060_v1  ;;  %v336_v26 = vmul.f32 %v827_v23, %v1060_v1  ;;  %v339_v30 = vmul.f32 %v832_v27, %v1060_v1  ;;  %v338_v31 = vmul.f32 %v831_v28, %v1060_v1 }
  0x19   : > { %v341_v35 = vmul.f32 %v836_v32, %v1060_v1  ;;  %v340_v36 = vmul.f32 %v835_v33, %v1060_v1  ;;  %v343_v40 = vmul.f32 %v840_v37, %v1060_v1  ;;  %v342_v41 = vmul.f32 %v839_v38, %v1060_v1 }
  0x1a   : > { %366 = vadd.xlane.f32.xlu1 %v331_v10  ;;  %362 = vadd.xlane.f32.xlu0 %v329_v11  ;;  %v844_v42 = vunpack.c.h.bf16 %v1142_v39  ;;  %v843_v43 = vunpack.c.l.bf16 %v1142_v39  ;;  %v848_v47 = vunpack.c.h.bf16 %v1153_v44  ;;  %v847_v48 = vunpack.c.l.bf16 %v1153_v44 }
  0x1b   : > { %v852_v52 = vunpack.c.h.bf16 %v1164_v49  ;;  %v851_v53 = vunpack.c.l.bf16 %v1164_v49  ;;  %v856_v57 = vunpack.c.h.bf16 %v1175_v54  ;;  %v855_v58 = vunpack.c.l.bf16 %v1175_v54 }
  0x1c   : > { %v345_v45 = vmul.f32 %v844_v42, %v1060_v1  ;;  %v344_v46 = vmul.f32 %v843_v43, %v1060_v1  ;;  %v347_v50 = vmul.f32 %v848_v47, %v1060_v1  ;;  %v346_v51 = vmul.f32 %v847_v48, %v1060_v1 }
  0x1d   : > { %v349_v55 = vmul.f32 %v852_v52, %v1060_v1  ;;  %v348_v56 = vmul.f32 %v851_v53, %v1060_v1  ;;  %v351_v60 = vmul.f32 %v856_v57, %v1060_v1  ;;  %v350_v61 = vmul.f32 %v855_v58, %v1060_v1 }
  0x1e   : > { %370 = vadd.xlane.f32.xlu1 %v333_v15  ;;  %368 = vadd.xlane.f32.xlu0 %v332_v16  ;;  %v860_v62 = vunpack.c.h.bf16 %v1186_v59  ;;  %v859_v63 = vunpack.c.l.bf16 %v1186_v59  ;;  %v1428_v11 = vunpack.c.h.bf16 %v1197_v8  ;;  %v1427_v15 = vunpack.c.l.bf16 %v1197_v8  ;;  %v1208_v16 = vld [vmem:[%s1052_s23 + $0x70] sm:$0xff]  }
  0x1f   : > { %v1430_v59 = vunpack.c.l.bf16 %v1197_v8 }
  0x20   : > { %v353_v9 = vmul.f32 %v860_v62, %v1060_v1  ;;  %v352_v10 = vmul.f32 %v859_v63, %v1060_v1 }
  0x22   : > { %374 = vadd.xlane.f32.xlu1 %v335_v20  ;;  %372 = vadd.xlane.f32.xlu0 %v334_v21  ;;  %v355_v20 = vmul.f32 %v1428_v11, %v1060_v1  ;;  %v354_v21 = vmul.f32 %v1427_v15, %v1060_v1 }
  0x26   : > { %378 = vadd.xlane.f32.xlu1 %v337_v25  ;;  %376 = vadd.xlane.f32.xlu0 %v336_v26  ;;  %v1426_v25 = vunpack.c.h.bf16 %v1208_v16  ;;  %v1425_v26 = vunpack.c.l.bf16 %v1208_v16 }
  0x2a   : > { %382 = vadd.xlane.f32.xlu1 %v339_v30  ;;  %380 = vadd.xlane.f32.xlu0 %v338_v31  ;;  %v1219_v30 = vld [vmem:[%s1052_s23 + $0x78] sm:$0xff]   ;;  %v357_v31 = vmul.f32 %v1426_v25, %v1060_v1 }
  0x2e   : > { %386 = vadd.xlane.f32.xlu1 %v341_v35  ;;  %384 = vadd.xlane.f32.xlu0 %v340_v36  ;;  %v356_v35 = vmul.f32 %v1425_v26, %v1060_v1  ;;  %v1424_v36 = vunpack.c.h.bf16 %v1219_v30 }
  0x32   : > { %390 = vadd.xlane.f32.xlu1 %v343_v40  ;;  %388 = vadd.xlane.f32.xlu0 %v342_v41  ;;  %v1423_v40 = vunpack.c.l.bf16 %v1219_v30  ;;  %v359_v41 = vmul.f32 %v1424_v36, %v1060_v1 }
  0x36   : > { %394 = vadd.xlane.f32.xlu1 %v345_v45  ;;  %392 = vadd.xlane.f32.xlu0 %v344_v46  ;;  %v358_v45 = vmul.f32 %v1423_v40, %v1060_v1  ;;  %v1235_v46 = vstv %s424_s26 }
  0x3a   : > { %398 = vadd.xlane.f32.xlu1 %v347_v50  ;;  %396 = vadd.xlane.f32.xlu0 %v346_v51 }
  0x3e   : > { %402 = vadd.xlane.f32.xlu1 %v349_v55  ;;  %400 = vadd.xlane.f32.xlu0 %v348_v56 }
  0x42   : > { %406 = vadd.xlane.f32.xlu1 %v351_v60  ;;  %404 = vadd.xlane.f32.xlu0 %v350_v61 }
  0x46   : > { %410 = vadd.xlane.f32.xlu1 %v353_v9  ;;  %408 = vadd.xlane.f32.xlu0 %v352_v10 }
  0x4a   : > { %414 = vadd.xlane.f32.xlu1 %v355_v20  ;;  %412 = vadd.xlane.f32.xlu0 %v354_v21 }
  0x4e   : > { %418 = vadd.xlane.f32.xlu1 %v357_v31  ;;  %416 = vadd.xlane.f32.xlu0 %v356_v35 }
  0x52   : > { %422 = vadd.xlane.f32.xlu1 %v359_v41  ;;  %420 = vadd.xlane.f32.xlu0 %v358_v45 }
  0xa3   : > { %v365_v50 = vpop.xlane.xlu1 %364  ;;  %v361_v51 = vpop.xlane.xlu0 %360 }
  0xa4   : > { %v428_v55 = vadd.f32 %v1235_v46, %v365_v50  ;;  %v426_v56 = vadd.f32 %v1235_v46, %v361_v51 }
  0xa6   : > { %v460_v60 = vmul.f32 0.5, %v428_v55  ;;  %v458_v61 = vmul.f32 0.5, %v426_v56 }
  0xa7   : > { %v367_v9 = vpop.xlane.xlu1 %366  ;;  %v363_v10 = vpop.xlane.xlu0 %362 }
  0xa8   : > { %912 = vtanh.f32 %v460_v60  ;;  %v429_v20 = vadd.f32 %v1235_v46, %v367_v9  ;;  %v427_v1 = vadd.f32 %v1235_v46, %v363_v10 }
  0xa9   : > { %914 = vtanh.f32 %v458_v61 }
  0xaa   : > { %v461_v21 = vmul.f32 0.5, %v429_v20  ;;  %v459_v31 = vmul.f32 0.5, %v427_v1 }
  0xab   : > { %v371_v35 = vpop.xlane.xlu1 %370  ;;  %v369_v41 = vpop.xlane.xlu0 %368 }
  0xac   : > { %916 = vtanh.f32 %v461_v21  ;;  %v431_v45 = vadd.f32 %v1235_v46, %v371_v35  ;;  %v430_v50 = vadd.f32 %v1235_v46, %v369_v41 }
  0xad   : > { %918 = vtanh.f32 %v459_v31 }
  0xae   : > { %v463_v51 = vmul.f32 0.5, %v431_v45  ;;  %v462_v55 = vmul.f32 0.5, %v430_v50  ;;  %v1249_v45 = vld [vmem:[%s245_s29] ss:$0 sm:$0xff] }
  0xaf   : > { %v375_v56 = vpop.xlane.xlu1 %374  ;;  %v373_v60 = vpop.xlane.xlu0 %372 }
  0xb0   : > { %920 = vtanh.f32 %v463_v51  ;;  %v433_v9 = vadd.f32 %v1235_v46, %v375_v56  ;;  %v432_v61 = vadd.f32 %v1235_v46, %v373_v60 }
  0xb1   : > { %922 = vtanh.f32 %v462_v55 }
  0xb2   : > { %v913_v10 = vpop.eup %912  ;;  %v465_v20 = vmul.f32 0.5, %v433_v9  ;;  %v464_v1 = vmul.f32 0.5, %v432_v61 }
  0xb3   : > { %v915_v21 = vpop.eup %914  ;;  %v524_v31 = vadd.f32 1.0, %v913_v10  ;;  %v379_v35 = vpop.xlane.xlu1 %378 }
  0xb4   : > { %v377_v41 = vpop.xlane.xlu0 %376  ;;  %v522_v50 = vadd.f32 1.0, %v915_v21  ;;  %924 = vtanh.f32 %v465_v20  ;;  %v435_v51 = vadd.f32 %v1235_v46, %v379_v35 }
  0xb5   : > { %v434_v56 = vadd.f32 %v1235_v46, %v377_v41  ;;  %v556_v60 = vmul.f32 0.5, %v524_v31  ;;  %926 = vtanh.f32 %v464_v1 }
  0xb6   : > { %v917_v40 = vpop.eup %916  ;;  %v554_v55 = vmul.f32 0.5, %v522_v50  ;;  %v467_v36 = vmul.f32 0.5, %v435_v51 }
  0xb7   : > { %v466_v9 = vmul.f32 0.5, %v434_v56  ;;  %v919_v61 = vpop.eup %918  ;;  %v595_v10 = vadd.f32 %v1249_v45, %v556_v60  ;;  %v525_v26 = vadd.f32 1.0, %v917_v40  ;;  %v383_v25 = vpop.xlane.xlu1 %382 }
  0xb8   : > { %v381_v15 = vpop.xlane.xlu0 %380  ;;  %v593_v20 = vadd.f32 %v1249_v45, %v554_v55  ;;  %v523_v21 = vadd.f32 1.0, %v919_v61  ;;  %928 = vtanh.f32 %v467_v36  ;;  %v437_v1 = vadd.f32 %v1235_v46, %v383_v25 }
  0xb9   : > { %v627_v31 = vmul.f32 %v815_v3, %v595_v10  ;;  %v557_v35 = vmul.f32 0.5, %v525_v26  ;;  %930 = vtanh.f32 %v466_v9  ;;  %v436_v40 = vadd.f32 %v1235_v46, %v381_v15 }
  0xba   : > { %v921_v41 = vpop.eup %920  ;;  %v625_v50 = vmul.f32 %v811_v4, %v593_v20  ;;  %v555_v51 = vmul.f32 0.5, %v523_v21  ;;  %v469_v56 = vmul.f32 0.5, %v437_v1 }
  0xbb   : > { %v923_v60 = vpop.eup %922  ;;  %659 = vst [vmem:[%s1258_s7 + $0x10] sm:$0xff] %v627_v31  ;;  %v596_v36 = vadd.f32 %v1249_v45, %v557_v35  ;;  %v527_v55 = vadd.f32 1.0, %v921_v41  ;;  %v468_v25 = vmul.f32 0.5, %v436_v40  ;;  %v387_v61 = vpop.xlane.xlu1 %386 }
  0xbc   : > { %v385_v11 = vpop.xlane.xlu0 %384  ;;  %657 = vst [vmem:[%s1258_s7] sm:$0xff] %v625_v50  ;;  %v594_v3 = vadd.f32 %v1249_v45, %v555_v51  ;;  %v526_v26 = vadd.f32 1.0, %v923_v60  ;;  %932 = vtanh.f32 %v469_v56  ;;  %v439_v15 = vadd.f32 %v1235_v46, %v387_v61 }
  0xbd   : > { %v628_v4 = vmul.f32 %v816_v5, %v596_v36  ;;  %v559_v9 = vmul.f32 0.5, %v527_v55  ;;  %934 = vtanh.f32 %v468_v25  ;;  %v438_v10 = vadd.f32 %v1235_v46, %v385_v11 }
  0xbe   : > { %v925_v20 = vpop.eup %924  ;;  %v626_v21 = vmul.f32 %v812_v6, %v594_v3  ;;  %v558_v1 = vmul.f32 0.5, %v526_v26  ;;  %v471_v31 = vmul.f32 0.5, %v439_v15 }
  0xbf   : > { %v927_v35 = vpop.eup %926  ;;  %660 = vst [vmem:[%s1258_s7 + $0x18] sm:$0xff] %v628_v4  ;;  %v598_v40 = vadd.f32 %v1249_v45, %v559_v9  ;;  %v529_v41 = vadd.f32 1.0, %v925_v20  ;;  %v470_v50 = vmul.f32 0.5, %v438_v10  ;;  %v391_v51 = vpop.xlane.xlu1 %390 }
  0xc0   : > { %v389_v0 = vpop.xlane.xlu0 %388  ;;  %658 = vst [vmem:[%s1258_s7 + $0x8] sm:$0xff] %v626_v21  ;;  %v597_v5 = vadd.f32 %v1249_v45, %v558_v1  ;;  %v528_v56 = vadd.f32 1.0, %v927_v35  ;;  %936 = vtanh.f32 %v471_v31  ;;  %v441_v11 = vadd.f32 %v1235_v46, %v391_v51 }
  0xc1   : > { %v630_v2 = vmul.f32 %v820_v12, %v598_v40  ;;  %v561_v6 = vmul.f32 0.5, %v529_v41  ;;  %938 = vtanh.f32 %v470_v50  ;;  %v440_v60 = vadd.f32 %v1235_v46, %v389_v0 }
  0xc2   : > { %v929_v36 = vpop.eup %928  ;;  %v629_v55 = vmul.f32 %v819_v13, %v597_v5  ;;  %v560_v25 = vmul.f32 0.5, %v528_v56  ;;  %v473_v61 = vmul.f32 0.5, %v441_v11 }
  0xc3   : > { %v931_v3 = vpop.eup %930  ;;  %662 = vst [vmem:[%s1258_s7 + $0x28] sm:$0xff] %v630_v2  ;;  %v600_v26 = vadd.f32 %v1249_v45, %v561_v6  ;;  %v531_v15 = vadd.f32 1.0, %v929_v36  ;;  %v472_v4 = vmul.f32 0.5, %v440_v60  ;;  %v395_v9 = vpop.xlane.xlu1 %394 }
  0xc4   : > { %v393_v10 = vpop.xlane.xlu0 %392  ;;  %661 = vst [vmem:[%s1258_s7 + $0x20] sm:$0xff] %v629_v55  ;;  %v599_v12 = vadd.f32 %v1249_v45, %v560_v25  ;;  %v530_v20 = vadd.f32 1.0, %v931_v3  ;;  %940 = vtanh.f32 %v473_v61  ;;  %v443_v21 = vadd.f32 %v1235_v46, %v395_v9 }
  0xc5   : > { %v632_v7 = vmul.f32 %v824_v17, %v600_v26  ;;  %v563_v13 = vmul.f32 0.5, %v531_v15  ;;  %942 = vtanh.f32 %v472_v4  ;;  %v442_v1 = vadd.f32 %v1235_v46, %v393_v10 }
  0xc6   : > { %v933_v31 = vpop.eup %932  ;;  %v631_v35 = vmul.f32 %v823_v18, %v599_v12  ;;  %v562_v40 = vmul.f32 0.5, %v530_v20  ;;  %v475_v41 = vmul.f32 0.5, %v443_v21 }
  0xc7   : > { %v935_v50 = vpop.eup %934  ;;  %664 = vst [vmem:[%s1258_s7 + $0x38] sm:$0xff] %v632_v7  ;;  %v602_v51 = vadd.f32 %v1249_v45, %v563_v13  ;;  %v533_v0 = vadd.f32 1.0, %v933_v31  ;;  %v474_v5 = vmul.f32 0.5, %v442_v1  ;;  %v399_v56 = vpop.xlane.xlu1 %398 }
  0xc8   : > { %v397_v11 = vpop.xlane.xlu0 %396  ;;  %663 = vst [vmem:[%s1258_s7 + $0x30] sm:$0xff] %v631_v35  ;;  %v601_v17 = vadd.f32 %v1249_v45, %v562_v40  ;;  %v532_v2 = vadd.f32 1.0, %v935_v50  ;;  %944 = vtanh.f32 %v475_v41  ;;  %v445_v6 = vadd.f32 %v1235_v46, %v399_v56 }
  0xc9   : > { %v634_v14 = vmul.f32 %v828_v22, %v602_v51  ;;  %v565_v18 = vmul.f32 0.5, %v533_v0  ;;  %946 = vtanh.f32 %v474_v5  ;;  %v444_v60 = vadd.f32 %v1235_v46, %v397_v11 }
  0xca   : > { %v937_v36 = vpop.eup %936  ;;  %v633_v55 = vmul.f32 %v827_v23, %v601_v17  ;;  %v564_v25 = vmul.f32 0.5, %v532_v2  ;;  %v477_v61 = vmul.f32 0.5, %v445_v6 }
  0xcb   : > { %v939_v3 = vpop.eup %938  ;;  %666 = vst [vmem:[%s1258_s7 + $0x48] sm:$0xff] %v634_v14  ;;  %v604_v26 = vadd.f32 %v1249_v45, %v565_v18  ;;  %v535_v15 = vadd.f32 1.0, %v937_v36  ;;  %v476_v4 = vmul.f32 0.5, %v444_v60  ;;  %v403_v9 = vpop.xlane.xlu1 %402 }
  0xcc   : > { %v401_v10 = vpop.xlane.xlu0 %400  ;;  %665 = vst [vmem:[%s1258_s7 + $0x40] sm:$0xff] %v633_v55  ;;  %v603_v22 = vadd.f32 %v1249_v45, %v564_v25  ;;  %v534_v12 = vadd.f32 1.0, %v939_v3  ;;  %948 = vtanh.f32 %v477_v61  ;;  %v447_v20 = vadd.f32 %v1235_v46, %v403_v9 }
  0xcd   : > { %v636_v19 = vmul.f32 %v832_v27, %v604_v26  ;;  %v567_v23 = vmul.f32 0.5, %v535_v15  ;;  %950 = vtanh.f32 %v476_v4  ;;  %v446_v21 = vadd.f32 %v1235_v46, %v401_v10 }
  0xce   : > { %v941_v7 = vpop.eup %940  ;;  %v635_v13 = vmul.f32 %v831_v28, %v603_v22  ;;  %v566_v1 = vmul.f32 0.5, %v534_v12  ;;  %v479_v31 = vmul.f32 0.5, %v447_v20 }
  0xcf   : > { %v943_v35 = vpop.eup %942  ;;  %668 = vst [vmem:[%s1258_s7 + $0x58] sm:$0xff] %v636_v19  ;;  %v606_v40 = vadd.f32 %v1249_v45, %v567_v23  ;;  %v537_v41 = vadd.f32 1.0, %v941_v7  ;;  %v478_v50 = vmul.f32 0.5, %v446_v21  ;;  %v407_v51 = vpop.xlane.xlu1 %406 }
  0xd0   : > { %v405_v0 = vpop.xlane.xlu0 %404  ;;  %667 = vst [vmem:[%s1258_s7 + $0x50] sm:$0xff] %v635_v13  ;;  %v605_v27 = vadd.f32 %v1249_v45, %v566_v1  ;;  %v536_v5 = vadd.f32 1.0, %v943_v35  ;;  %952 = vtanh.f32 %v479_v31  ;;  %v449_v56 = vadd.f32 %v1235_v46, %v407_v51 }
  0xd1   : > { %v638_v24 = vmul.f32 %v836_v32, %v606_v40  ;;  %v569_v28 = vmul.f32 0.5, %v537_v41  ;;  %954 = vtanh.f32 %v478_v50  ;;  %v448_v11 = vadd.f32 %v1235_v46, %v405_v0 }
  0xd2   : > { %v945_v17 = vpop.eup %944  ;;  %v637_v2 = vmul.f32 %v835_v33, %v605_v27  ;;  %v568_v6 = vmul.f32 0.5, %v536_v5  ;;  %v481_v14 = vmul.f32 0.5, %v449_v56 }
  0xd3   : > { %v947_v18 = vpop.eup %946  ;;  %670 = vst [vmem:[%s1258_s7 + $0x68] sm:$0xff] %v638_v24  ;;  %v608_v60 = vadd.f32 %v1249_v45, %v569_v28  ;;  %v539_v36 = vadd.f32 1.0, %v945_v17  ;;  %v480_v55 = vmul.f32 0.5, %v448_v11  ;;  %v411_v25 = vpop.xlane.xlu1 %410 }
  0xd4   : > { %v409_v61 = vpop.xlane.xlu0 %408  ;;  %669 = vst [vmem:[%s1258_s7 + $0x60] sm:$0xff] %v637_v2  ;;  %v607_v32 = vadd.f32 %v1249_v45, %v568_v6  ;;  %v538_v3 = vadd.f32 1.0, %v947_v18  ;;  %956 = vtanh.f32 %v481_v14  ;;  %v451_v26 = vadd.f32 %v1235_v46, %v411_v25 }
  0xd5   : > { %v640_v29 = vmul.f32 %v840_v37, %v608_v60  ;;  %v571_v33 = vmul.f32 0.5, %v539_v36  ;;  %958 = vtanh.f32 %v480_v55  ;;  %v450_v15 = vadd.f32 %v1235_v46, %v409_v61 }
  0xd6   : > { %v949_v4 = vpop.eup %948  ;;  %v639_v9 = vmul.f32 %v839_v38, %v607_v32  ;;  %v570_v10 = vmul.f32 0.5, %v538_v3  ;;  %v483_v22 = vmul.f32 0.5, %v451_v26 }
  0xd7   : > { %v951_v12 = vpop.eup %950  ;;  %672 = vst [vmem:[%s1258_s7 + $0x78] sm:$0xff] %v640_v29  ;;  %v610_v20 = vadd.f32 %v1249_v45, %v571_v33  ;;  %v541_v19 = vadd.f32 1.0, %v949_v4  ;;  %v482_v23 = vmul.f32 0.5, %v450_v15  ;;  %v415_v21 = vpop.xlane.xlu1 %414 }
  0xd8   : > { %v413_v7 = vpop.xlane.xlu0 %412  ;;  %671 = vst [vmem:[%s1258_s7 + $0x70] sm:$0xff] %v639_v9  ;;  %v609_v37 = vadd.f32 %v1249_v45, %v570_v10  ;;  %v540_v13 = vadd.f32 1.0, %v951_v12  ;;  %960 = vtanh.f32 %v483_v22  ;;  %v453_v1 = vadd.f32 %v1235_v46, %v415_v21 }
  0xd9   : > { %v642_v34 = vmul.f32 %v844_v42, %v610_v20  ;;  %v573_v38 = vmul.f32 0.5, %v541_v19  ;;  %962 = vtanh.f32 %v482_v23  ;;  %v452_v31 = vadd.f32 %v1235_v46, %v413_v7 }
  0xda   : > { %v953_v35 = vpop.eup %952  ;;  %v641_v40 = vmul.f32 %v843_v43, %v609_v37  ;;  %v572_v41 = vmul.f32 0.5, %v540_v13  ;;  %v485_v50 = vmul.f32 0.5, %v453_v1 }
  0xdb   : > { %v955_v51 = vpop.eup %954  ;;  %674 = vst [vmem:[%s1258_s7 + $0x88] sm:$0xff] %v642_v34  ;;  %v612_v0 = vadd.f32 %v1249_v45, %v573_v38  ;;  %v543_v27 = vadd.f32 1.0, %v953_v35  ;;  %v484_v5 = vmul.f32 0.5, %v452_v31  ;;  %v419_v56 = vpop.xlane.xlu1 %418 }
  0xdc   : > { %v417_v24 = vpop.xlane.xlu0 %416  ;;  %673 = vst [vmem:[%s1258_s7 + $0x80] sm:$0xff] %v641_v40  ;;  %v611_v42 = vadd.f32 %v1249_v45, %v572_v41  ;;  %v542_v28 = vadd.f32 1.0, %v955_v51  ;;  %964 = vtanh.f32 %v485_v50  ;;  %v455_v11 = vadd.f32 %v1235_v46, %v419_v56 }
  0xdd   : > { %v644_v39 = vmul.f32 %v848_v47, %v612_v0  ;;  %v575_v43 = vmul.f32 0.5, %v543_v27  ;;  %966 = vtanh.f32 %v484_v5  ;;  %v454_v17 = vadd.f32 %v1235_v46, %v417_v24 }
  0xde   : > { %v957_v2 = vpop.eup %956  ;;  %v643_v6 = vmul.f32 %v847_v48, %v611_v42  ;;  %v574_v14 = vmul.f32 0.5, %v542_v28  ;;  %v487_v18 = vmul.f32 0.5, %v455_v11  ;;  %v1429_v0 = vunpack.c.h.bf16 %v1197_v8 }
  0xdf   : > { %v959_v60 = vpop.eup %958  ;;  %676 = vst [vmem:[%s1258_s7 + $0x98] sm:$0xff] %v644_v39  ;;  %v614_v36 = vadd.f32 %v1249_v45, %v575_v43  ;;  %v545_v55 = vadd.f32 1.0, %v957_v2  ;;  %v486_v25 = vmul.f32 0.5, %v454_v17  ;;  %v423_v61 = vpop.xlane.xlu1 %422  ;;  %v1431_v43 = vunpack.c.h.bf16 %v1208_v16 }
  0xe0   : > { %v421_v32 = vpop.xlane.xlu0 %420  ;;  %675 = vst [vmem:[%s1258_s7 + $0x90] sm:$0xff] %v643_v6  ;;  %v613_v47 = vadd.f32 %v1249_v45, %v574_v14  ;;  %v544_v3 = vadd.f32 1.0, %v959_v60  ;;  %968 = vtanh.f32 %v487_v18  ;;  %v457_v44 = vadd.f32 %v1235_v46, %v423_v61 }
  0xe1   : > { %v646_v48 = vmul.f32 %v852_v52, %v614_v36  ;;  %v577_v26 = vmul.f32 0.5, %v545_v55  ;;  %970 = vtanh.f32 %v486_v25  ;;  %v456_v29 = vadd.f32 %v1235_v46, %v421_v32 }
  0xe2   : > { %v961_v33 = vpop.eup %960  ;;  %v645_v15 = vmul.f32 %v851_v53, %v613_v47  ;;  %v576_v4 = vmul.f32 0.5, %v544_v3  ;;  %v489_v9 = vmul.f32 0.5, %v457_v44  ;;  %v1432_v8 = vunpack.c.l.bf16 %v1208_v16 }
  0xe3   : > { %v963_v10 = vpop.eup %962  ;;  %678 = vst [vmem:[%s1258_s7 + $0xa8] sm:$0xff] %v646_v48  ;;  %v616_v22 = vadd.f32 %v1249_v45, %v577_v26  ;;  %v547_v12 = vadd.f32 1.0, %v961_v33  ;;  %v488_v20 = vmul.f32 0.5, %v456_v29  ;;  %v1433_v36 = vunpack.c.h.bf16 %v1219_v30 }
  0xe4   : > { %677 = vst [vmem:[%s1258_s7 + $0xa0] sm:$0xff] %v645_v15  ;;  %v615_v52 = vadd.f32 %v1249_v45, %v576_v4  ;;  %v546_v19 = vadd.f32 1.0, %v963_v10  ;;  %972 = vtanh.f32 %v489_v9  ;;  %v1434_v25 = vunpack.c.l.bf16 %v1219_v30 }
  0xe5   : > { %v648_v46 = vmul.f32 %v856_v57, %v616_v22  ;;  %v579_v49 = vmul.f32 0.5, %v547_v12  ;;  %974 = vtanh.f32 %v488_v20 }
  0xe6   : > { %v965_v53 = vpop.eup %964  ;;  %v647_v23 = vmul.f32 %v855_v58, %v615_v52  ;;  %v578_v21 = vmul.f32 0.5, %v546_v19 }
  0xe7   : > { %v967_v7 = vpop.eup %966  ;;  %680 = vst [vmem:[%s1258_s7 + $0xb8] sm:$0xff] %v648_v46  ;;  %v618_v37 = vadd.f32 %v1249_v45, %v579_v49  ;;  %v549_v13 = vadd.f32 1.0, %v965_v53 }
  0xe8   : > { %679 = vst [vmem:[%s1258_s7 + $0xb0] sm:$0xff] %v647_v23  ;;  %v617_v1 = vadd.f32 %v1249_v45, %v578_v21  ;;  %v548_v34 = vadd.f32 1.0, %v967_v7 }
  0xe9   : > { %v650_v57 = vmul.f32 %v860_v62, %v618_v37  ;;  %v581_v38 = vmul.f32 0.5, %v549_v13 }
  0xea   : > { %v969_v31 = vpop.eup %968  ;;  %v649_v54 = vmul.f32 %v859_v63, %v617_v1  ;;  %v580_v58 = vmul.f32 0.5, %v548_v34 }
  0xeb   : > { %v971_v35 = vpop.eup %970  ;;  %682 = vst [vmem:[%s1258_s7 + $0xc8] sm:$0xff] %v650_v57  ;;  %v620_v40 = vadd.f32 %v1249_v45, %v581_v38  ;;  %v551_v41 = vadd.f32 1.0, %v969_v31 }
  0xec   : > { %681 = vst [vmem:[%s1258_s7 + $0xc0] sm:$0xff] %v649_v54  ;;  %v619_v50 = vadd.f32 %v1249_v45, %v580_v58  ;;  %v550_v51 = vadd.f32 1.0, %v971_v35 }
  0xed   : > { %v652_v62 = vmul.f32 %v1429_v0, %v620_v40  ;;  %v583_v27 = vmul.f32 0.5, %v551_v41 }
  0xee   : > { %v973_v5 = vpop.eup %972  ;;  %v651_v63 = vmul.f32 %v1430_v59, %v619_v50  ;;  %v582_v56 = vmul.f32 0.5, %v550_v51 }
  0xef   : > { %v975_v24 = vpop.eup %974  ;;  %684 = vst [vmem:[%s1258_s7 + $0xd8] sm:$0xff] %v652_v62  ;;  %v622_v42 = vadd.f32 %v1249_v45, %v583_v27  ;;  %v553_v28 = vadd.f32 1.0, %v973_v5 }
  0xf0   : > { %683 = vst [vmem:[%s1258_s7 + $0xd0] sm:$0xff] %v651_v63  ;;  %v621_v11 = vadd.f32 %v1249_v45, %v582_v56  ;;  %v552_v39 = vadd.f32 1.0, %v975_v24 }
  0xf1   : > { %v654_v17 = vmul.f32 %v1431_v43, %v622_v42  ;;  %v585_v2 = vmul.f32 0.5, %v553_v28 }
  0xf2   : > { %v653_v6 = vmul.f32 %v1432_v8, %v621_v11  ;;  %v584_v14 = vmul.f32 0.5, %v552_v39 }
  0xf3   : > { %686 = vst [vmem:[%s1258_s7 + $0xe8] sm:$0xff] %v654_v17  ;;  %v624_v18 = vadd.f32 %v1249_v45, %v585_v2 }
  0xf4   : > { %685 = vst [vmem:[%s1258_s7 + $0xe0] sm:$0xff] %v653_v6  ;;  %v623_v60 = vadd.f32 %v1249_v45, %v584_v14 }
  0xf5   : > { %v656_v55 = vmul.f32 %v1433_v36, %v624_v18 }
  0xf6   : > { %v655_v61 = vmul.f32 %v1434_v25, %v623_v60 }
  0xf7   : > { %688 = vst [vmem:[%s1258_s7 + $0xf8] sm:$0xff] %v656_v55 }
  0xf8   : > { %687 = vst [vmem:[%s1258_s7 + $0xf0] sm:$0xff] %v655_v61 }
  0xf9 PF: > { %s15_s19 = sadd.s32 1, %s998_s19   ;;  %s1435_s17 = smov %s994_s18 }
  0xfa   : > { %p12_p5 = scmp.ge.s32.totalorder %s15_s19, 4   ;;  %s1436_s18 = smov %s1438_s3 }
  0xfc   :  { %14 = sbr.rel (!%p12_p5) target bundleno = 2 (0x2), region = 69 }

// kernel: upblock_forward.4
= control target key start
LH: loop header
LB: loop body
LE: loop exit
PB: predicated region body
PF: predicated region fallthrough
CT: control target
= control target key end

     0   :  { %s15010_s25 = smov 0   ;;  %s15012_s26 = smov 0   ;;  %s17531_s0 = inlined_call_operand.vmem [shape: bf16[2,16,16,8], index: 0, kind: input, shape index: {}, may-alias: {0,1,2}]   ;;  %s17532_s1 = inlined_call_operand.vmem [shape: bf16[2,16,16,8], index: 1, kind: input, shape index: {}, may-alias: {0,1,2}]   ;;  %s17533_s2 = inlined_call_operand.vmem [shape: bf16[2,16,16,8], index: 2, kind: input, shape index: {}, may-alias: {0,1,2}]   ;;  %s17534_s3 = inlined_call_operand.vmem [shape: bf16[2,16,16,128], index: 3, kind: input, shape index: {}, may-alias: {3,4,5}]   ;;  %s17535_s4 = inlined_call_operand.vmem [shape: bf16[2,16,16,128], index: 4, kind: input, shape index: {}, may-alias: {3,4,5}]   ;;  %s17536_s5 = inlined_call_operand.vmem [shape: bf16[2,16,16,128], index: 5, kind: input, shape index: {}, may-alias: {3,4,5}]   ;;  %s17537_s6 = inlined_call_operand.vmem [shape: bf16[9,8,128], index: 6, kind: input, shape index: {}]   ;;  %s17538_s7 = inlined_call_operand.vmem [shape: bf16[9,128,128], index: 7, kind: input, shape index: {}]   ;;  %s17539_s8 = inlined_call_operand.vmem [shape: f32[1,128], index: 8, kind: input, shape index: {}]   ;;  %s17540_s9 = inlined_call_operand.vmem [shape: f32[1,128], index: 9, kind: input, shape index: {}]   ;;  %s17541_s10 = inlined_call_operand.vmem [shape: bf16[9,128,128], index: 10, kind: input, shape index: {}]   ;;  %s17542_s11 = inlined_call_operand.vmem [shape: f32[1,128], index: 11, kind: input, shape index: {}]   ;;  %s17543_s12 = inlined_call_operand.vmem [shape: f32[1,128], index: 12, kind: input, shape index: {}]   ;;  %s17544_s13 = inlined_call_operand.vmem [shape: bf16[2,16,16,128], index: 13, kind: output, shape index: {0}]   ;;  %s17545_s14 = inlined_call_operand.vmem [shape: f32[2,1,128], index: 14, kind: output, shape index: {1}]  }
   0x1   :  { %s15014_s27 = smov 0  }
   0x2 LB: > { %s37_s28 = sadd.s32 1, %s14925_s26  ;;  %p11134_p0 = scmp.ge.s32.totalorder %s14929_s27, 1  ;;  %s14929_s27 = sphi %s15014_s27, %s25_s27   ;;  %s14925_s26 = sphi %s15012_s26, %s17808_s26   ;;  %s14921_s25 = sphi %s15010_s25, %s17807_s25  }
   0x3   : > { %p39_p1 = scmp.ge.s32.totalorder %s37_s28, 2  ;;  %p591_p2 = scmp.lt.s32.totalorder %s14929_s27, 3 }
   0x5   : > { %s17810_s28 = smov (%p39_p1, %s37_s28), 0  ;;  %p592_p3 = pnand %p11134_p0, %p591_p2 }
   0x7   : > { %595 = sbr.rel (%p592_p3) target bundleno = 1943 (0x797), region = 72 }
   0xe   : > { %vm1890_vm0 = vcmask 1043456   ;;  %v11217_v0 = vld [vmem:[%s17537_s6 + $0x4] sm:$0xf]  ;;  %v832_v2 = vlaneseq  ;;  %vm1835_vm1 = vcmask 64512   ;;  %v17546_v5 = vmov 0   ;;  %p717_p4 = scmp.lt.s32.totalorder %s14921_s25, 1 }
   0xf   : > { %v14698_v1 = vld [vmem:[%s17538_s7] sm:$0xff]   ;;  %14661 = vmatprep.subr.msk.bf16.mxu0 %vm1890_vm0, %v11217_v0  ;;  %v15038_v3 = vsel %vm1890_vm0, %v11217_v0, 0  ;;  %v15043_v6 = vcombine.low %v17546_v5, %v17546_v5  ;;  %vm14932_vm2 = vmmov 0   ;;  %v11260_v7 = vld [vmem:[%s17537_s6 + $0x8] sm:$0xf]  ;;  %v14700_v11 = vld [vmem:[%s17538_s7 + $0x10] sm:$0xff]  }
  0x10   : > { %12699 = vmatpush3.bf16.msra.mxu0 %v15038_v3  ;;  %12556 = vmatprep.subr.bf16.mxu1 %v14698_v1  ;;  %v833_v4 = vshrl.u32 %v832_v2, 7  ;;  %vm1012_vm3 = vmpackc.low %vm14932_vm2, %vm14932_vm2  ;;  %v3307_v9 = vsel %vm1890_vm0, %v11260_v7, 0  ;;  %v14699_v10 = vld [vmem:[%s17538_s7 + $0x8] sm:$0xff]   ;;  %s17812_s25 = smov (!%p717_p4, %s14921_s25), 1  ;;  %vm2712_vm8 = vsmask.f32 7424 }
  0x11   : > { %12557 = vmatpush3.bf16.msra.mxu1 %v14698_v1  ;;  %v1014_v8 = vsel %vm1012_vm3, 65537, %v17546_v5  ;;  %14663 = vmatprep.subr.msk.bf16.mxu0 %vm1890_vm0, %v11260_v7  ;;  %s15067_s20 = sshll.u32 %s17812_s25, 7  ;;  %v14705_v15 = vld [vmem:[%s17538_s7 + $0xc0] sm:$0xff]   ;;  %v14703_v17 = vld [vmem:[%s17538_s7 + $0x18] sm:$0xff]   ;;  %v17636_v19 = vmov 0  ;;  %v17639_v27 = vmov 0  ;;  %s17421_s29 = scalar_lea.vmem %s17545_s14, %s17812_s25 }
  0x12   : > { %v834_v12 = vadd.s32 8, %v833_v4  ;;  %vm1040_vm4 = vcmp.eq.s32.totalorder %v833_v4, 0  ;;  %12700 = vmatprep.mubr.msk.bf16.mxu0 %vm1835_vm1, %v15043_v6  ;;  %12558 = vmatprep.subr.bf16.mxu1 %v14699_v10  ;;  %s15077_s24 = scalar_lea.vmem %s17531_s0, %s15067_s20  ;;  %v14704_v23 = vld [vmem:[%s17538_s7 + $0x20] sm:$0xff]   ;;  %v15124_v37 = vrot.slane %v17546_v5, 7  ;;  %v14706_v38 = vld [vmem:[%s17538_s7 + $0x28] sm:$0xff]   ;;  %s15144_s19 = scalar_lea.vmem %s17534_s3, %s15067_s20  ;;  %v14707_v54 = vld [vmem:[%s17538_s7 + $0x30] sm:$0xff]  }
  0x13   : > { %vm1046_vm5 = vmpackc.low %vm1040_vm4, %vm1040_vm4  ;;  %12701 = vmatmul.mubr.msk.bf16.vlgmr.msra.gmra.mrb[0].mxu0 %vm1835_vm1, %v15043_v6  ;;  %v15087_v20 = vld [vmem:[%s15077_s24] sm:$0xff]   ;;  %v15090_v21 = vld [vmem:[%s15077_s24 + $0x8] sm:$0xff]   ;;  %vm1299_vm11 = vsmask.f32 256  ;;  %s17446_s17 = scalar_lea.vmem %s17544_s13, %s15067_s20 }
  0x14   : > { %vm1007_vm6 = vcmp.eq.s32.totalorder %v834_v12, 15  ;;  %v1048_v13 = vsel %vm1046_vm5, 65537, %v17546_v5  ;;  %12789 = vmatpush3.bf16.msra.mxu0 %v3307_v9  ;;  %12704 = vmatprep.mubr.msk.bf16.mxu0 %vm1835_vm1, %v15087_v20  ;;  %v15115_v32 = vld [vmem:[%s15077_s24 + $0x10] sm:$0xff]   ;;  %17643 = vst [vmem:[#allocation6_spill] sm:$0xff] %v15124_v37  ;;  %v15138_v45 = vld [vmem:[%s15077_s24 + $0x18] sm:$0xff]   ;;  %v14709_v47 = vld [vmem:[%s17538_s7 + $0xc8] sm:$0xff]  }
  0x15   : > { %vm1013_vm7 = vmpackc.low %vm1007_vm6, %vm1007_vm6  ;;  %v11170_v14 = vcombine.low %v1048_v13, %v1014_v8  ;;  %12559 = vmatpush3.bf16.msra.mxu1 %v14699_v10  ;;  %12826 = vmatprep.subr.bf16.mxu0 %v14705_v15  ;;  %v15162_v53 = vld [vmem:[%s15077_s24 + $0x20] sm:$0xff]   ;;  %v14713_v59 = vld [vmem:[%s17538_s7 + $0xd0] sm:$0xff]  }
  0x16   : > { %v1015_v16 = vsel %vm1013_vm7, 65537, %v17546_v5  ;;  %12560 = vmatprep.subr.bf16.mxu1 %v14700_v11  ;;  %v14714_v60 = vld [vmem:[%s15144_s19] sm:$0xff]   ;;  %v14710_v62 = vld [vmem:[%s17538_s7 + $0x38] sm:$0xff]   ;;  %v14715_v7 = vld [vmem:[%s15144_s19 + $0x8] sm:$0xff]  }
  0x17   : > { %v11169_v18 = vcombine.low %v1014_v8, %v1015_v16  ;;  %vm15082_vm9 = vcmp.ne.s16.totalorder %v11170_v14, 0  ;;  %v15195_v9 = vld [vmem:[%s15077_s24 + $0x28] sm:$0xff]  }
  0x18   : > { %v17637_v19 = vsel %vm15082_vm9, 4294967295, %v17636_v19  ;;  %v1054_v22 = vsel %vm15082_vm9, 0, %v15043_v6  ;;  %v1056_v26 = vsel %vm15082_vm9, 0, %v15087_v20  ;;  %v1057_v30 = vsel %vm15082_vm9, 0, %v15090_v21 }
  0x19   : > { %17638 = vst [vmem:[#allocation3_spill] sm:$0xff] %v17637_v19  ;;  %12561 = vmatpush3.bf16.msra.mxu1 %v14700_v11  ;;  %v2714_v24 = vshrl.u32 %v1054_v22, 16  ;;  %v2716_v25 = vshll.u32 %v1054_v22, 16  ;;  %vm15103_vm10 = vcmp.ne.s16.totalorder %v11169_v18, 0  ;;  %v3120_v28 = vshll.u32 %v1056_v26, 16 }
  0x1a   : > { %v17640_v27 = vsel %vm15103_vm10, 4294967295, %v17639_v27  ;;  %12562 = vmatprep.subr.bf16.mxu1 %v14703_v17  ;;  %v3124_v31 = vshrl.u32 %v1056_v26, 16  ;;  %v3128_v34 = vshll.u32 %v1057_v30, 16  ;;  %v1058_v36 = vsel %vm15082_vm9, 0, %v15115_v32 }
  0x1b   : > { %17641 = vst [vmem:[#allocation4_spill] sm:$0xff] %v17640_v27  ;;  %12705 = vmatmul.mubr.msk.bf16.gmra.mrb[4].mxu0 %vm1835_vm1, %v15090_v21  ;;  %v15109_v29 = vrot.slane %v2716_v25, 1  ;;  %v3122_v33 = vrot.slane %v3120_v28, 1  ;;  %v3132_v41 = vshrl.u32 %v1057_v30, 16  ;;  %v3136_v42 = vshll.u32 %v1058_v36, 16  ;;  %v15210_v25 = vld [vmem:[%s15077_s24 + $0x30] sm:$0xff]  }
  0x1c   : > { %v3130_v40 = vrot.slane %v3128_v34, 1  ;;  %v1020_v44 = vsel %vm15103_vm10, 0, %v15043_v6  ;;  %v1059_v51 = vsel %vm15082_vm9, 0, %v15138_v45  ;;  %v3140_v52 = vshrl.u32 %v1058_v36, 16  ;;  %v14718_v28 = vld [vmem:[%s17538_s7 + $0xd8] sm:$0xff]   ;;  %v14719_v36 = vld [vmem:[%s15144_s19 + $0x10] sm:$0xff]  }
  0x1d   : > { %12563 = vmatpush3.bf16.msra.mxu1 %v14703_v17  ;;  %v15118_v35 = vor.u32 %v15109_v29, %v2714_v24  ;;  %v3126_v39 = vor.u32 %v3124_v31, %v3122_v33  ;;  %v1305_v48 = vshrl.u32 %v1020_v44, 16  ;;  %v1308_v50 = vshll.u32 %v1020_v44, 16  ;;  %v16009_v27 = vld [vmem:[%s15077_s24 + $0x18] sm:$0xff]  }
  0x1e   : > { %12564 = vmatprep.subr.bf16.mxu1 %v14704_v23  ;;  %v3138_v55 = vrot.slane %v3136_v42, 1  ;;  %v3144_v57 = vshll.u32 %v1059_v51, 16  ;;  %v1060_v58 = vsel %vm15082_vm9, 0, %v15162_v53  ;;  %v3134_v61 = vor.u32 %v3132_v41, %v3130_v40  ;;  %17706 = vst [vmem:[#allocation58_spill] sm:$0xff] %v16009_v27 }
  0x1f   : > { %17642 = vst [vmem:[#allocation5_spill] sm:$0xff] %v15118_v35  ;;  %v15132_v43 = vsel %vm2712_vm8, %v15118_v35, %v15109_v29  ;;  %v15150_v46 = vsel %vm2712_vm8, %v15118_v35, %v3122_v33  ;;  %v15156_v49 = vsel %vm2712_vm8, %v3126_v39, %v3130_v40  ;;  %v15167_v56 = vrot.slane %v1305_v48, 7  ;;  %v15225_v40 = vld [vmem:[%s15077_s24 + $0x38] sm:$0xff]  }
  0x20   : > { %17644 = vst [vmem:[#allocation7_spill] sm:$0xff] %v15132_v43  ;;  %12790 = vmatprep.mubr.msk.bf16.mxu0 %vm1835_vm1, %v15132_v43  ;;  %17645 = vst [vmem:[#allocation8_spill] sm:$0xff] %v15150_v46  ;;  %v3146_v0 = vrot.slane %v3144_v57, 1  ;;  %v3152_v1 = vshll.u32 %v1060_v58, 16  ;;  %v3142_v2 = vor.u32 %v3140_v52, %v3138_v55  ;;  %v1244_v4 = vsel %vm15103_vm10, 0, %v14714_v60  ;;  %v14745_v35 = vld [vmem:[%s15144_s19 + $0x78] sm:$0xff]  }
  0x21   : > { %12565 = vmatpush3.bf16.msra.mxu1 %v14704_v23  ;;  %17646 = vst [vmem:[#allocation9_spill] sm:$0xff] %v15156_v49  ;;  %v15184_v63 = vor.u32 %v1308_v50, %v15167_v56  ;;  %v3148_v10 = vshrl.u32 %v1059_v51, 16  ;;  %v1321_v11 = vshrl.u32 %v1244_v4, 16  ;;  %v1324_v12 = vshll.u32 %v1244_v4, 16 }
  0x22   : > { %12566 = vmatprep.subr.bf16.mxu1 %v14706_v38  ;;  %v1245_v13 = vsel %vm15103_vm10, 0, %v14715_v7  ;;  %v15201_v14 = vsel %vm2712_vm8, %v3134_v61, %v3138_v55  ;;  %v1061_v17 = vsel %vm15082_vm9, 0, %v15195_v9  ;;  %v15207_v18 = vsel %vm2712_vm8, %v3142_v2, %v3146_v0 }
  0x23   : > { %12791 = vmatmul.mubr.msk.bf16.vlgmr.msra.gmra.mrb[8].mxu0 %vm1835_vm1, %v15150_v46  ;;  %v15192_v8 = vsel %vm1299_vm11, %v15124_v37, %v15184_v63  ;;  %17647 = vst [vmem:[#allocation10_spill] sm:$0xff] %v15201_v14  ;;  %v1329_v16 = vshrl.u32 %v1245_v13, 16  ;;  %17648 = vst [vmem:[#allocation11_spill] sm:$0xff] %v15207_v18  ;;  %v1323_v22 = vrot.slane %v1321_v11, 7  ;;  %v3156_v23 = vshrl.u32 %v1060_v58, 16 }
  0x24   : > { %12827 = vmatpush3.bf16.msra.mxu0 %v14705_v15  ;;  %12794 = vmatprep.mubr.msk.bf16.mxu0 %vm1835_vm1, %v15156_v49  ;;  %v3154_v15 = vrot.slane %v3152_v1, 1  ;;  %v3160_v24 = vshll.u32 %v1061_v17, 16  ;;  %v1332_v26 = vshll.u32 %v1245_v13, 16  ;;  %v3150_v30 = vor.u32 %v3148_v10, %v3146_v0  ;;  %v14724_v0 = vld [vmem:[%s15144_s19 + $0x20] sm:$0xff]   ;;  %v14725_v10 = vld [vmem:[%s15144_s19 + $0x28] sm:$0xff]  }
  0x25   : > { %12567 = vmatpush3.bf16.msra.mxu1 %v14706_v38  ;;  %12828 = vmatprep.subr.bf16.mxu0 %v14709_v47  ;;  %v1326_v31 = vor.u32 %v1324_v12, %v1323_v22  ;;  %v1331_v33 = vrot.slane %v1329_v16, 7  ;;  %v1062_v34 = vsel %vm15082_vm9, 0, %v15210_v25  ;;  %v14720_v38 = vld [vmem:[%s15144_s19 + $0x18] sm:$0xff]   ;;  %v15230_v41 = vsel %vm1299_vm11, %v15167_v56, %v15184_v63 }
  0x26   : > { %12568 = vmatprep.subr.bf16.mxu1 %v14707_v54  ;;  %12572 = vmatprep.mubr.bf16.mxu1 %v15192_v8  ;;  %v3162_v39 = vrot.slane %v3160_v24, 1  ;;  %17649 = vst [vmem:[#allocation12_spill] sm:$0xff] %v15230_v41  ;;  %v3158_v42 = vor.u32 %v3156_v23, %v3154_v15  ;;  %v1246_v44 = vsel %vm15103_vm10, 0, %v14719_v36  ;;  %v3168_v50 = vshll.u32 %v1062_v34, 16 }
  0x27   : > { %v15239_v48 = vsel %vm1299_vm11, %v15167_v56, %v1326_v31  ;;  %v1337_v51 = vshrl.u32 %v1246_v44, 16  ;;  %v1340_v52 = vshll.u32 %v1246_v44, 16  ;;  %v15245_v55 = vsel %vm2712_vm8, %v3150_v30, %v3154_v15 }
  0x28   : > { %12829 = vmatpush3.bf16.msra.mxu0 %v14709_v47  ;;  %v15235_v47 = vld [vmem:[%s15077_s24 + $0x40] sm:$0xff]   ;;  %17650 = vst [vmem:[#allocation13_spill] sm:$0xff] %v15245_v55  ;;  %v1247_v57 = vsel %vm15103_vm10, 0, %v14720_v38  ;;  %v1063_v58 = vsel %vm15082_vm9, 0, %v15225_v40  ;;  %v3164_v60 = vshrl.u32 %v1061_v17, 16  ;;  %v15259_v1 = vsel %vm2712_vm8, %v3158_v42, %v3162_v39 }
  0x29   : > { %12569 = vmatpush3.bf16.msra.mxu1 %v14707_v54  ;;  %12830 = vmatprep.subr.bf16.mxu0 %v14713_v59  ;;  %v14723_v54 = vld [vmem:[%s17538_s7 + $0xe0] sm:$0xff]   ;;  %v1339_v61 = vrot.slane %v1337_v51, 7  ;;  %17651 = vst [vmem:[#allocation14_spill] sm:$0xff] %v15259_v1  ;;  %v1345_v2 = vshrl.u32 %v1247_v57, 16  ;;  %v3172_v4 = vshrl.u32 %v1062_v34, 16  ;;  %v3176_v7 = vshll.u32 %v1063_v58, 16 }
  0x2a   : > { %12570 = vmatprep.subr.bf16.mxu1 %v14710_v62  ;;  %v3170_v11 = vrot.slane %v3168_v50, 1  ;;  %v1248_v13 = vsel %vm15103_vm10, 0, %v14724_v0  ;;  %v1348_v15 = vshll.u32 %v1247_v57, 16  ;;  %v3180_v16 = vshrl.u32 %v1063_v58, 16  ;;  %v15283_v50 = vld [vmem:[%s15077_s24 + $0x50] sm:$0xff]   ;;  %v14729_v58 = vld [vmem:[%s17538_s7 + $0xe8] sm:$0xff]  }
  0x2b   : > { %12795 = vmatmul.mubr.msk.bf16.gmra.mrb[12].mxu0 %vm1835_vm1, %v15201_v14  ;;  %v1342_v12 = vor.u32 %v1340_v52, %v1339_v61  ;;  %v1353_v23 = vshrl.u32 %v1248_v13, 16  ;;  %v3166_v24 = vor.u32 %v3164_v60, %v3162_v39  ;;  %v1347_v31 = vrot.slane %v1345_v2, 7  ;;  %v14728_v57 = vld [vmem:[%s15144_s19 + $0x30] sm:$0xff]  }
  0x2c   : > { %12798 = vmatprep.mubr.msk.bf16.mxu0 %vm1835_vm1, %v15207_v18  ;;  %12831 = vmatpush3.bf16.msra.mxu0 %v14713_v59  ;;  %v1334_v59 = vor.u32 %v1332_v26, %v1331_v33  ;;  %v1249_v26 = vsel %vm15103_vm10, 0, %v14725_v10  ;;  %v3174_v34 = vor.u32 %v3172_v4, %v3170_v11  ;;  %v3178_v36 = vrot.slane %v3176_v7, 1  ;;  %v14730_v7 = vld [vmem:[%s15144_s19 + $0x38] sm:$0xff]  }
  0x2d   : > { %12571 = vmatpush3.bf16.msra.mxu1 %v14710_v62  ;;  %12832 = vmatprep.subr.bf16.mxu0 %v14718_v28  ;;  %v1064_v62 = vsel %vm15082_vm9, 0, %v15235_v47  ;;  %v15277_v38 = vsel %vm1299_vm11, %v1331_v33, %v1342_v12  ;;  %v1355_v42 = vrot.slane %v1353_v23, 7  ;;  %v1356_v44 = vshll.u32 %v1248_v13, 16  ;;  %v15306_v12 = vld [vmem:[%s15077_s24 + $0x58] sm:$0xff]  }
  0x2e   : > { %v3184_v17 = vshll.u32 %v1064_v62, 16  ;;  %v15274_v30 = vsel %vm1299_vm11, %v1323_v22, %v1334_v59  ;;  %v1361_v52 = vshrl.u32 %v1249_v26, 16  ;;  %v15287_v22 = vsel %vm2712_vm8, %v3166_v24, %v3170_v11 }
  0x2f   : > { %17652 = vst [vmem:[#allocation15_spill] sm:$0xff] %v15287_v22  ;;  %v3188_v33 = vshrl.u32 %v1064_v62, 16  ;;  %v1350_v59 = vor.u32 %v1348_v15, %v1347_v31  ;;  %v15295_v60 = vsel %vm2712_vm8, %v3174_v34, %v3178_v36  ;;  %v1066_v2 = vsel %vm15082_vm9, 0, %v15283_v50  ;;  %v15316_v34 = vld [vmem:[%s15077_s24 + $0x60] sm:$0xff]  }
  0x30   : > { %12573 = vmatmul.mubr.bf16.vlgmr.msra.gmra.mrb[0].mxu1 %v15230_v41  ;;  %12833 = vmatpush3.bf16.msra.mxu0 %v14718_v28  ;;  %v15271_v28 = vld [vmem:[%s15077_s24 + $0x48] sm:$0xff]   ;;  %v3186_v51 = vrot.slane %v3184_v17, 1  ;;  %17653 = vst [vmem:[#allocation16_spill] sm:$0xff] %v15295_v60  ;;  %v1358_v4 = vor.u32 %v1356_v44, %v1355_v42  ;;  %v1250_v62 = vsel %vm15103_vm10, 0, %v14728_v57  ;;  %v3182_v10 = vor.u32 %v3180_v16, %v3178_v36 }
  0x31   : > { %12576 = vmatprep.mubr.bf16.mxu1 %v15239_v48  ;;  %12834 = vmatprep.subr.bf16.mxu0 %v14723_v54  ;;  %v1065_v39 = vsel %vm15082_vm9, 0, %v15271_v28  ;;  %v1363_v11 = vrot.slane %v1361_v52, 7  ;;  %v3200_v13 = vshll.u32 %v1066_v2, 16  ;;  %v1369_v15 = vshrl.u32 %v1250_v62, 16 }
  0x32   : > { %v3192_v0 = vshll.u32 %v1065_v39, 16  ;;  %v15311_v17 = vsel %vm1299_vm11, %v1339_v61, %v1350_v59  ;;  %v3190_v23 = vor.u32 %v3188_v33, %v3186_v51  ;;  %v15319_v16 = vsel %vm1299_vm11, %v1347_v31, %v1358_v4  ;;  %v14733_v61 = vld [vmem:[%s15144_s19 + $0x40] sm:$0xff]  }
  0x33   : > { %12799 = vmatmul.mubr.msk.bf16.gmra.mrb[16].mxu0 %vm1835_vm1, %v15245_v55  ;;  %v15321_v36 = vrot.slane %v1369_v15, 7  ;;  %v1372_v44 = vshll.u32 %v1250_v62, 16  ;;  %v1067_v52 = vsel %vm15082_vm9, 0, %v15306_v12  ;;  %v15328_v33 = vsel %vm2712_vm8, %v3182_v10, %v3186_v51 }
  0x34   : > { %12802 = vmatprep.mubr.msk.bf16.mxu0 %vm1835_vm1, %v15259_v1  ;;  %12835 = vmatpush3.bf16.msra.mxu0 %v14723_v54  ;;  %v1364_v54 = vshll.u32 %v1249_v26, 16  ;;  %v3194_v24 = vrot.slane %v3192_v0, 1  ;;  %v1251_v26 = vsel %vm15103_vm10, 0, %v14730_v7  ;;  %17654 = vst [vmem:[#allocation17_spill] sm:$0xff] %v15328_v33  ;;  %v3202_v59 = vrot.slane %v3200_v13, 1  ;;  %v15346_v13 = vld [vmem:[%s15077_s24 + $0x68] sm:$0xff]  }
  0x35   : > { %12836 = vmatprep.subr.bf16.mxu0 %v14729_v58  ;;  %v1377_v31 = vshrl.u32 %v1251_v26, 16  ;;  %v3204_v0 = vshrl.u32 %v1066_v2, 16  ;;  %v1252_v4 = vsel %vm15103_vm10, 0, %v14733_v61  ;;  %v3208_v7 = vshll.u32 %v1067_v52, 16 }
  0x36   : > { %v1366_v57 = vor.u32 %v1364_v54, %v1363_v11  ;;  %v15335_v62 = vsel %vm2712_vm8, %v3190_v23, %v3194_v24  ;;  %v1068_v51 = vsel %vm15082_vm9, 0, %v15316_v34  ;;  %v14735_v54 = vld [vmem:[%s17538_s7 + $0xf0] sm:$0xff]   ;;  %v1374_v2 = vor.u32 %v1372_v44, %v15321_v36 }
  0x37   : > { %17655 = vst [vmem:[#allocation18_spill] sm:$0xff] %v15335_v62  ;;  %v1385_v10 = vshrl.u32 %v1252_v4, 16  ;;  %v14738_v23 = vld [vmem:[%s15144_s19 + $0x50] sm:$0xff]   ;;  %v1379_v5 = vrot.slane %v1377_v31, 7  ;;  %v3210_v44 = vrot.slane %v3208_v7, 1  ;;  %v3216_v1 = vshll.u32 %v1068_v51, 16 }
  0x38   : > { %12577 = vmatmul.mubr.bf16.gmra.mrb[4].mxu1 %v15274_v30  ;;  %12837 = vmatpush3.bf16.msra.mxu0 %v14729_v58  ;;  %v3196_v58 = vshrl.u32 %v1065_v39, 16  ;;  %v14734_v39 = vld [vmem:[%s15144_s19 + $0x48] sm:$0xff]   ;;  %v15351_v15 = vsel %vm1299_vm11, %v1355_v42, %v1366_v57  ;;  %v1388_v55 = vshll.u32 %v1252_v4, 16  ;;  %v15359_v42 = vsel %vm1299_vm11, %v1363_v11, %v1374_v2  ;;  %v14739_v7 = vld [vmem:[%s15144_s19 + $0x58] sm:$0xff]  }
  0x39   : > { %12580 = vmatprep.mubr.bf16.mxu1 %v15277_v38  ;;  %12838 = vmatprep.subr.bf16.mxu0 %v14735_v54  ;;  %v15361_v57 = vrot.slane %v1385_v10, 7  ;;  %v3212_v31 = vshrl.u32 %v1067_v52, 16  ;;  %v3220_v52 = vshrl.u32 %v1068_v51, 16  ;;  %v3218_v10 = vrot.slane %v3216_v1, 1 }
  0x3a   : > { %v3198_v61 = vor.u32 %v3196_v58, %v3194_v24  ;;  %v15366_v24 = vsel %vm15082_vm9, 0, %v15346_v13  ;;  %v14741_v58 = vld [vmem:[%s17538_s7 + $0xf8] sm:$0xff]  }
  0x3b   : > { %12803 = vmatmul.mubr.msk.bf16.gmra.mrb[20].mxu0 %vm1835_vm1, %v15287_v22  ;;  %v3206_v22 = vor.u32 %v3204_v0, %v3202_v59  ;;  %v1254_v0 = vsel %vm15103_vm10, 0, %v14738_v23  ;;  %v3224_v2 = vshll.u32 %v15366_v24, 16  ;;  %v1390_v23 = vor.u32 %v1388_v55, %v15361_v57 }
  0x3c   : > { %12806 = vmatprep.mubr.msk.bf16.mxu0 %vm1835_vm1, %v15295_v60  ;;  %v1380_v60 = vshll.u32 %v1251_v26, 16  ;;  %12839 = vmatpush3.bf16.msra.mxu0 %v14735_v54  ;;  %v15369_v26 = vld [vmem:[%s15077_s24 + $0x70] sm:$0xff]   ;;  %v15378_v11 = vsel %vm2712_vm8, %v3198_v61, %v3202_v59  ;;  %v1401_v61 = vshrl.u32 %v1254_v0, 16  ;;  %v3214_v51 = vor.u32 %v3212_v31, %v3210_v44 }
  0x3d   : > { %17656 = vst [vmem:[#allocation19_spill] sm:$0xff] %v15378_v11  ;;  %12840 = vmatprep.subr.bf16.mxu0 %v14741_v58  ;;  %v15383_v54 = vsel %vm2712_vm8, %v3206_v22, %v3210_v44  ;;  %v1070_v59 = vsel %vm15082_vm9, 0, %v15369_v26  ;;  %v14742_v22 = vld [vmem:[%s15144_s19 + $0x60] sm:$0xff]   ;;  %v1255_v55 = vsel %vm15103_vm10, 0, %v14739_v7  ;;  %v3222_v18 = vor.u32 %v3220_v52, %v3218_v10 }
  0x3e   : > { %17657 = vst [vmem:[#allocation20_spill] sm:$0xff] %v15383_v54  ;;  %v3226_v14 = vrot.slane %v3224_v2, 1  ;;  %v3232_v49 = vshll.u32 %v1070_v59, 16  ;;  %v1403_v44 = vrot.slane %v1401_v61, 7  ;;  %v1404_v31 = vshll.u32 %v1254_v0, 16  ;;  %v14743_v0 = vld [vmem:[%s15144_s19 + $0x68] sm:$0xff]  }
  0x3f   : > { %v1256_v7 = vsel %vm15103_vm10, 0, %v14742_v22  ;;  %v3228_v52 = vshrl.u32 %v15366_v24, 16  ;;  %v3236_v2 = vshrl.u32 %v1070_v59, 16  ;;  %v15435_v59 = vld [vmem:[%s17538_s7 + $0x40] sm:$0xff]   ;;  %v1412_v46 = vshll.u32 %v1255_v55, 16 }
  0x40   : > { %12581 = vmatmul.mubr.bf16.gmra.mrb[8].mxu1 %v15311_v17  ;;  %12841 = vmatpush3.bf16.msra.mxu0 %v14741_v58  ;;  %v15427_v61 = vsel %vm2712_vm8, %v3222_v18, %v3226_v14  ;;  %v1420_v19 = vshll.u32 %v1256_v7, 16 }
  0x41   : > { %12584 = vmatprep.mubr.bf16.mxu1 %v15319_v16  ;;  %17659 = vst [vmem:[#allocation22_spill] sm:$0xff] %v15427_v61 }
  0x43   : > { %12807 = vmatmul.mubr.msk.bf16.gmra.mrb[24].mxu0 %vm1835_vm1, %v15328_v33  ;;  %v1253_v33 = vsel %vm15103_vm10, 0, %v14734_v39  ;;  %v1382_v39 = vor.u32 %v1380_v60, %v1379_v5 }
  0x44   : > { %12810 = vmatprep.mubr.msk.bf16.mxu0 %vm1835_vm1, %v15335_v62  ;;  %v1393_v4 = vshrl.u32 %v1253_v33, 16  ;;  %v15391_v62 = vld [vmem:[%s15077_s24 + $0x78] sm:$0xff]   ;;  %v1396_v60 = vshll.u32 %v1253_v33, 16  ;;  %v11303_v33 = vld [vmem:[%s17537_s6 + $0xc] sm:$0xf] }
  0x45   : > { %v15402_v1 = vsel %vm1299_vm11, %v15321_v36, %v1382_v39  ;;  %14664 = vmatprep.subr.msk.bf16.mxu0 %vm1890_vm0, %v11303_v33  ;;  %v1409_v36 = vshrl.u32 %v1255_v55, 16  ;;  %v15418_v39 = vsel %vm2712_vm8, %v3214_v51, %v3218_v10  ;;  %v3234_v10 = vrot.slane %v3232_v49, 1 }
  0x46   : > { %v1395_v58 = vrot.slane %v1393_v4, 7  ;;  %v1071_v4 = vsel %vm15082_vm9, 0, %v15391_v62  ;;  %17658 = vst [vmem:[#allocation21_spill] sm:$0xff] %v15418_v39  ;;  %v1417_v51 = vshrl.u32 %v1256_v7, 16  ;;  %v3230_v49 = vor.u32 %v3228_v52, %v3226_v14 }
  0x47   : > { %v3240_v22 = vshll.u32 %v1071_v4, 16  ;;  %v1411_v18 = vrot.slane %v1409_v36, 7  ;;  %v1257_v36 = vsel %vm15103_vm10, 0, %v14743_v0  ;;  %v15457_v14 = vsel %vm15103_vm10, 0, %v15087_v20 }
  0x48   : > { %12585 = vmatmul.mubr.bf16.gmra.mrb[12].mxu1 %v15351_v15  ;;  %v15461_v7 = vsel %vm2712_vm8, %v3230_v49, %v3234_v10  ;;  %v1425_v52 = vshrl.u32 %v1257_v36, 16  ;;  %v1708_v0 = vshrl.u32 %v15457_v14, 16  ;;  %v15473_v20 = vsel %vm15103_vm10, 0, %v15090_v21 }
  0x49   : > { %12588 = vmatprep.mubr.bf16.mxu1 %v15359_v42  ;;  %v3242_v43 = vrot.slane %v3240_v22, 1  ;;  %17660 = vst [vmem:[#allocation23_spill] sm:$0xff] %v15461_v7  ;;  %v1428_v21 = vshll.u32 %v1257_v36, 16 }
  0x4b   : > { %12811 = vmatmul.mubr.msk.bf16.gmra.mrb[28].mxu0 %vm1835_vm1, %v15378_v11  ;;  %v15408_v11 = vsel %vm1299_vm11, %v1379_v5, %v1390_v23  ;;  %v1398_v5 = vor.u32 %v1396_v60, %v1395_v58  ;;  %v1282_v23 = vld [vmem:[%s17537_s6] sm:$0xf]  ;;  %v1406_v60 = vor.u32 %v1404_v31, %v1403_v44  ;;  %v3238_v31 = vor.u32 %v3236_v2, %v3234_v10 }
  0x4c   : > { %12814 = vmatprep.mubr.msk.bf16.mxu0 %vm1835_vm1, %v15383_v54  ;;  %v14744_v54 = vld [vmem:[%s15144_s19 + $0x70] sm:$0xff]   ;;  %14660 = vmatprep.subr.msk.bf16.mxu1 %vm1890_vm0, %v1282_v23  ;;  %v1892_v24 = vsel %vm1890_vm0, %v1282_v23, 0  ;;  %v3244_v23 = vshrl.u32 %v1071_v4, 16  ;;  %v1414_v4 = vor.u32 %v1412_v46, %v1411_v18 }
  0x4d   : > { %12609 = vmatpush3.bf16.msra.mxu1 %v1892_v24  ;;  %v15441_v37 = vsel %vm1299_vm11, %v15361_v57, %v1398_v5  ;;  %v1258_v55 = vsel %vm15103_vm10, 0, %v14744_v54  ;;  %v15452_v57 = vsel %vm1299_vm11, %v1395_v58, %v1406_v60  ;;  %v1419_v5 = vrot.slane %v1417_v51, 7 }
  0x4e   : > { %12646 = vmatprep.subr.bf16.mxu1 %v15435_v59  ;;  %v1433_v2 = vshrl.u32 %v1258_v55, 16  ;;  %v1259_v54 = vsel %vm15103_vm10, 0, %v14745_v35  ;;  %v15467_v58 = vsel %vm2712_vm8, %v3238_v31, %v3242_v43  ;;  %v3246_v46 = vor.u32 %v3244_v23, %v3242_v43 }
  0x4f   : > { %17661 = vst [vmem:[#allocation24_spill] sm:$0xff] %v15467_v58  ;;  %v1422_v22 = vor.u32 %v1420_v19, %v1419_v5  ;;  %v15478_v10 = vsel %vm1299_vm11, %v1403_v44, %v1414_v4  ;;  %v15481_v35 = vsel %vm1890_vm0, %v11303_v33, 0  ;;  %v1441_v60 = vshrl.u32 %v1259_v54, 16 }
  0x50   : > { %12589 = vmatmul.mubr.bf16.gmra.mrb[16].mxu1 %v15402_v1  ;;  %17662 = vst [vmem:[#allocation25_spill] sm:$0xff] %v15478_v10  ;;  %v15486_v51 = vsel %vm15103_vm10, 0, %v15115_v32  ;;  %v1436_v19 = vshll.u32 %v1258_v55, 16  ;;  %v1716_v43 = vshrl.u32 %v15473_v20, 16  ;;  %v15494_v44 = vsel %vm15103_vm10, 0, %v15138_v45 }
  0x51   : > { %12592 = vmatprep.mubr.bf16.mxu1 %v15408_v11  ;;  %v1427_v33 = vrot.slane %v1425_v52, 7  ;;  %v15496_v24 = vrot.slane %v1433_v2, 7  ;;  %v1444_v49 = vshll.u32 %v1259_v54, 16  ;;  %v15498_v31 = vrot.slane %v1708_v0, 7 }
  0x52   : > { %v15502_v32 = vsel %vm2712_vm8, %v3246_v46, %v15109_v29  ;;  %v15505_v23 = vsel %vm1299_vm11, %v1411_v18, %v1422_v22  ;;  %v1724_v55 = vshrl.u32 %v15486_v51, 16  ;;  %v15509_v4 = vrot.slane %v1441_v60, 7 }
  0x53   : > { %12815 = vmatmul.mubr.msk.bf16.gmra.mrb[32].mxu0 %vm1835_vm1, %v15418_v39  ;;  %17663 = vst [vmem:[#allocation26_spill] sm:$0xff] %v15502_v32  ;;  %17664 = vst [vmem:[#allocation27_spill] sm:$0xff] %v15505_v23  ;;  %v1732_v45 = vshrl.u32 %v15494_v44, 16  ;;  %v15515_v52 = vsel %vm15103_vm10, 0, %v15162_v53  ;;  %v15520_v2 = vsel %vm15103_vm10, 0, %v15195_v9  ;;  %v15523_v18 = vrot.slane %v1716_v43, 7 }
  0x54   : > { %12818 = vmatprep.mubr.msk.bf16.mxu0 %vm1835_vm1, %v15427_v61  ;;  %v15530_v46 = vsel %vm15103_vm10, 0, %v15210_v25  ;;  %v1430_v53 = vor.u32 %v1428_v21, %v1427_v33  ;;  %v1438_v22 = vor.u32 %v1436_v19, %v15496_v24  ;;  %v15538_v60 = vsel %vm15103_vm10, 0, %v15225_v40 }
  0x55   : > { %v15540_v43 = vrot.slane %v1724_v55, 7  ;;  %v1740_v0 = vshrl.u32 %v15515_v52, 16  ;;  %v1748_v54 = vshrl.u32 %v15520_v2, 16  ;;  %v15547_v25 = vsel %vm15103_vm10, 0, %v15235_v47 }
  0x56   : > { %v15551_v21 = vrot.slane %v1732_v45, 7  ;;  %v1756_v40 = vshrl.u32 %v15530_v46, 16  ;;  %v15558_v55 = vsel %vm15103_vm10, 0, %v15271_v28  ;;  %v1764_v9 = vshrl.u32 %v15538_v60, 16 }
  0x57   : > { %v15565_v47 = vsel %vm15103_vm10, 0, %v15283_v50  ;;  %v15568_v45 = vsel %vm1299_vm11, %v1419_v5, %v1430_v53  ;;  %v15571_v19 = vsel %vm1299_vm11, %v1427_v33, %v1438_v22  ;;  %v1772_v36 = vshrl.u32 %v15547_v25, 16  ;;  %v15591_v22 = vld [vmem:[%s17538_s7 + $0x100] sm:$0xff]  }
  0x58   : > { %12593 = vmatmul.mubr.bf16.gmra.mrb[20].mxu1 %v15441_v37  ;;  %17665 = vst [vmem:[#allocation28_spill] sm:$0xff] %v15568_v45  ;;  %17666 = vst [vmem:[#allocation29_spill] sm:$0xff] %v15571_v19  ;;  %v15577_v28 = vsel %vm15103_vm10, 0, %v15306_v12  ;;  %v1446_v5 = vor.u32 %v1444_v49, %v15509_v4  ;;  %v1788_v53 = vshrl.u32 %v15565_v47, 16  ;;  %v15594_v12 = vrot.slane %v1756_v40, 7 }
  0x59   : > { %12596 = vmatprep.mubr.bf16.mxu1 %v15452_v57  ;;  %v1796_v50 = vshrl.u32 %v15577_v28, 16  ;;  %v15601_v49 = vrot.slane %v1772_v36, 7  ;;  %v15608_v39 = vsel %vm15103_vm10, 0, %v15316_v34  ;;  %v1799_v36 = vshll.u32 %v15577_v28, 16 }
  0x5a   : > { %v1804_v33 = vshrl.u32 %v15608_v39, 16  ;;  %v15624_v34 = vsel %vm1299_vm11, %v15496_v24, %v1446_v5  ;;  %v14747_v24 = vld [vmem:[%s17538_s7 + $0x48] sm:$0xff]  }
  0x5b   : > { %12819 = vmatmul.mubr.msk.bf16.gmra.mrb[36].mxu0 %vm1835_vm1, %v15461_v7  ;;  %v1780_v7 = vshrl.u32 %v15558_v55, 16  ;;  %v15619_v61 = vrot.slane %v1796_v50, 7  ;;  %17667 = vst [vmem:[#allocation30_spill] sm:$0xff] %v15624_v34  ;;  %v17668_v50 = vshll.u32 %v15457_v14, 16  ;;  %v17670_v14 = vshll.u32 %v15473_v20, 16 }
  0x5c   : > { %12822 = vmatprep.mubr.msk.bf16.mxu0 %vm1835_vm1, %v15467_v58  ;;  %v15581_v58 = vrot.slane %v1748_v54, 7  ;;  %v15596_v54 = vrot.slane %v1764_v9, 7  ;;  %v1791_v9 = vshll.u32 %v15565_v47, 16 }
  0x5d   : > { %v15610_v40 = vrot.slane %v1780_v7, 7  ;;  %v1721_v5 = vor.u32 %v17670_v14, %v15523_v18  ;;  %v15668_v7 = vsel %vm15103_vm10, 0, %v15369_v26  ;;  %v14750_v26 = vld [vmem:[%s17538_s7 + $0x60] sm:$0xff]   ;;  %v1801_v47 = vor.u32 %v1799_v36, %v15619_v61 }
  0x5f   : > { %v15678_v14 = vsel %vm1299_vm11, %v15498_v31, %v1721_v5 }
  0x60   : > { %12597 = vmatmul.mubr.bf16.gmra.mrb[24].mxu1 %v15478_v10  ;;  %17672 = vst [vmem:[#allocation32_spill] sm:$0xff] %v15678_v14 }
  0x61   : > { %12600 = vmatprep.mubr.bf16.mxu1 %v15505_v23 }
  0x63   : > { %12823 = vmatmul.mubr.msk.bf16.gmra.mrb[40].mxu0 %vm1835_vm1, %v15502_v32  ;;  %v15579_v32 = vrot.slane %v1740_v0, 7  ;;  %v15614_v0 = vrot.slane %v1788_v53, 7  ;;  %v1713_v53 = vor.u32 %v17668_v50, %v15498_v31  ;;  %v17674_v31 = vshll.u32 %v15494_v44, 16 }
  0x64   : > { %12842 = vmatprep.mubr.bf16.mxu0 %v15230_v41 }
  0x65   : > { %v1737_v5 = vor.u32 %v17674_v31, %v15551_v21  ;;  %v14755_v31 = vld [vmem:[%s17538_s7 + $0x78] sm:$0xff]  }
  0x68   : > { %12601 = vmatmul.mubr.bf16.gmra.mrb[28].mxu1 %v15568_v45 }
  0x69   : > { %12604 = vmatprep.mubr.bf16.mxu1 %v15571_v19 }
  0x6b   : > { %12843 = vmatmul.mubr.bf16.vlgmr.msra.gmra.mrb[8].mxu0 %v15239_v48 }
  0x6c   : > { %12879 = vmatpush3.bf16.msra.mxu0 %v15481_v35  ;;  %12846 = vmatprep.mubr.bf16.mxu0 %v15274_v30  ;;  %v15634_v35 = vsel %vm15103_vm10, 0, %v15346_v13  ;;  %v14748_v13 = vld [vmem:[%s17538_s7 + $0x50] sm:$0xff]  }
  0x6d   : > { %12916 = vmatprep.subr.bf16.mxu0 %v15591_v22  ;;  %v1812_v20 = vshrl.u32 %v15634_v35, 16 }
  0x70   : > { %12605 = vmatmul.mubr.bf16.gmra.mrb[32].mxu1 %v15624_v34 }
  0x71   : > { %12610 = vmatprep.mubr.msk.bf16.mxu1 %vm1835_vm1, %v15192_v8  ;;  %v15646_v8 = vsel %vm1299_vm11, %v15167_v56, %v1713_v53  ;;  %v17671_v56 = vshll.u32 %v15486_v51, 16  ;;  %v15663_v53 = vrot.slane %v1804_v33, 7  ;;  %v1815_v51 = vshll.u32 %v15634_v35, 16  ;;  %v14754_v35 = vld [vmem:[%s17538_s7 + $0x108] sm:$0xff]  }
  0x72   : > { %17669 = vst [vmem:[#allocation31_spill] sm:$0xff] %v15646_v8 }
  0x73   : > { %12847 = vmatmul.mubr.bf16.gmra.mrb[12].mxu0 %v15277_v38  ;;  %v1729_v50 = vor.u32 %v17671_v56, %v15540_v43  ;;  %v14752_v56 = vld [vmem:[%s17538_s7 + $0x68] sm:$0xff]  }
  0x74   : > { %12850 = vmatprep.mubr.bf16.mxu0 %v15311_v17 }
  0x75   : > { %v15682_v33 = vsel %vm1299_vm11, %v15523_v18, %v1729_v50  ;;  %v17675_v18 = vshll.u32 %v15515_v52, 16  ;;  %v15704_v50 = vsel %vm1299_vm11, %v15540_v43, %v1737_v5  ;;  %v14753_v52 = vld [vmem:[%s17538_s7 + $0x70] sm:$0xff]   ;;  %v17678_v43 = vshll.u32 %v15520_v2, 16 }
  0x76   : > { %17673 = vst [vmem:[#allocation33_spill] sm:$0xff] %v15682_v33  ;;  %17676 = vst [vmem:[#allocation34_spill] sm:$0xff] %v15704_v50 }
  0x78   : > { %12611 = vmatmul.mubr.msk.bf16.vlgmr.msra.gmra.mrb[0].mxu1 %vm1835_vm1, %v15230_v41 }
  0x79   : > { %12614 = vmatprep.mubr.msk.bf16.mxu1 %vm1835_vm1, %v15646_v8  ;;  %12647 = vmatpush3.bf16.msra.mxu1 %v15435_v59  ;;  %v14749_v59 = vld [vmem:[%s17538_s7 + $0x58] sm:$0xff]  }
  0x7a   : > { %12648 = vmatprep.subr.bf16.mxu1 %v14747_v24 }
  0x7b   : > { %12851 = vmatmul.mubr.bf16.gmra.mrb[16].mxu0 %v15319_v16 }
  0x7c   : > { %12854 = vmatprep.mubr.bf16.mxu0 %v15351_v15 }
  0x7d   : > { %12649 = vmatpush3.bf16.msra.mxu1 %v14747_v24  ;;  %v1745_v24 = vor.u32 %v17675_v18, %v15579_v32 }
  0x7e   : > { %12650 = vmatprep.subr.bf16.mxu1 %v14748_v13 }
  0x7f   : > { %v15708_v44 = vsel %vm1299_vm11, %v15551_v21, %v1745_v24  ;;  %v17679_v21 = vshll.u32 %v15530_v46, 16  ;;  %v17682_v46 = vshll.u32 %v15538_v60, 16  ;;  %v14874_v60 = vld [vmem:[%s17537_s6 + $0x4] sm:$0xf] }
  0x80   : > { %12615 = vmatmul.mubr.msk.bf16.gmra.mrb[4].mxu1 %vm1835_vm1, %v15678_v14  ;;  %17677 = vst [vmem:[#allocation35_spill] sm:$0xff] %v15708_v44 }
  0x81   : > { %12618 = vmatprep.mubr.msk.bf16.mxu1 %vm1835_vm1, %v15682_v33  ;;  %12651 = vmatpush3.bf16.msra.mxu1 %v14748_v13  ;;  %v1753_v13 = vor.u32 %v17678_v43, %v15581_v58  ;;  %v1820_v43 = vshrl.u32 %v15668_v7, 16 }
  0x82   : > { %12652 = vmatprep.subr.bf16.mxu1 %v14749_v59 }
  0x83   : > { %12855 = vmatmul.mubr.bf16.gmra.mrb[20].mxu0 %v15359_v42  ;;  %v15730_v5 = vsel %vm1299_vm11, %v15579_v32, %v1753_v13  ;;  %v17683_v32 = vshll.u32 %v15547_v25, 16  ;;  %v17686_v25 = vshll.u32 %v15558_v55, 16  ;;  %v1823_v55 = vshll.u32 %v15668_v7, 16 }
  0x84   : > { %12858 = vmatprep.mubr.bf16.mxu0 %v15402_v1  ;;  %17680 = vst [vmem:[#allocation36_spill] sm:$0xff] %v15730_v5  ;;  %v1037_v13 = vsel %vm15103_vm10, 0, %v15391_v62  ;;  %v15799_v7 = vsel %vm1299_vm11, %v15614_v0, %v1801_v47  ;;  %v1822_v36 = vrot.slane %v1820_v43, 7  ;;  %v15810_v62 = vsel %vm1299_vm11, %v15509_v4, %v15184_v63  ;;  %v15901_v43 = vld [vmem:[%s15144_s19 + $0x18] sm:$0xff]   ;;  %v15914_v47 = vld [vmem:[%s15144_s19 + $0x28] sm:$0xff]  }
  0x85   : > { %12653 = vmatpush3.bf16.msra.mxu1 %v14749_v59  ;;  %v1761_v59 = vor.u32 %v17679_v21, %v15594_v12  ;;  %v1777_v18 = vor.u32 %v17683_v32, %v15601_v49  ;;  %17690 = vst [vmem:[#allocation42_spill] sm:$0xff] %v15799_v7  ;;  %17692 = vst [vmem:[#allocation44_spill] sm:$0xff] %v15810_v62  ;;  %v15867_v32 = vld [vmem:[%s15144_s19] sm:$0xff]  }
  0x86   : > { %12654 = vmatprep.subr.bf16.mxu1 %v14750_v26  ;;  %17696 = vst [vmem:[#allocation48_spill] sm:$0xff] %v15867_v32  ;;  %17699 = vst [vmem:[#allocation51_spill] sm:$0xff] %v15901_v43 }
  0x87   : > { %v15734_v2 = vsel %vm1299_vm11, %v15581_v58, %v1761_v59  ;;  %v15754_v24 = vsel %vm1299_vm11, %v15596_v54, %v1777_v18  ;;  %v14759_v18 = vld [vmem:[%s17538_s7 + $0x128] sm:$0xff]   ;;  %17701 = vst [vmem:[#allocation53_spill] sm:$0xff] %v15914_v47 }
  0x88   : > { %12619 = vmatmul.mubr.msk.bf16.gmra.mrb[8].mxu1 %vm1835_vm1, %v15704_v50  ;;  %17681 = vst [vmem:[#allocation37_spill] sm:$0xff] %v15734_v2  ;;  %17685 = vst [vmem:[#allocation39_spill] sm:$0xff] %v15754_v24 }
  0x89   : > { %12622 = vmatprep.mubr.msk.bf16.mxu1 %vm1835_vm1, %v15708_v44  ;;  %12655 = vmatpush3.bf16.msra.mxu1 %v14750_v26  ;;  %v1769_v26 = vor.u32 %v17682_v46, %v15596_v54  ;;  %v1793_v54 = vor.u32 %v1791_v9, %v15614_v0  ;;  %v14757_v46 = vld [vmem:[%s17538_s7 + $0x118] sm:$0xff]  }
  0x8a   : > { %12656 = vmatprep.subr.bf16.mxu1 %v14752_v56 }
  0x8b   : > { %12859 = vmatmul.mubr.bf16.gmra.mrb[24].mxu0 %v15408_v11  ;;  %v15750_v58 = vsel %vm1299_vm11, %v15594_v12, %v1769_v26  ;;  %v1785_v12 = vor.u32 %v17686_v25, %v15610_v40  ;;  %v15863_v26 = vld [vmem:[%s17538_s7 + $0x80] sm:$0xff]   ;;  %v15883_v25 = vld [vmem:[%s15144_s19 + $0x8] sm:$0xff]  }
  0x8c   : > { %12862 = vmatprep.mubr.bf16.mxu0 %v15441_v37  ;;  %17684 = vst [vmem:[#allocation38_spill] sm:$0xff] %v15750_v58  ;;  %17697 = vst [vmem:[#allocation49_spill] sm:$0xff] %v15883_v25 }
  0x8d   : > { %12657 = vmatpush3.bf16.msra.mxu1 %v14752_v56  ;;  %v15774_v56 = vsel %vm1299_vm11, %v15601_v49, %v1785_v12  ;;  %v17689_v49 = vshll.u32 %v15608_v39, 16  ;;  %v1828_v39 = vshrl.u32 %v1037_v13, 16  ;;  %v14761_v12 = vld [vmem:[%s17538_s7 + $0x138] sm:$0xff]  }
  0x8e   : > { %12658 = vmatprep.subr.bf16.mxu1 %v14753_v52  ;;  %17687 = vst [vmem:[#allocation40_spill] sm:$0xff] %v15774_v56 }
  0x8f   : > { %v1809_v9 = vor.u32 %v17689_v49, %v15663_v53  ;;  %v15816_v21 = vrot.slane %v1828_v39, 7  ;;  %v15918_v49 = vld [vmem:[%s15144_s19 + $0x30] sm:$0xff]  }
  0x90   : > { %12623 = vmatmul.mubr.msk.bf16.gmra.mrb[12].mxu1 %vm1835_vm1, %v15730_v5  ;;  %17702 = vst [vmem:[#allocation54_spill] sm:$0xff] %v15918_v49 }
  0x91   : > { %12626 = vmatprep.mubr.msk.bf16.mxu1 %vm1835_vm1, %v15734_v2  ;;  %12659 = vmatpush3.bf16.msra.mxu1 %v14753_v52  ;;  %v15778_v52 = vsel %vm1299_vm11, %v15610_v40, %v1793_v54  ;;  %v1814_v40 = vrot.slane %v1812_v20, 7  ;;  %v15803_v28 = vsel %vm1299_vm11, %v15619_v61, %v1809_v9  ;;  %v1825_v20 = vor.u32 %v1823_v55, %v1822_v36  ;;  %v11346_v54 = vld [vmem:[%s17537_s6 + $0x10] sm:$0xf]  ;;  %v15905_v55 = vld [vmem:[%s15144_s19 + $0x20] sm:$0xff]   ;;  %v15926_v9 = vld [vmem:[%s15144_s19 + $0x38] sm:$0xff]  }
  0x92   : > { %12660 = vmatprep.subr.bf16.mxu1 %v14755_v31  ;;  %17688 = vst [vmem:[#allocation41_spill] sm:$0xff] %v15778_v52  ;;  %17691 = vst [vmem:[#allocation43_spill] sm:$0xff] %v15803_v28  ;;  %v1831_v61 = vshll.u32 %v1037_v13, 16 }
  0x93   : > { %12863 = vmatmul.mubr.bf16.gmra.mrb[28].mxu0 %v15452_v57  ;;  %v1817_v0 = vor.u32 %v1815_v51, %v1814_v40  ;;  %v15826_v4 = vsel %vm1299_vm11, %v1814_v40, %v1825_v20  ;;  %17700 = vst [vmem:[#allocation52_spill] sm:$0xff] %v15905_v55  ;;  %v15930_v40 = vld [vmem:[%s15144_s19 + $0x40] sm:$0xff]  }
  0x94   : > { %12866 = vmatprep.mubr.bf16.mxu0 %v15478_v10  ;;  %17694 = vst [vmem:[#allocation46_spill] sm:$0xff] %v15826_v4  ;;  %v1833_v51 = vor.u32 %v1831_v61, %v15816_v21  ;;  %v15946_v61 = vld [vmem:[%s15144_s19 + $0x50] sm:$0xff]  }
  0x95   : > { %12661 = vmatpush3.bf16.msra.mxu1 %v14755_v31  ;;  %v15823_v59 = vsel %vm1299_vm11, %v15663_v53, %v1817_v0  ;;  %v14756_v53 = vld [vmem:[%s17538_s7 + $0x110] sm:$0xff]   ;;  %v15942_v0 = vld [vmem:[%s15144_s19 + $0x48] sm:$0xff]  }
  0x96   : > { %14662 = vmatprep.subr.msk.bf16.mxu1 %vm1890_vm0, %v14874_v60  ;;  %17693 = vst [vmem:[#allocation45_spill] sm:$0xff] %v15823_v59  ;;  %v15845_v31 = vsel %vm1299_vm11, %v1822_v36, %v1833_v51  ;;  %v14760_v60 = vld [vmem:[%s17538_s7 + $0x130] sm:$0xff]  }
  0x97   : > { %17695 = vst [vmem:[#allocation47_spill] sm:$0xff] %v15845_v31 }
  0x98   : > { %12627 = vmatmul.mubr.msk.bf16.gmra.mrb[16].mxu1 %vm1835_vm1, %v15750_v58 }
  0x99   : > { %12630 = vmatprep.mubr.msk.bf16.mxu1 %vm1835_vm1, %v15754_v24 }
  0x9b   : > { %12867 = vmatmul.mubr.bf16.gmra.mrb[32].mxu0 %v15505_v23 }
  0x9c   : > { %12870 = vmatprep.mubr.bf16.mxu0 %v15568_v45 }
  0xa0   : > { %12631 = vmatmul.mubr.msk.bf16.gmra.mrb[20].mxu1 %vm1835_vm1, %v15774_v56 }
  0xa1   : > { %12634 = vmatprep.mubr.msk.bf16.mxu1 %vm1835_vm1, %v15778_v52 }
  0xa3   : > { %12871 = vmatmul.mubr.bf16.gmra.mrb[36].mxu0 %v15571_v19 }
  0xa4   : > { %12874 = vmatprep.mubr.bf16.mxu0 %v15624_v34 }
  0xa8   : > { %12635 = vmatmul.mubr.msk.bf16.gmra.mrb[24].mxu1 %vm1835_vm1, %v15799_v7 }
  0xa9   : > { %12638 = vmatprep.mubr.msk.bf16.mxu1 %vm1835_vm1, %v15803_v28 }
  0xab   : > { %12875 = vmatmul.mubr.bf16.gmra.mrb[40].mxu0 %v15810_v62 }
  0xac   : > { %12880 = vmatprep.mubr.msk.bf16.mxu0 %vm1835_vm1, %v15230_v41  ;;  %v17715_v41 = vld [vmem:[#allocation7_spill] sm:$0xff] }
  0xb0   : > { %12639 = vmatmul.mubr.msk.bf16.gmra.mrb[28].mxu1 %vm1835_vm1, %v15823_v59 }
  0xb1   : > { %12642 = vmatprep.mubr.msk.bf16.mxu1 %vm1835_vm1, %v15826_v4 }
  0xb3   : > { %12881 = vmatmul.mubr.msk.bf16.vlgmr.msra.gmra.mrb[8].mxu0 %vm1835_vm1, %v15646_v8 }
  0xb4   : > { %12917 = vmatpush3.bf16.msra.mxu0 %v15591_v22  ;;  %12884 = vmatprep.mubr.msk.bf16.mxu0 %vm1835_vm1, %v15678_v14  ;;  %v14758_v22 = vld [vmem:[%s17538_s7 + $0x120] sm:$0xff]   ;;  %v16106_v14 = vld [vmem:[%s15077_s24 + $0x78] sm:$0xff]  }
  0xb5   : > { %12918 = vmatprep.subr.bf16.mxu0 %v14754_v35 }
  0xb8   : > { %12643 = vmatmul.mubr.msk.bf16.gmra.mrb[32].mxu1 %vm1835_vm1, %v15845_v31  ;;  %12919 = vmatpush3.bf16.msra.mxu0 %v14754_v35 }
  0xb9   : > { %12662 = vmatprep.mubr.bf16.mxu1 %v15043_v6  ;;  %12920 = vmatprep.subr.bf16.mxu0 %v14756_v53 }
  0xbb   : > { %12885 = vmatmul.mubr.msk.bf16.gmra.mrb[12].mxu0 %vm1835_vm1, %v15682_v33 }
  0xbc   : > { %12888 = vmatprep.mubr.msk.bf16.mxu0 %vm1835_vm1, %v15704_v50  ;;  %12921 = vmatpush3.bf16.msra.mxu0 %v14756_v53 }
  0xbd   : > { %12922 = vmatprep.subr.bf16.mxu0 %v14757_v46 }
  0xc0   : > { %12663 = vmatmul.mubr.bf16.vlgmr.msra.gmra.mrb[0].mxu1 %v15043_v6  ;;  %12923 = vmatpush3.bf16.msra.mxu0 %v14757_v46  ;;  %v15960_v46 = vld [vmem:[%s15144_s19 + $0x58] sm:$0xff]  }
  0xc1   : > { %12666 = vmatprep.mubr.bf16.mxu1 %v15867_v32  ;;  %12924 = vmatprep.subr.bf16.mxu0 %v14758_v22 }
  0xc2   : > { %13799 = vmatpush3.bf16.msra.mxu1 %v15038_v3  ;;  %v15887_v3 = vld [vmem:[%s15144_s19 + $0x10] sm:$0xff]  }
  0xc3   : > { %12889 = vmatmul.mubr.msk.bf16.gmra.mrb[16].mxu0 %vm1835_vm1, %v15708_v44  ;;  %12736 = vmatprep.subr.bf16.mxu1 %v15863_v26  ;;  %17698 = vst [vmem:[#allocation50_spill] sm:$0xff] %v15887_v3  ;;  %v1266_v34 = vsel %vm15082_vm9, 0, %v15887_v3 }
  0xc4   : > { %12892 = vmatprep.mubr.msk.bf16.mxu0 %vm1835_vm1, %v15730_v5  ;;  %12925 = vmatpush3.bf16.msra.mxu0 %v14758_v22  ;;  %v15966_v22 = vsel %vm1299_vm11, %v15816_v21, %v15184_v63  ;;  %v4394_v63 = vsel %vm1890_vm0, %v11346_v54, 0  ;;  %v15983_v21 = vld [vmem:[%s15144_s19 + $0x70] sm:$0xff]   ;;  %v1265_v5 = vsel %vm15082_vm9, 0, %v15883_v25  ;;  %v2745_v19 = vshll.u32 %v1266_v34, 16 }
  0xc5   : > { %12926 = vmatprep.subr.bf16.mxu0 %v14759_v18  ;;  %17703 = vst [vmem:[#allocation55_spill] sm:$0xff] %v15966_v22  ;;  %v2737_v33 = vshll.u32 %v1265_v5, 16 }
  0xc6   : > { %v2747_v10 = vrot.slane %v2745_v19, 1 }
  0xc7   : > { %v2739_v62 = vrot.slane %v2737_v33, 1  ;;  %v1267_v33 = vsel %vm15082_vm9, 0, %v15901_v43 }
  0xc8   : > { %12667 = vmatmul.mubr.bf16.gmra.mrb[4].mxu1 %v15883_v25  ;;  %12927 = vmatpush3.bf16.msra.mxu0 %v14759_v18  ;;  %v2753_v45 = vshll.u32 %v1267_v33, 16 }
  0xc9   : > { %12670 = vmatprep.mubr.bf16.mxu1 %v15887_v3  ;;  %12928 = vmatprep.subr.bf16.mxu0 %v14760_v60 }
  0xcb   : > { %12893 = vmatmul.mubr.msk.bf16.gmra.mrb[20].mxu0 %vm1835_vm1, %v15734_v2  ;;  %v1264_v2 = vsel %vm15082_vm9, 0, %v15867_v32 }
  0xcc   : > { %12896 = vmatprep.mubr.msk.bf16.mxu0 %vm1835_vm1, %v15750_v58  ;;  %12929 = vmatpush3.bf16.msra.mxu0 %v14760_v60  ;;  %v15971_v60 = vld [vmem:[%s15144_s19 + $0x60] sm:$0xff]   ;;  %v2729_v44 = vshll.u32 %v1264_v2, 16  ;;  %v2733_v50 = vshrl.u32 %v1264_v2, 16  ;;  %v17716_v2 = vld [vmem:[#allocation5_spill] sm:$0xff] }
  0xcd   : > { %12930 = vmatprep.subr.bf16.mxu0 %v14761_v12  ;;  %17704 = vst [vmem:[#allocation56_spill] sm:$0xff] %v15971_v60  ;;  %v17732_v58 = vld [vmem:[#allocation21_spill] sm:$0xff] }
  0xce   : > { %v2731_v8 = vrot.slane %v2729_v44, 1  ;;  %v2741_v44 = vshrl.u32 %v1265_v5, 16  ;;  %v1268_v5 = vsel %vm15082_vm9, 0, %v15905_v55 }
  0xd0   : > { %12671 = vmatmul.mubr.bf16.gmra.mrb[8].mxu1 %v15901_v43  ;;  %12931 = vmatpush3.bf16.msra.mxu0 %v14761_v12  ;;  %v15978_v12 = vld [vmem:[%s15144_s19 + $0x68] sm:$0xff]   ;;  %v2743_v23 = vor.u32 %v2741_v44, %v2739_v62 }
  0xd1   : > { %12674 = vmatprep.mubr.bf16.mxu1 %v15905_v55  ;;  %14665 = vmatprep.subr.msk.bf16.mxu0 %vm1890_vm0, %v11346_v54  ;;  %v15999_v54 = vld [vmem:[%s15077_s24 + $0x10] sm:$0xff]  }
  0xd2   : > { %17705 = vst [vmem:[#allocation57_spill] sm:$0xff] %v15999_v54  ;;  %v16147_v44 = vsel %vm2712_vm8, %v2743_v23, %v2747_v10  ;;  %v14773_v23 = vld [vmem:[%s17538_s7 + $0x158] sm:$0xff]  }
  0xd3   : > { %12897 = vmatmul.mubr.msk.bf16.gmra.mrb[24].mxu0 %vm1835_vm1, %v15754_v24  ;;  %v16081_v24 = vld [vmem:[%s15077_s24 + $0x60] sm:$0xff]  }
  0xd4   : > { %12900 = vmatprep.mubr.msk.bf16.mxu0 %vm1835_vm1, %v15774_v56  ;;  %v16064_v56 = vld [vmem:[%s15077_s24 + $0x48] sm:$0xff]  }
  0xd5   : > { %17712 = vst [vmem:[#allocation64_spill] sm:$0xff] %v16064_v56 }
  0xd8   : > { %12675 = vmatmul.mubr.bf16.gmra.mrb[12].mxu1 %v15914_v47 }
  0xd9   : > { %12678 = vmatprep.mubr.bf16.mxu1 %v15918_v49 }
  0xdb   : > { %12901 = vmatmul.mubr.msk.bf16.gmra.mrb[28].mxu0 %vm1835_vm1, %v15778_v52  ;;  %v14769_v52 = vld [vmem:[%s17538_s7 + $0xb8] sm:$0xff]  }
  0xdc   : > { %12904 = vmatprep.mubr.msk.bf16.mxu0 %vm1835_vm1, %v15799_v7  ;;  %v16046_v7 = vld [vmem:[%s15077_s24 + $0x38] sm:$0xff]  }
  0xdd   : > { %17710 = vst [vmem:[#allocation62_spill] sm:$0xff] %v16046_v7 }
  0xe0   : > { %12679 = vmatmul.mubr.bf16.gmra.mrb[16].mxu1 %v15926_v9 }
  0xe1   : > { %12682 = vmatprep.mubr.bf16.mxu1 %v15930_v40 }
  0xe3   : > { %12905 = vmatmul.mubr.msk.bf16.gmra.mrb[32].mxu0 %vm1835_vm1, %v15803_v28  ;;  %v14767_v28 = vld [vmem:[%s17538_s7 + $0xa8] sm:$0xff]  }
  0xe4   : > { %12908 = vmatprep.mubr.msk.bf16.mxu0 %vm1835_vm1, %v15823_v59  ;;  %v16028_v59 = vld [vmem:[%s15077_s24 + $0x28] sm:$0xff]  }
  0xe5   : > { %17708 = vst [vmem:[#allocation60_spill] sm:$0xff] %v16028_v59 }
  0xe6   : > { %v15937_v13 = vpop.f32.mrb[0].mxu0 }
  0xe7   : > { %v2442_v36 = vpop.f32.mrb[1].mxu0 }
  0xe8   : > { %v15939_v39 = vpop.f32.mrb[2].mxu0  ;;  %12683 = vmatmul.mubr.bf16.gmra.mrb[20].mxu1 %v15942_v0  ;;  %v15989_v36 = vld [vmem:[%s17538_s7 + $0x140] sm:$0xff]  }
  0xe9   : > { %v2445_v20 = vpop.f32.mrb[3].mxu0  ;;  %12686 = vmatprep.mubr.bf16.mxu1 %v15946_v61 }
  0xea   : > { %v15995_v20 = vld [vmem:[%s15144_s19 + $0x78] sm:$0xff]  }
  0xeb   : > { %12909 = vmatmul.mubr.msk.bf16.gmra.mrb[36].mxu0 %vm1835_vm1, %v15826_v4  ;;  %v14765_v4 = vld [vmem:[%s17538_s7 + $0x98] sm:$0xff]  }
  0xec   : > { %12912 = vmatprep.mubr.msk.bf16.mxu0 %vm1835_vm1, %v15845_v31  ;;  %v14764_v31 = vld [vmem:[%s17538_s7 + $0x90] sm:$0xff]  }
  0xee   : > { %v15953_v35 = vpop.f32.mrb[4].mxu0 }
  0xef   : > { %v15955_v51 = vpop.f32.mrb[5].mxu0 }
  0xf0   : > { %v15957_v53 = vpop.f32.mrb[6].mxu0  ;;  %12687 = vmatmul.mubr.bf16.gmra.mrb[24].mxu1 %v15960_v46 }
  0xf1   : > { %v15968_v18 = vpop.f32.mrb[7].mxu0  ;;  %12690 = vmatprep.mubr.bf16.mxu1 %v15971_v60 }
  0xf3   : > { %12913 = vmatmul.mubr.msk.bf16.gmra.mrb[40].mxu0 %vm1835_vm1, %v15966_v22  ;;  %v16014_v22 = vld [vmem:[%s15077_s24 + $0x20] sm:$0xff]  }
  0xf4   : > { %12932 = vmatprep.mubr.bf16.mxu0 %v15043_v6  ;;  %17707 = vst [vmem:[#allocation59_spill] sm:$0xff] %v16014_v22 }
  0xf8   : > { %12691 = vmatmul.mubr.bf16.gmra.mrb[28].mxu1 %v15978_v12 }
  0xf9   : > { %12694 = vmatprep.mubr.bf16.mxu1 %v15983_v21 }
  0xfb   : > { %12933 = vmatmul.mubr.bf16.vlgmr.msra.gmra.mrb[8].mxu0 %v15867_v32  ;;  %v2735_v32 = vor.u32 %v2733_v50, %v2731_v8 }
  0xfc   : > { %12969 = vmatpush3.bf16.msra.mxu0 %v4394_v63  ;;  %12936 = vmatprep.mubr.bf16.mxu0 %v15883_v25  ;;  %v14763_v63 = vld [vmem:[%s17538_s7 + $0x88] sm:$0xff]   ;;  %v16119_v25 = vsel %vm2712_vm8, %v17716_v2, %v2731_v8  ;;  %v16136_v2 = vld [vmem:[%s15077_s24] sm:$0xff]  }
  0xfd   : > { %13006 = vmatprep.subr.bf16.mxu0 %v15989_v36  ;;  %v16125_v50 = vsel %vm2712_vm8, %v2735_v32, %v2739_v62  ;;  %v14771_v8 = vld [vmem:[%s17538_s7 + $0x148] sm:$0xff]   ;;  %17717 = vst [vmem:[#allocation7_spill] sm:$0xff] %v16136_v2  ;;  %v2755_v62 = vrot.slane %v2753_v45, 1  ;;  %v2761_v32 = vshll.u32 %v1268_v5, 16 }
  0xff   : > { %v2763_v45 = vrot.slane %v2761_v32, 1  ;;  %v14774_v32 = vld [vmem:[%s17538_s7 + $0x160] sm:$0xff]  }
 0x100   : > { %12695 = vmatmul.mubr.bf16.gmra.mrb[32].mxu1 %v15995_v20 }
 0x101   : > { %12708 = vmatprep.mubr.msk.bf16.mxu1 %vm1835_vm1, %v15999_v54 }
 0x103   : > { %12937 = vmatmul.mubr.bf16.gmra.mrb[12].mxu0 %v15887_v3  ;;  %v2749_v3 = vshrl.u32 %v1266_v34, 16  ;;  %v16142_v34 = vld [vmem:[%s15077_s24 + $0x8] sm:$0xff]  }
 0x104   : > { %12940 = vmatprep.mubr.bf16.mxu0 %v15901_v43  ;;  %17718 = vst [vmem:[#allocation66_spill] sm:$0xff] %v16142_v34  ;;  %v1270_v43 = vsel %vm15082_vm9, 0, %v15918_v49 }
 0x105   : > { %v2751_v19 = vor.u32 %v2749_v3, %v2747_v10 }
 0x107   : > { %v16157_v3 = vsel %vm2712_vm8, %v2751_v19, %v2755_v62  ;;  %v2777_v19 = vshll.u32 %v1270_v43, 16 }
 0x108   : > { %12709 = vmatmul.mubr.msk.bf16.vlgmr.msra.gmra.mrb[8].mxu1 %vm1835_vm1, %v16009_v27 }
 0x109   : > { %12712 = vmatprep.mubr.msk.bf16.mxu1 %vm1835_vm1, %v16014_v22  ;;  %12737 = vmatpush3.bf16.msra.mxu1 %v15863_v26  ;;  %v16033_v26 = vld [vmem:[%s15077_s24 + $0x30] sm:$0xff]  }
 0x10a   : > { %12738 = vmatprep.subr.bf16.mxu1 %v14763_v63  ;;  %17709 = vst [vmem:[#allocation61_spill] sm:$0xff] %v16033_v26 }
 0x10b   : > { %12941 = vmatmul.mubr.bf16.gmra.mrb[16].mxu0 %v15905_v55  ;;  %v14772_v55 = vld [vmem:[%s17538_s7 + $0x150] sm:$0xff]  }
 0x10c   : > { %12944 = vmatprep.mubr.bf16.mxu0 %v15914_v47 }
 0x10d   : > { %12739 = vmatpush3.bf16.msra.mxu1 %v14763_v63  ;;  %v14766_v63 = vld [vmem:[%s17538_s7 + $0xa0] sm:$0xff]  }
 0x10e   : > { %12740 = vmatprep.subr.bf16.mxu1 %v14764_v31 }
 0x110   : > { %12713 = vmatmul.mubr.msk.bf16.gmra.mrb[12].mxu1 %vm1835_vm1, %v16028_v59 }
 0x111   : > { %12716 = vmatprep.mubr.msk.bf16.mxu1 %vm1835_vm1, %v16033_v26  ;;  %12741 = vmatpush3.bf16.msra.mxu1 %v14764_v31  ;;  %v16051_v31 = vld [vmem:[%s15077_s24 + $0x40] sm:$0xff]  }
 0x112   : > { %12742 = vmatprep.subr.bf16.mxu1 %v14765_v4  ;;  %17711 = vst [vmem:[#allocation63_spill] sm:$0xff] %v16051_v31 }
 0x113   : > { %12945 = vmatmul.mubr.bf16.gmra.mrb[20].mxu0 %v15918_v49  ;;  %v1271_v49 = vsel %vm15082_vm9, 0, %v15926_v9 }
 0x114   : > { %12948 = vmatprep.mubr.bf16.mxu0 %v15926_v9 }
 0x115   : > { %12743 = vmatpush3.bf16.msra.mxu1 %v14765_v4  ;;  %v14768_v4 = vld [vmem:[%s17538_s7 + $0xb0] sm:$0xff]  }
 0x116   : > { %12744 = vmatprep.subr.bf16.mxu1 %v14766_v63 }
 0x118   : > { %12717 = vmatmul.mubr.msk.bf16.gmra.mrb[16].mxu1 %vm1835_vm1, %v16046_v7 }
 0x119   : > { %12720 = vmatprep.mubr.msk.bf16.mxu1 %vm1835_vm1, %v16051_v31  ;;  %12745 = vmatpush3.bf16.msra.mxu1 %v14766_v63  ;;  %v16069_v63 = vld [vmem:[%s15077_s24 + $0x50] sm:$0xff]  }
 0x11a   : > { %12746 = vmatprep.subr.bf16.mxu1 %v14767_v28  ;;  %17713 = vst [vmem:[#allocation65_spill] sm:$0xff] %v16069_v63 }
 0x11b   : > { %12949 = vmatmul.mubr.bf16.gmra.mrb[24].mxu0 %v15930_v40 }
 0x11c   : > { %12952 = vmatprep.mubr.bf16.mxu0 %v15942_v0 }
 0x11d   : > { %12747 = vmatpush3.bf16.msra.mxu1 %v14767_v28  ;;  %v16076_v28 = vld [vmem:[%s15077_s24 + $0x58] sm:$0xff]  }
 0x11e   : > { %12748 = vmatprep.subr.bf16.mxu1 %v14768_v4 }
 0x120   : > { %12721 = vmatmul.mubr.msk.bf16.gmra.mrb[20].mxu1 %vm1835_vm1, %v16064_v56 }
 0x121   : > { %12724 = vmatprep.mubr.msk.bf16.mxu1 %vm1835_vm1, %v16069_v63  ;;  %12749 = vmatpush3.bf16.msra.mxu1 %v14768_v4  ;;  %v16088_v4 = vld [vmem:[%s15077_s24 + $0x68] sm:$0xff]  }
 0x122   : > { %12750 = vmatprep.subr.bf16.mxu1 %v14769_v52 }
 0x123   : > { %12953 = vmatmul.mubr.bf16.gmra.mrb[28].mxu0 %v15946_v61 }
 0x124   : > { %12956 = vmatprep.mubr.bf16.mxu0 %v15960_v46 }
 0x125   : > { %12751 = vmatpush3.bf16.msra.mxu1 %v14769_v52  ;;  %v16093_v52 = vld [vmem:[%s15077_s24 + $0x70] sm:$0xff]  }
 0x128   : > { %12725 = vmatmul.mubr.msk.bf16.gmra.mrb[24].mxu1 %vm1835_vm1, %v16076_v28 }
 0x129   : > { %12728 = vmatprep.mubr.msk.bf16.mxu1 %vm1835_vm1, %v16081_v24 }
 0x12b   : > { %12957 = vmatmul.mubr.bf16.gmra.mrb[32].mxu0 %v15971_v60 }
 0x12c   : > { %12960 = vmatprep.mubr.bf16.mxu0 %v15978_v12 }
 0x130   : > { %12729 = vmatmul.mubr.msk.bf16.gmra.mrb[28].mxu1 %vm1835_vm1, %v16088_v4 }
 0x131   : > { %12732 = vmatprep.mubr.msk.bf16.mxu1 %vm1835_vm1, %v16093_v52 }
 0x133   : > { %12961 = vmatmul.mubr.bf16.gmra.mrb[36].mxu0 %v15983_v21 }
 0x134   : > { %12964 = vmatprep.mubr.bf16.mxu0 %v15995_v20 }
 0x138   : > { %12733 = vmatmul.mubr.msk.bf16.gmra.mrb[32].mxu1 %vm1835_vm1, %v16106_v14 }
 0x139   : > { %12752 = vmatprep.mubr.bf16.mxu1 %v17715_v41 }
 0x13b   : > { %12965 = vmatmul.mubr.bf16.gmra.mrb[40].mxu0 %v15043_v6 }
 0x13c   : > { %12970 = vmatprep.mubr.msk.bf16.mxu0 %vm1835_vm1, %v15043_v6 }
 0x140   : > { %12753 = vmatmul.mubr.bf16.vlgmr.msra.gmra.mrb[36].mxu1 %v16119_v25 }
 0x141   : > { %12756 = vmatprep.mubr.bf16.mxu1 %v16125_v50 }
 0x143   : > { %12971 = vmatmul.mubr.msk.bf16.vlgmr.msra.gmra.mrb[8].mxu0 %vm1835_vm1, %v16136_v2  ;;  %v2757_v2 = vshrl.u32 %v1267_v33, 16 }
 0x144   : > { %13007 = vmatpush3.bf16.msra.mxu0 %v15989_v36  ;;  %12974 = vmatprep.mubr.msk.bf16.mxu0 %vm1835_vm1, %v16142_v34  ;;  %v1269_v36 = vsel %vm15082_vm9, 0, %v15914_v47  ;;  %v2765_v34 = vshrl.u32 %v1268_v5, 16 }
 0x145   : > { %13008 = vmatprep.subr.bf16.mxu0 %v14771_v8  ;;  %v2769_v10 = vshll.u32 %v1269_v36, 16  ;;  %v2759_v33 = vor.u32 %v2757_v2, %v2755_v62  ;;  %v2773_v2 = vshrl.u32 %v1269_v36, 16 }
 0x147   : > { %v2771_v5 = vrot.slane %v2769_v10, 1  ;;  %v16177_v47 = vsel %vm2712_vm8, %v2759_v33, %v2763_v45  ;;  %v2785_v10 = vshll.u32 %v1271_v49, 16 }
 0x148   : > { %12757 = vmatmul.mubr.bf16.gmra.mrb[40].mxu1 %v16147_v44  ;;  %13009 = vmatpush3.bf16.msra.mxu0 %v14771_v8  ;;  %v2767_v8 = vor.u32 %v2765_v34, %v2763_v45  ;;  %v2781_v34 = vshrl.u32 %v1270_v43, 16  ;;  %v1272_v45 = vsel %vm15082_vm9, 0, %v15930_v40 }
 0x149   : > { %13010 = vmatprep.subr.bf16.mxu0 %v14772_v55  ;;  %12760 = vmatprep.mubr.bf16.mxu1 %v16157_v3  ;;  %v2775_v36 = vor.u32 %v2773_v2, %v2771_v5  ;;  %v2793_v33 = vshll.u32 %v1272_v45, 16 }
 0x14a   : > { %v16180_v62 = vsel %vm2712_vm8, %v2767_v8, %v2771_v5  ;;  %v14776_v8 = vld [vmem:[%s17538_s7 + $0x170] sm:$0xff]   ;;  %v2789_v5 = vshrl.u32 %v1271_v49, 16 }
 0x14b   : > { %12975 = vmatmul.mubr.msk.bf16.gmra.mrb[12].mxu0 %vm1835_vm1, %v15999_v54 }
 0x14c   : > { %12978 = vmatprep.mubr.msk.bf16.mxu0 %vm1835_vm1, %v16009_v27  ;;  %13011 = vmatpush3.bf16.msra.mxu0 %v14772_v55  ;;  %v2779_v55 = vrot.slane %v2777_v19, 1  ;;  %v14775_v27 = vld [vmem:[%s17538_s7 + $0x168] sm:$0xff]   ;;  %v1273_v19 = vsel %vm15082_vm9, 0, %v15942_v0 }
 0x14d   : > { %13012 = vmatprep.subr.bf16.mxu0 %v14773_v23 }
 0x14e   : > { %v2783_v43 = vor.u32 %v2781_v34, %v2779_v55  ;;  %v16201_v54 = vsel %vm2712_vm8, %v2775_v36, %v2779_v55  ;;  %v2797_v34 = vshrl.u32 %v1272_v45, 16  ;;  %v1274_v55 = vsel %vm15082_vm9, 0, %v15946_v61 }
 0x14f   : > { %v2809_v36 = vshll.u32 %v1274_v55, 16 }
 0x150   : > { %13013 = vmatpush3.bf16.msra.mxu0 %v14773_v23  ;;  %12761 = vmatmul.mubr.bf16.gmra.mrb[8].mxu1 %v16177_v47  ;;  %v2787_v23 = vrot.slane %v2785_v10, 1  ;;  %v2801_v10 = vshll.u32 %v1273_v19, 16 }
 0x151   : > { %13014 = vmatprep.subr.bf16.mxu0 %v14774_v32  ;;  %12764 = vmatprep.mubr.bf16.mxu1 %v16180_v62 }
 0x152   : > { %v16204_v2 = vsel %vm2712_vm8, %v2783_v43, %v2787_v23  ;;  %v2803_v45 = vrot.slane %v2801_v10, 1  ;;  %v1275_v43 = vsel %vm15082_vm9, 0, %v15960_v46 }
 0x153   : > { %12979 = vmatmul.mubr.msk.bf16.gmra.mrb[16].mxu0 %vm1835_vm1, %v16014_v22  ;;  %v2817_v10 = vshll.u32 %v1275_v43, 16 }
 0x154   : > { %12982 = vmatprep.mubr.msk.bf16.mxu0 %vm1835_vm1, %v16028_v59  ;;  %13015 = vmatpush3.bf16.msra.mxu0 %v14774_v32  ;;  %v2795_v32 = vrot.slane %v2793_v33, 1  ;;  %v14777_v59 = vld [vmem:[%s17538_s7 + $0x178] sm:$0xff]   ;;  %v11389_v33 = vld [vmem:[%s17537_s6 + $0x14] sm:$0xf] }
 0x155   : > { %13016 = vmatprep.subr.bf16.mxu0 %v14775_v27 }
 0x156   : > { %v2799_v49 = vor.u32 %v2797_v34, %v2795_v32  ;;  %v2813_v34 = vshrl.u32 %v1274_v55, 16 }
 0x158   : > { %13017 = vmatpush3.bf16.msra.mxu0 %v14775_v27  ;;  %12765 = vmatmul.mubr.bf16.gmra.mrb[12].mxu1 %v16201_v54  ;;  %v2791_v27 = vor.u32 %v2789_v5, %v2787_v23  ;;  %v2805_v23 = vshrl.u32 %v1273_v19, 16  ;;  %v16228_v5 = vsel %vm2712_vm8, %v2799_v49, %v2803_v45 }
 0x159   : > { %13018 = vmatprep.subr.bf16.mxu0 %v14776_v8  ;;  %12768 = vmatprep.mubr.bf16.mxu1 %v16204_v2 }
 0x15a   : > { %v16225_v22 = vsel %vm2712_vm8, %v2791_v27, %v2795_v32  ;;  %v2819_v32 = vrot.slane %v2817_v10, 1  ;;  %v1277_v27 = vsel %vm15082_vm9, 0, %v15978_v12 }
 0x15b   : > { %12983 = vmatmul.mubr.msk.bf16.gmra.mrb[20].mxu0 %vm1835_vm1, %v16033_v26 }
 0x15c   : > { %12986 = vmatprep.mubr.msk.bf16.mxu0 %vm1835_vm1, %v16046_v7  ;;  %13019 = vmatpush3.bf16.msra.mxu0 %v14776_v8  ;;  %v2811_v8 = vrot.slane %v2809_v36, 1  ;;  %v1276_v7 = vsel %vm15082_vm9, 0, %v15971_v60  ;;  %v2821_v36 = vshrl.u32 %v1275_v43, 16 }
 0x15d   : > { %13020 = vmatprep.subr.bf16.mxu0 %v14777_v59  ;;  %v2825_v55 = vshll.u32 %v1276_v7, 16 }
 0x15e   : > { %v2815_v19 = vor.u32 %v2813_v34, %v2811_v8 }
 0x15f   : > { %v2827_v60 = vrot.slane %v2825_v55, 1 }
 0x160   : > { %13021 = vmatpush3.bf16.msra.mxu0 %v14777_v59  ;;  %12769 = vmatmul.mubr.bf16.gmra.mrb[16].mxu1 %v16225_v22  ;;  %v2807_v59 = vor.u32 %v2805_v23, %v2803_v45  ;;  %v16247_v26 = vsel %vm2712_vm8, %v2815_v19, %v2819_v32  ;;  %v2833_v45 = vshll.u32 %v1277_v27, 16  ;;  %v1278_v23 = vsel %vm15082_vm9, 0, %v15983_v21 }
 0x161   : > { %14666 = vmatprep.subr.msk.bf16.mxu0 %vm1890_vm0, %v11389_v33  ;;  %12772 = vmatprep.mubr.bf16.mxu1 %v16228_v5  ;;  %v2841_v10 = vshll.u32 %v1278_v23, 16  ;;  %v2837_v19 = vshrl.u32 %v1277_v27, 16 }
 0x162   : > { %v16244_v49 = vsel %vm2712_vm8, %v2807_v59, %v2811_v8  ;;  %v2823_v8 = vor.u32 %v2821_v36, %v2819_v32  ;;  %v2835_v34 = vrot.slane %v2833_v45, 1 }
 0x163   : > { %12987 = vmatmul.mubr.msk.bf16.gmra.mrb[24].mxu0 %vm1835_vm1, %v16051_v31  ;;  %v2829_v31 = vshrl.u32 %v1276_v7, 16  ;;  %v1279_v7 = vsel %vm15082_vm9, 0, %v15995_v20 }
 0x164   : > { %12990 = vmatprep.mubr.msk.bf16.mxu0 %vm1835_vm1, %v16064_v56  ;;  %v16262_v59 = vsel %vm2712_vm8, %v2823_v8, %v2827_v60  ;;  %v2843_v56 = vrot.slane %v2841_v10, 1  ;;  %v2849_v32 = vshll.u32 %v1279_v7, 16  ;;  %v2853_v45 = vshrl.u32 %v1279_v7, 16 }
 0x165   : > { %v2831_v43 = vor.u32 %v2829_v31, %v2827_v60  ;;  %v2839_v31 = vor.u32 %v2837_v19, %v2835_v34 }
 0x166   : > { %v2851_v36 = vrot.slane %v2849_v32, 1 }
 0x167   : > { %v16265_v55 = vsel %vm2712_vm8, %v2831_v43, %v2835_v34  ;;  %v16274_v27 = vsel %vm2712_vm8, %v2839_v31, %v2843_v56  ;;  %v4946_v43 = vsel %vm1890_vm0, %v11389_v33, 0  ;;  %v14778_v34 = vld [vmem:[%s17538_s7 + $0x180] sm:$0xff]  }
 0x168   : > { %12773 = vmatmul.mubr.bf16.gmra.mrb[20].mxu1 %v16244_v49  ;;  %v2855_v8 = vor.u32 %v2853_v45, %v2851_v36 }
 0x169   : > { %12776 = vmatprep.mubr.bf16.mxu1 %v16247_v26 }
 0x16b   : > { %12991 = vmatmul.mubr.msk.bf16.gmra.mrb[28].mxu0 %vm1835_vm1, %v16069_v63  ;;  %v2845_v63 = vshrl.u32 %v1278_v23, 16 }
 0x16c   : > { %12994 = vmatprep.mubr.msk.bf16.mxu0 %vm1835_vm1, %v16076_v28 }
 0x16d   : > { %v2847_v60 = vor.u32 %v2845_v63, %v2843_v56  ;;  %v16287_v63 = vsel %vm2712_vm8, %v2855_v8, %v15109_v29  ;;  %v17719_v56 = vld [vmem:[#allocation6_spill] sm:$0xff] }
 0x16f   : > { %v16277_v23 = vsel %vm2712_vm8, %v2847_v60, %v2851_v36 }
 0x170   : > { %12777 = vmatmul.mubr.bf16.gmra.mrb[24].mxu1 %v16262_v59 }
 0x171   : > { %12780 = vmatprep.mubr.bf16.mxu1 %v16265_v55 }
 0x173   : > { %12995 = vmatmul.mubr.msk.bf16.gmra.mrb[32].mxu0 %vm1835_vm1, %v16081_v24 }
 0x174   : > { %12998 = vmatprep.mubr.msk.bf16.mxu0 %vm1835_vm1, %v16088_v4 }
 0x178   : > { %12781 = vmatmul.mubr.bf16.gmra.mrb[28].mxu1 %v16274_v27 }
 0x179   : > { %12784 = vmatprep.mubr.bf16.mxu1 %v16277_v23 }
 0x17b   : > { %12999 = vmatmul.mubr.msk.bf16.gmra.mrb[36].mxu0 %vm1835_vm1, %v16093_v52 }
 0x17c   : > { %13002 = vmatprep.mubr.msk.bf16.mxu0 %vm1835_vm1, %v16106_v14 }
 0x180   : > { %12785 = vmatmul.mubr.bf16.gmra.mrb[32].mxu1 %v16287_v63 }
 0x181   : > { %13382 = vmatprep.mubr.bf16.mxu1 %v17719_v56  ;;  %v17734_v56 = vld [vmem:[#allocation23_spill] sm:$0xff] }
 0x183   : > { %13003 = vmatmul.mubr.msk.bf16.gmra.mrb[40].mxu0 %vm1835_vm1, %v15043_v6 }
 0x184   : > { %13022 = vmatprep.mubr.bf16.mxu0 %v16119_v25 }
 0x18b   : > { %13023 = vmatmul.mubr.bf16.vlgmr.msra.gmra.mrb[8].mxu0 %v16125_v50 }
 0x18c   : > { %13059 = vmatpush3.bf16.msra.mxu0 %v4946_v43  ;;  %13026 = vmatprep.mubr.bf16.mxu0 %v16147_v44  ;;  %v14780_v43 = vld [vmem:[%s17538_s7 + $0x190] sm:$0xff]  }
 0x18d   : > { %13096 = vmatprep.subr.bf16.mxu0 %v14778_v34 }
 0x193   : > { %13027 = vmatmul.mubr.bf16.gmra.mrb[12].mxu0 %v16157_v3  ;;  %v12664_v29 = vpop.f32.mrb[0].mxu1 }
 0x194   : > { %v16302_v10 = vadd.f32 %v15937_v13, %v12664_v29  ;;  %v2208_v7 = vpop.f32.mrb[1].mxu1  ;;  %13030 = vmatprep.mubr.bf16.mxu0 %v16177_v47  ;;  %v14781_v29 = vld [vmem:[%s17538_s7 + $0x198] sm:$0xff]  }
 0x195   : > { %v12665_v25 = vpop.f32.mrb[2].mxu1  ;;  %v17723_v7 = vld [vmem:[#allocation11_spill] sm:$0xff] }
 0x196   : > { %v16306_v33 = vadd.f32 %v15939_v39, %v12665_v25  ;;  %v2211_v19 = vpop.f32.mrb[3].mxu1  ;;  %v17724_v25 = vld [vmem:[#allocation13_spill] sm:$0xff] }
 0x197   : > { %v14783_v19 = vld [vmem:[%s17538_s7 + $0x1a8] sm:$0xff]  }
 0x19b   : > { %13031 = vmatmul.mubr.bf16.gmra.mrb[16].mxu0 %v16180_v62  ;;  %v12668_v32 = vpop.f32.mrb[4].mxu1 }
 0x19c   : > { %v16310_v31 = vadd.f32 %v15953_v35, %v12668_v32  ;;  %v2224_v60 = vpop.f32.mrb[5].mxu1  ;;  %13034 = vmatprep.mubr.bf16.mxu0 %v16201_v54  ;;  %v17720_v35 = vld [vmem:[#allocation8_spill] sm:$0xff]  ;;  %v17725_v32 = vld [vmem:[#allocation14_spill] sm:$0xff] }
 0x19d   : > { %v16314_v13 = vadd.f32 %v15955_v51, %v2224_v60  ;;  %v12669_v36 = vpop.f32.mrb[6].mxu1  ;;  %v14779_v51 = vld [vmem:[%s17538_s7 + $0x188] sm:$0xff]   ;;  %v17726_v60 = vld [vmem:[#allocation15_spill] sm:$0xff] }
 0x19e   : > { %v16317_v45 = vadd.f32 %v15957_v53, %v12669_v36  ;;  %v2227_v8 = vpop.f32.mrb[7].mxu1  ;;  %v17721_v53 = vld [vmem:[#allocation9_spill] sm:$0xff] }
 0x19f   : > { %v16320_v39 = vadd.f32 %v15968_v18, %v2227_v8  ;;  %v17722_v18 = vld [vmem:[#allocation10_spill] sm:$0xff]  ;;  %v14784_v36 = vld [vmem:[%s17538_s7 + $0x1b0] sm:$0xff]  }
 0x1a0   : > { %v14785_v8 = vld [vmem:[%s17538_s7 + $0x1b8] sm:$0xff]  }
 0x1a3   : > { %13035 = vmatmul.mubr.bf16.gmra.mrb[20].mxu0 %v16204_v2 }
 0x1a4   : > { %13038 = vmatprep.mubr.bf16.mxu0 %v16225_v22 }
 0x1ab   : > { %13039 = vmatmul.mubr.bf16.gmra.mrb[24].mxu0 %v16228_v5 }
 0x1ac   : > { %13042 = vmatprep.mubr.bf16.mxu0 %v16244_v49 }
 0x1b3   : > { %13043 = vmatmul.mubr.bf16.gmra.mrb[28].mxu0 %v16247_v26 }
 0x1b4   : > { %13046 = vmatprep.mubr.bf16.mxu0 %v16262_v59 }
 0x1bb   : > { %13047 = vmatmul.mubr.bf16.gmra.mrb[32].mxu0 %v16265_v55 }
 0x1bc   : > { %13050 = vmatprep.mubr.bf16.mxu0 %v16274_v27 }
 0x1c3   : > { %13051 = vmatmul.mubr.bf16.gmra.mrb[36].mxu0 %v16277_v23 }
 0x1c4   : > { %13054 = vmatprep.mubr.bf16.mxu0 %v16287_v63 }
 0x1cb   : > { %13055 = vmatmul.mubr.bf16.gmra.mrb[40].mxu0 %v17715_v41 }
 0x1cc   : > { %13060 = vmatprep.mubr.msk.bf16.mxu0 %vm1835_vm1, %v17720_v35  ;;  %v17727_v35 = vld [vmem:[#allocation16_spill] sm:$0xff] }
 0x1d3   : > { %13061 = vmatmul.mubr.msk.bf16.vlgmr.msra.gmra.mrb[8].mxu0 %vm1835_vm1, %v17721_v53 }
 0x1d4   : > { %13097 = vmatpush3.bf16.msra.mxu0 %v14778_v34  ;;  %13064 = vmatprep.mubr.msk.bf16.mxu0 %vm1835_vm1, %v17722_v18  ;;  %v14782_v34 = vld [vmem:[%s17538_s7 + $0x1a0] sm:$0xff]  }
 0x1d5   : > { %13098 = vmatprep.subr.bf16.mxu0 %v14779_v51 }
 0x1d8   : > { %13099 = vmatpush3.bf16.msra.mxu0 %v14779_v51  ;;  %v17728_v51 = vld [vmem:[#allocation17_spill] sm:$0xff] }
 0x1d9   : > { %13100 = vmatprep.subr.bf16.mxu0 %v14780_v43 }
 0x1db   : > { %13065 = vmatmul.mubr.msk.bf16.gmra.mrb[12].mxu0 %vm1835_vm1, %v17723_v7 }
 0x1dc   : > { %13068 = vmatprep.mubr.msk.bf16.mxu0 %vm1835_vm1, %v17724_v25  ;;  %13101 = vmatpush3.bf16.msra.mxu0 %v14780_v43  ;;  %v11432_v43 = vld [vmem:[%s17537_s6 + $0x18] sm:$0xf] }
 0x1dd   : > { %13102 = vmatprep.subr.bf16.mxu0 %v14781_v29 }
 0x1e0   : > { %13103 = vmatpush3.bf16.msra.mxu0 %v14781_v29  ;;  %v17729_v29 = vld [vmem:[#allocation18_spill] sm:$0xff] }
 0x1e1   : > { %13104 = vmatprep.subr.bf16.mxu0 %v14782_v34 }
 0x1e3   : > { %13069 = vmatmul.mubr.msk.bf16.gmra.mrb[16].mxu0 %vm1835_vm1, %v17725_v32 }
 0x1e4   : > { %13072 = vmatprep.mubr.msk.bf16.mxu0 %vm1835_vm1, %v17726_v60  ;;  %13105 = vmatpush3.bf16.msra.mxu0 %v14782_v34  ;;  %v17730_v34 = vld [vmem:[#allocation19_spill] sm:$0xff] }
 0x1e5   : > { %13106 = vmatprep.subr.bf16.mxu0 %v14783_v19 }
 0x1e8   : > { %13107 = vmatpush3.bf16.msra.mxu0 %v14783_v19  ;;  %v17731_v19 = vld [vmem:[#allocation20_spill] sm:$0xff] }
 0x1e9   : > { %13108 = vmatprep.subr.bf16.mxu0 %v14784_v36 }
 0x1eb   : > { %13073 = vmatmul.mubr.msk.bf16.gmra.mrb[20].mxu0 %vm1835_vm1, %v17727_v35 }
 0x1ec   : > { %13076 = vmatprep.mubr.msk.bf16.mxu0 %vm1835_vm1, %v17728_v51  ;;  %13109 = vmatpush3.bf16.msra.mxu0 %v14784_v36  ;;  %v17733_v36 = vld [vmem:[#allocation22_spill] sm:$0xff] }
 0x1ed   : > { %13110 = vmatprep.subr.bf16.mxu0 %v14785_v8  ;;  %v17736_v51 = vld [vmem:[#allocation26_spill] sm:$0xff] }
 0x1f0   : > { %13111 = vmatpush3.bf16.msra.mxu0 %v14785_v8  ;;  %v17735_v8 = vld [vmem:[#allocation24_spill] sm:$0xff] }
 0x1f1   : > { %14667 = vmatprep.subr.msk.bf16.mxu0 %vm1890_vm0, %v11432_v43 }
 0x1f3   : > { %13077 = vmatmul.mubr.msk.bf16.gmra.mrb[24].mxu0 %vm1835_vm1, %v17729_v29 }
 0x1f4   : > { %13080 = vmatprep.mubr.msk.bf16.mxu0 %vm1835_vm1, %v17730_v34 }
 0x1fb   : > { %13081 = vmatmul.mubr.msk.bf16.gmra.mrb[28].mxu0 %vm1835_vm1, %v17731_v19 }
 0x1fc   : > { %13084 = vmatprep.mubr.msk.bf16.mxu0 %vm1835_vm1, %v17732_v58 }
 0x203   : > { %13085 = vmatmul.mubr.msk.bf16.gmra.mrb[32].mxu0 %vm1835_vm1, %v17733_v36 }
 0x204   : > { %13088 = vmatprep.mubr.msk.bf16.mxu0 %vm1835_vm1, %v17734_v56 }
 0x20b   : > { %13089 = vmatmul.mubr.msk.bf16.gmra.mrb[36].mxu0 %vm1835_vm1, %v17735_v8  ;;  %v5498_v8 = vsel %vm1890_vm0, %v11432_v43, 0 }
 0x20c   : > { %13092 = vmatprep.mubr.msk.bf16.mxu0 %vm1835_vm1, %v17736_v51  ;;  %v14786_v51 = vld [vmem:[%s17538_s7 + $0x1c0] sm:$0xff]  }
 0x213   : > { %13093 = vmatmul.mubr.msk.bf16.gmra.mrb[40].mxu0 %vm1835_vm1, %v17715_v41  ;;  %v12754_v34 = vpop.f32.mrb[36].mxu1 }
 0x214   : > { %v16395_v19 = vadd.f32 %v12754_v34, %v16302_v10  ;;  %v2961_v58 = vpop.f32.mrb[37].mxu1  ;;  %13112 = vmatprep.mubr.bf16.mxu0 %v15239_v48 }
 0x215   : > { %v12755_v36 = vpop.f32.mrb[38].mxu1 }
 0x216   : > { %v16399_v29 = vadd.f32 %v12755_v36, %v16306_v33  ;;  %v2964_v56 = vpop.f32.mrb[39].mxu1  ;;  %v14791_v36 = vld [vmem:[%s17538_s7 + $0x1e8] sm:$0xff]  }
 0x21b   : > { %13113 = vmatmul.mubr.bf16.vlgmr.msra.gmra.mrb[8].mxu0 %v15274_v30  ;;  %v12758_v35 = vpop.f32.mrb[40].mxu1  ;;  %v17737_v30 = vld [vmem:[#allocation25_spill] sm:$0xff] }
 0x21c   : > { %v16407_v10 = vadd.f32 %v12758_v35, %v16310_v31  ;;  %13149 = vmatpush3.bf16.msra.mxu0 %v5498_v8  ;;  %v2977_v58 = vpop.f32.mrb[41].mxu1  ;;  %13116 = vmatprep.mubr.bf16.mxu0 %v15277_v38  ;;  %v17738_v38 = vld [vmem:[#allocation27_spill] sm:$0xff]  ;;  %v17739_v31 = vld [vmem:[#allocation28_spill] sm:$0xff] }
 0x21d   : > { %v16411_v48 = vadd.f32 %v2977_v58, %v16314_v13  ;;  %v12759_v56 = vpop.f32.mrb[42].mxu1  ;;  %13186 = vmatprep.subr.bf16.mxu0 %v14786_v51  ;;  %v14788_v13 = vld [vmem:[%s17538_s7 + $0x1d0] sm:$0xff]   ;;  %v17748_v35 = vld [vmem:[#allocation35_spill] sm:$0xff]  ;;  %v17749_v8 = vld [vmem:[#allocation36_spill] sm:$0xff] }
 0x21e   : > { %v16414_v33 = vadd.f32 %v12759_v56, %v16317_v45  ;;  %v2980_v43 = vpop.f32.mrb[43].mxu1  ;;  %v14789_v45 = vld [vmem:[%s17538_s7 + $0x1d8] sm:$0xff]   ;;  %v17750_v58 = vld [vmem:[#allocation37_spill] sm:$0xff] }
 0x21f   : > { %v16417_v34 = vadd.f32 %v2980_v43, %v16320_v39  ;;  %v17747_v39 = vld [vmem:[#allocation34_spill] sm:$0xff]  ;;  %v14792_v56 = vld [vmem:[%s17538_s7 + $0x1f0] sm:$0xff]  }
 0x220   : > { %v14793_v43 = vld [vmem:[%s17538_s7 + $0x1f8] sm:$0xff]  }
 0x223   : > { %13117 = vmatmul.mubr.bf16.gmra.mrb[12].mxu0 %v15311_v17  ;;  %v17740_v17 = vld [vmem:[#allocation29_spill] sm:$0xff] }
 0x224   : > { %13120 = vmatprep.mubr.bf16.mxu0 %v15319_v16  ;;  %v17741_v16 = vld [vmem:[#allocation30_spill] sm:$0xff] }
 0x22b   : > { %13121 = vmatmul.mubr.bf16.gmra.mrb[16].mxu0 %v15351_v15  ;;  %v17742_v15 = vld [vmem:[#allocation44_spill] sm:$0xff] }
 0x22c   : > { %13124 = vmatprep.mubr.bf16.mxu0 %v15359_v42  ;;  %v17743_v42 = vld [vmem:[#allocation12_spill] sm:$0xff] }
 0x233   : > { %13125 = vmatmul.mubr.bf16.gmra.mrb[20].mxu0 %v15402_v1  ;;  %v17744_v1 = vld [vmem:[#allocation31_spill] sm:$0xff] }
 0x234   : > { %13128 = vmatprep.mubr.bf16.mxu0 %v15408_v11  ;;  %v17745_v11 = vld [vmem:[#allocation32_spill] sm:$0xff] }
 0x23b   : > { %13129 = vmatmul.mubr.bf16.gmra.mrb[24].mxu0 %v15441_v37  ;;  %v14787_v37 = vld [vmem:[%s17538_s7 + $0x1c8] sm:$0xff]  }
 0x23c   : > { %13132 = vmatprep.mubr.bf16.mxu0 %v15452_v57  ;;  %v17746_v57 = vld [vmem:[#allocation33_spill] sm:$0xff] }
 0x243   : > { %13133 = vmatmul.mubr.bf16.gmra.mrb[28].mxu0 %v17737_v30  ;;  %v17751_v30 = vld [vmem:[#allocation38_spill] sm:$0xff] }
 0x244   : > { %13136 = vmatprep.mubr.bf16.mxu0 %v17738_v38  ;;  %v17752_v38 = vld [vmem:[#allocation39_spill] sm:$0xff] }
 0x24b   : > { %13137 = vmatmul.mubr.bf16.gmra.mrb[32].mxu0 %v17739_v31  ;;  %v11475_v31 = vld [vmem:[%s17537_s6 + $0x1c] sm:$0xf] }
 0x24c   : > { %13140 = vmatprep.mubr.bf16.mxu0 %v17740_v17  ;;  %v17753_v17 = vld [vmem:[#allocation40_spill] sm:$0xff] }
 0x253   : > { %13141 = vmatmul.mubr.bf16.gmra.mrb[36].mxu0 %v17741_v16  ;;  %v17754_v16 = vld [vmem:[#allocation41_spill] sm:$0xff] }
 0x254   : > { %13144 = vmatprep.mubr.bf16.mxu0 %v17742_v15  ;;  %v17755_v15 = vld [vmem:[#allocation42_spill] sm:$0xff] }
 0x25b   : > { %13145 = vmatmul.mubr.bf16.gmra.mrb[40].mxu0 %v17743_v42 }
 0x25c   : > { %13150 = vmatprep.mubr.msk.bf16.mxu0 %vm1835_vm1, %v17744_v1  ;;  %v17756_v1 = vld [vmem:[#allocation43_spill] sm:$0xff] }
 0x263   : > { %13151 = vmatmul.mubr.msk.bf16.vlgmr.msra.gmra.mrb[8].mxu0 %vm1835_vm1, %v17745_v11  ;;  %v17758_v11 = vld [vmem:[#allocation46_spill] sm:$0xff] }
 0x264   : > { %13187 = vmatpush3.bf16.msra.mxu0 %v14786_v51  ;;  %13154 = vmatprep.mubr.msk.bf16.mxu0 %vm1835_vm1, %v17746_v57  ;;  %v14790_v51 = vld [vmem:[%s17538_s7 + $0x1e0] sm:$0xff]  }
 0x265   : > { %13188 = vmatprep.subr.bf16.mxu0 %v14787_v37  ;;  %v17759_v57 = vld [vmem:[#allocation47_spill] sm:$0xff] }
 0x268   : > { %13189 = vmatpush3.bf16.msra.mxu0 %v14787_v37  ;;  %v17757_v37 = vld [vmem:[#allocation45_spill] sm:$0xff] }
 0x269   : > { %13190 = vmatprep.subr.bf16.mxu0 %v14788_v13 }
 0x26b   : > { %13155 = vmatmul.mubr.msk.bf16.gmra.mrb[12].mxu0 %vm1835_vm1, %v17747_v39  ;;  %v6033_v39 = vsel %vm1890_vm0, %v11475_v31, 0 }
 0x26c   : > { %13158 = vmatprep.mubr.msk.bf16.mxu0 %vm1835_vm1, %v17748_v35  ;;  %13191 = vmatpush3.bf16.msra.mxu0 %v14788_v13  ;;  %v17760_v13 = vld [vmem:[#allocation55_spill] sm:$0xff] }
 0x26d   : > { %13192 = vmatprep.subr.bf16.mxu0 %v14789_v45  ;;  %v14794_v35 = vld [vmem:[%s17538_s7 + $0x200] sm:$0xff]  }
 0x270   : > { %13193 = vmatpush3.bf16.msra.mxu0 %v14789_v45  ;;  %v17761_v45 = vld [vmem:[#allocation48_spill] sm:$0xff] }
 0x271   : > { %13194 = vmatprep.subr.bf16.mxu0 %v14790_v51 }
 0x273   : > { %13159 = vmatmul.mubr.msk.bf16.gmra.mrb[16].mxu0 %vm1835_vm1, %v17749_v8  ;;  %v17764_v8 = vld [vmem:[#allocation51_spill] sm:$0xff] }
 0x274   : > { %13162 = vmatprep.mubr.msk.bf16.mxu0 %vm1835_vm1, %v17750_v58  ;;  %13195 = vmatpush3.bf16.msra.mxu0 %v14790_v51  ;;  %v17762_v51 = vld [vmem:[#allocation49_spill] sm:$0xff]  ;;  %v17765_v58 = vld [vmem:[#allocation52_spill] sm:$0xff] }
 0x275   : > { %13196 = vmatprep.subr.bf16.mxu0 %v14791_v36 }
 0x278   : > { %13197 = vmatpush3.bf16.msra.mxu0 %v14791_v36  ;;  %v17763_v36 = vld [vmem:[#allocation50_spill] sm:$0xff] }
 0x279   : > { %13198 = vmatprep.subr.bf16.mxu0 %v14792_v56 }
 0x27b   : > { %13163 = vmatmul.mubr.msk.bf16.gmra.mrb[20].mxu0 %vm1835_vm1, %v17751_v30 }
 0x27c   : > { %13166 = vmatprep.mubr.msk.bf16.mxu0 %vm1835_vm1, %v17752_v38  ;;  %13199 = vmatpush3.bf16.msra.mxu0 %v14792_v56  ;;  %v17766_v56 = vld [vmem:[#allocation53_spill] sm:$0xff] }
 0x27d   : > { %13200 = vmatprep.subr.bf16.mxu0 %v14793_v43 }
 0x280   : > { %13201 = vmatpush3.bf16.msra.mxu0 %v14793_v43  ;;  %v16509_v43 = vpop.f32.mrb[8].mxu1 }
 0x281   : > { %14668 = vmatprep.subr.msk.bf16.mxu0 %vm1890_vm0, %v11475_v31  ;;  %v16512_v30 = vpop.f32.mrb[9].mxu1  ;;  %v17768_v31 = vld [vmem:[#allocation56_spill] sm:$0xff] }
 0x282   : > { %v16515_v38 = vpop.f32.mrb[10].mxu1 }
 0x283   : > { %13167 = vmatmul.mubr.msk.bf16.gmra.mrb[24].mxu0 %vm1835_vm1, %v17753_v17  ;;  %v16518_v17 = vpop.f32.mrb[11].mxu1 }
 0x284   : > { %13170 = vmatprep.mubr.msk.bf16.mxu0 %vm1835_vm1, %v17754_v16  ;;  %v16520_v16 = vpop.f32.mrb[12].mxu1 }
 0x28b   : > { %13171 = vmatmul.mubr.msk.bf16.gmra.mrb[28].mxu0 %vm1835_vm1, %v17755_v15 }
 0x28c   : > { %13174 = vmatprep.mubr.msk.bf16.mxu0 %vm1835_vm1, %v17756_v1 }
 0x293   : > { %13175 = vmatmul.mubr.msk.bf16.gmra.mrb[32].mxu0 %vm1835_vm1, %v17757_v37 }
 0x294   : > { %13178 = vmatprep.mubr.msk.bf16.mxu0 %vm1835_vm1, %v17758_v11  ;;  %v17769_v11 = vld [vmem:[#allocation7_spill] sm:$0xff] }
 0x29b   : > { %13179 = vmatmul.mubr.msk.bf16.gmra.mrb[36].mxu0 %vm1835_vm1, %v17759_v57 }
 0x29c   : > { %13182 = vmatprep.mubr.msk.bf16.mxu0 %vm1835_vm1, %v17760_v13 }
 0x2a3   : > { %13183 = vmatmul.mubr.msk.bf16.gmra.mrb[40].mxu0 %vm1835_vm1, %v17743_v42  ;;  %v17767_v42 = vld [vmem:[#allocation54_spill] sm:$0xff] }
 0x2a4   : > { %13202 = vmatprep.mubr.bf16.mxu0 %v17761_v45  ;;  %v14795_v45 = vld [vmem:[%s17538_s7 + $0x208] sm:$0xff]  }
 0x2ab   : > { %13203 = vmatmul.mubr.bf16.vlgmr.msra.gmra.mrb[8].mxu0 %v17762_v51 }
 0x2ac   : > { %13239 = vmatpush3.bf16.msra.mxu0 %v6033_v39  ;;  %13206 = vmatprep.mubr.bf16.mxu0 %v17763_v36  ;;  %v17770_v39 = vld [vmem:[#allocation66_spill] sm:$0xff]  ;;  %v17771_v36 = vld [vmem:[#allocation57_spill] sm:$0xff] }
 0x2ad   : > { %13276 = vmatprep.subr.bf16.mxu0 %v14794_v35 }
 0x2b3   : > { %13207 = vmatmul.mubr.bf16.gmra.mrb[12].mxu0 %v17764_v8 }
 0x2b4   : > { %13210 = vmatprep.mubr.bf16.mxu0 %v17765_v58  ;;  %v14796_v58 = vld [vmem:[%s17538_s7 + $0x210] sm:$0xff]  }
 0x2bb   : > { %13211 = vmatmul.mubr.bf16.gmra.mrb[16].mxu0 %v17766_v56 }
 0x2bc   : > { %13214 = vmatprep.mubr.bf16.mxu0 %v17767_v42 }
 0x2c3   : > { %13215 = vmatmul.mubr.bf16.gmra.mrb[20].mxu0 %v15926_v9  ;;  %v16522_v9 = vpop.f32.mrb[13].mxu1 }
 0x2c4   : > { %13218 = vmatprep.mubr.bf16.mxu0 %v15930_v40  ;;  %v16525_v40 = vpop.f32.mrb[14].mxu1 }
 0x2cb   : > { %13219 = vmatmul.mubr.bf16.gmra.mrb[24].mxu0 %v15942_v0  ;;  %v16528_v0 = vpop.f32.mrb[15].mxu1 }
 0x2cc   : > { %13222 = vmatprep.mubr.bf16.mxu0 %v15946_v61  ;;  %v16530_v61 = vpop.f32.mrb[16].mxu1 }
 0x2d3   : > { %13223 = vmatmul.mubr.bf16.gmra.mrb[28].mxu0 %v15960_v46  ;;  %v16532_v46 = vpop.f32.mrb[17].mxu1 }
 0x2d4   : > { %13226 = vmatprep.mubr.bf16.mxu0 %v17768_v31  ;;  %v16535_v15 = vpop.f32.mrb[18].mxu1  ;;  %v17775_v31 = vld [vmem:[#allocation58_spill] sm:$0xff] }
 0x2d5   : > { %v16538_v1 = vpop.f32.mrb[19].mxu1 }
 0x2d6   : > { %v16540_v37 = vpop.f32.mrb[20].mxu1 }
 0x2db   : > { %13227 = vmatmul.mubr.bf16.gmra.mrb[32].mxu0 %v15978_v12  ;;  %v16542_v12 = vpop.f32.mrb[21].mxu1 }
 0x2dc   : > { %13230 = vmatprep.mubr.bf16.mxu0 %v15983_v21  ;;  %v16545_v21 = vpop.f32.mrb[22].mxu1 }
 0x2dd   : > { %v16549_v57 = vpop.f32.mrb[23].mxu1 }
 0x2e3   : > { %13231 = vmatmul.mubr.bf16.gmra.mrb[36].mxu0 %v15995_v20  ;;  %v16551_v20 = vpop.f32.mrb[24].mxu1 }
 0x2e4   : > { %13234 = vmatprep.mubr.bf16.mxu0 %v15043_v6  ;;  %v16553_v13 = vpop.f32.mrb[25].mxu1 }
 0x2e5   : > { %v16560_v51 = vpop.f32.mrb[26].mxu1 }
 0x2e6   : > { %v16564_v8 = vpop.f32.mrb[27].mxu1 }
 0x2e7   : > { %17772 = vst [vmem:[#allocation8_spill] sm:$0xff] %v16564_v8  ;;  %v16569_v56 = vpop.f32.mrb[28].mxu1 }
 0x2e8   : > { %17773 = vst [vmem:[#allocation9_spill] sm:$0xff] %v16569_v56  ;;  %v16571_v42 = vpop.f32.mrb[29].mxu1 }
 0x2e9   : > { %17774 = vst [vmem:[#allocation10_spill] sm:$0xff] %v16571_v42 }
 0x2eb   : > { %13235 = vmatmul.mubr.bf16.gmra.mrb[40].mxu0 %v15043_v6 }
 0x2ec   : > { %13240 = vmatprep.mubr.msk.bf16.mxu0 %vm1835_vm1, %v17769_v11  ;;  %v16578_v11 = vpop.f32.mrb[30].mxu1 }
 0x2ed   : > { %17776 = vst [vmem:[#allocation11_spill] sm:$0xff] %v16578_v11  ;;  %v17778_v11 = vld [vmem:[#allocation60_spill] sm:$0xff] }
 0x2f3   : > { %13241 = vmatmul.mubr.msk.bf16.vlgmr.msra.gmra.mrb[8].mxu0 %vm1835_vm1, %v17770_v39  ;;  %v17777_v39 = vld [vmem:[#allocation59_spill] sm:$0xff] }
 0x2f4   : > { %13277 = vmatpush3.bf16.msra.mxu0 %v14794_v35  ;;  %13244 = vmatprep.mubr.msk.bf16.mxu0 %vm1835_vm1, %v17771_v36  ;;  %v14797_v35 = vld [vmem:[%s17538_s7 + $0x218] sm:$0xff]   ;;  %v16582_v36 = vpop.f32.mrb[31].mxu1 }
 0x2f5   : > { %13278 = vmatprep.subr.bf16.mxu0 %v14795_v45  ;;  %v12786_v42 = vpop.f32.mrb[32].mxu1 }
 0x2f6   : > { %v16587_v56 = vpop.f32.mrb[33].mxu1  ;;  %v14801_v42 = vld [vmem:[%s17538_s7 + $0x238] sm:$0xff]  }
 0x2f7   : > { %v12787_v8 = vpop.f32.mrb[34].mxu1 }
 0x2f8   : > { %13279 = vmatpush3.bf16.msra.mxu0 %v14795_v45  ;;  %v14798_v45 = vld [vmem:[%s17538_s7 + $0x220] sm:$0xff]   ;;  %v14800_v8 = vld [vmem:[%s17538_s7 + $0x230] sm:$0xff]  }
 0x2f9   : > { %13280 = vmatprep.subr.bf16.mxu0 %v14796_v58 }
 0x2fb   : > { %13245 = vmatmul.mubr.msk.bf16.gmra.mrb[12].mxu0 %vm1835_vm1, %v17775_v31  ;;  %v14799_v31 = vld [vmem:[%s17538_s7 + $0x228] sm:$0xff]  }
 0x2fc   : > { %13248 = vmatprep.mubr.msk.bf16.mxu0 %vm1835_vm1, %v17777_v39  ;;  %13281 = vmatpush3.bf16.msra.mxu0 %v14796_v58  ;;  %v16594_v58 = vpop.f32.mrb[35].mxu1  ;;  %v17779_v39 = vld [vmem:[#allocation61_spill] sm:$0xff] }
 0x2fd   : > { %13282 = vmatprep.subr.bf16.mxu0 %v14797_v35 }
 0x300   : > { %13283 = vmatpush3.bf16.msra.mxu0 %v14797_v35  ;;  %v17780_v35 = vld [vmem:[#allocation62_spill] sm:$0xff] }
 0x301   : > { %13284 = vmatprep.subr.bf16.mxu0 %v14798_v45 }
 0x303   : > { %13249 = vmatmul.mubr.msk.bf16.gmra.mrb[16].mxu0 %vm1835_vm1, %v17778_v11  ;;  %v17781_v11 = vld [vmem:[#allocation63_spill] sm:$0xff] }
 0x304   : > { %13252 = vmatprep.mubr.msk.bf16.mxu0 %vm1835_vm1, %v17779_v39  ;;  %13285 = vmatpush3.bf16.msra.mxu0 %v14798_v45  ;;  %v11518_v45 = vld [vmem:[%s17537_s6 + $0x20] sm:$0xf]  ;;  %v17783_v39 = vld [vmem:[#allocation65_spill] sm:$0xff] }
 0x305   : > { %13286 = vmatprep.subr.bf16.mxu0 %v14799_v31 }
 0x308   : > { %13287 = vmatpush3.bf16.msra.mxu0 %v14799_v31  ;;  %v17782_v31 = vld [vmem:[#allocation64_spill] sm:$0xff] }
 0x309   : > { %13288 = vmatprep.subr.bf16.mxu0 %v14800_v8 }
 0x30b   : > { %13253 = vmatmul.mubr.msk.bf16.gmra.mrb[20].mxu0 %vm1835_vm1, %v17780_v35 }
 0x30c   : > { %13256 = vmatprep.mubr.msk.bf16.mxu0 %vm1835_vm1, %v17781_v11  ;;  %13289 = vmatpush3.bf16.msra.mxu0 %v14800_v8 }
 0x30d   : > { %13290 = vmatprep.subr.bf16.mxu0 %v14801_v42 }
 0x310   : > { %13291 = vmatpush3.bf16.msra.mxu0 %v14801_v42 }
 0x311   : > { %14669 = vmatprep.subr.msk.bf16.mxu0 %vm1890_vm0, %v11518_v45 }
 0x313   : > { %13257 = vmatmul.mubr.msk.bf16.gmra.mrb[24].mxu0 %vm1835_vm1, %v17782_v31 }
 0x314   : > { %13260 = vmatprep.mubr.msk.bf16.mxu0 %vm1835_vm1, %v17783_v39 }
 0x31b   : > { %13261 = vmatmul.mubr.msk.bf16.gmra.mrb[28].mxu0 %vm1835_vm1, %v16076_v28  ;;  %v6580_v28 = vsel %vm1890_vm0, %v11518_v45, 0 }
 0x31c   : > { %13264 = vmatprep.mubr.msk.bf16.mxu0 %vm1835_vm1, %v16081_v24  ;;  %v14803_v24 = vld [vmem:[%s17541_s10 + $0x8] sm:$0xff]  }
 0x323   : > { %13265 = vmatmul.mubr.msk.bf16.gmra.mrb[32].mxu0 %vm1835_vm1, %v16088_v4  ;;  %v14806_v4 = vld [vmem:[%s17541_s10 + $0x20] sm:$0xff]  }
 0x324   : > { %13268 = vmatprep.mubr.msk.bf16.mxu0 %vm1835_vm1, %v16093_v52 }
 0x32b   : > { %13269 = vmatmul.mubr.msk.bf16.gmra.mrb[36].mxu0 %vm1835_vm1, %v16106_v14  ;;  %v14802_v14 = vld [vmem:[%s17541_s10] sm:$0xff]  }
 0x32c   : > { %13272 = vmatprep.mubr.msk.bf16.mxu0 %vm1835_vm1, %v15043_v6  ;;  %13366 = vmatprep.subr.bf16.mxu1 %v14802_v14 }
 0x32d   : > { %13367 = vmatpush3.bf16.msra.mxu1 %v14802_v14 }
 0x32e   : > { %13368 = vmatprep.subr.bf16.mxu1 %v14803_v24 }
 0x331   : > { %13369 = vmatpush3.bf16.msra.mxu1 %v14803_v24 }
 0x333   : > { %13273 = vmatmul.mubr.msk.bf16.gmra.mrb[40].mxu0 %vm1835_vm1, %v15043_v6  ;;  %v14804_v6 = vld [vmem:[%s17541_s10 + $0x10] sm:$0xff]  }
 0x334   : > { %13292 = vmatprep.mubr.bf16.mxu0 %v16125_v50  ;;  %13370 = vmatprep.subr.bf16.mxu1 %v14804_v6  ;;  %v17785_v50 = vld [vmem:[#allocation5_spill] sm:$0xff] }
 0x335   : > { %13371 = vmatpush3.bf16.msra.mxu1 %v14804_v6 }
 0x33b   : > { %13293 = vmatmul.mubr.bf16.vlgmr.msra.gmra.mrb[8].mxu0 %v16147_v44 }
 0x33c   : > { %13329 = vmatpush3.bf16.msra.mxu0 %v6580_v28  ;;  %13296 = vmatprep.mubr.bf16.mxu0 %v16157_v3  ;;  %v17787_v3 = vld [vmem:[#allocation17_spill] sm:$0xff] }
 0x343   : > { %13297 = vmatmul.mubr.bf16.gmra.mrb[12].mxu0 %v16177_v47  ;;  %v14805_v47 = vld [vmem:[%s17541_s10 + $0x18] sm:$0xff]  }
 0x344   : > { %13300 = vmatprep.mubr.bf16.mxu0 %v16180_v62  ;;  %13372 = vmatprep.subr.bf16.mxu1 %v14805_v47  ;;  %v17788_v62 = vld [vmem:[#allocation18_spill] sm:$0xff] }
 0x345   : > { %13373 = vmatpush3.bf16.msra.mxu1 %v14805_v47 }
 0x346   : > { %13374 = vmatprep.subr.bf16.mxu1 %v14806_v4 }
 0x349   : > { %13375 = vmatpush3.bf16.msra.mxu1 %v14806_v4 }
 0x34b   : > { %13301 = vmatmul.mubr.bf16.gmra.mrb[16].mxu0 %v16201_v54  ;;  %v14807_v54 = vld [vmem:[%s17541_s10 + $0x28] sm:$0xff]  }
 0x34c   : > { %13304 = vmatprep.mubr.bf16.mxu0 %v16204_v2  ;;  %13376 = vmatprep.subr.bf16.mxu1 %v14807_v54  ;;  %v17789_v2 = vld [vmem:[#allocation19_spill] sm:$0xff] }
 0x34d   : > { %13377 = vmatpush3.bf16.msra.mxu1 %v14807_v54 }
 0x353   : > { %13305 = vmatmul.mubr.bf16.gmra.mrb[20].mxu0 %v16225_v22  ;;  %v17784_v22 = vmov 0  }
 0x354   : > { %13308 = vmatprep.mubr.bf16.mxu0 %v16228_v5  ;;  %v16667_v52 = vrot.slane %v17784_v22, 1  ;;  %v17790_v5 = vld [vmem:[#allocation20_spill] sm:$0xff] }
 0x356   : > { %v6345_v44 = vsel %vm2712_vm8, %v17785_v50, %v16667_v52 }
 0x35b   : > { %13309 = vmatmul.mubr.bf16.gmra.mrb[24].mxu0 %v16244_v49  ;;  %v17791_v49 = vld [vmem:[#allocation21_spill] sm:$0xff] }
 0x35c   : > { %13312 = vmatprep.mubr.bf16.mxu0 %v16247_v26  ;;  %v17786_v26 = vld [vmem:[#allocation16_spill] sm:$0xff] }
 0x363   : > { %13313 = vmatmul.mubr.bf16.gmra.mrb[28].mxu0 %v16262_v59  ;;  %v17792_v59 = vld [vmem:[#allocation22_spill] sm:$0xff] }
 0x364   : > { %13316 = vmatprep.mubr.bf16.mxu0 %v16265_v55  ;;  %v17793_v55 = vld [vmem:[#allocation23_spill] sm:$0xff] }
 0x36b   : > { %13317 = vmatmul.mubr.bf16.gmra.mrb[32].mxu0 %v16274_v27  ;;  %v17794_v27 = vld [vmem:[#allocation24_spill] sm:$0xff] }
 0x36c   : > { %13320 = vmatprep.mubr.bf16.mxu0 %v16277_v23  ;;  %v17795_v23 = vld [vmem:[#allocation26_spill] sm:$0xff] }
 0x373   : > { %13321 = vmatmul.mubr.bf16.gmra.mrb[36].mxu0 %v16287_v63  ;;  %v14808_v63 = vld [vmem:[%s17541_s10 + $0x30] sm:$0xff]  }
 0x374   : > { %13324 = vmatprep.mubr.bf16.mxu0 %v17715_v41  ;;  %13378 = vmatprep.subr.bf16.mxu1 %v14808_v63 }
 0x375   : > { %13379 = vmatpush3.bf16.msra.mxu1 %v14808_v63 }
 0x37b   : > { %13325 = vmatmul.mubr.bf16.gmra.mrb[40].mxu0 %v6345_v44 }
 0x37c   : > { %13330 = vmatprep.mubr.msk.bf16.mxu0 %vm1835_vm1, %v17721_v53  ;;  %v14809_v53 = vld [vmem:[%s17541_s10 + $0x38] sm:$0xff]  }
 0x37d   : > { %13380 = vmatprep.subr.bf16.mxu1 %v14809_v53 }
 0x37e   : > { %13381 = vmatpush3.bf16.msra.mxu1 %v14809_v53 }
 0x383   : > { %13331 = vmatmul.mubr.msk.bf16.vlgmr.msra.gmra.mrb[8].mxu0 %vm1835_vm1, %v17722_v18  ;;  %v14810_v18 = vld [vmem:[%s17541_s10 + $0x40] sm:$0xff]  }
 0x384   : > { %13334 = vmatprep.mubr.msk.bf16.mxu0 %vm1835_vm1, %v17723_v7  ;;  %13414 = vmatprep.subr.bf16.mxu1 %v14810_v18  ;;  %v16719_v7 = vld [vmem:[%s17539_s8] ss:$0 sm:$0xff] }
 0x38b   : > { %13335 = vmatmul.mubr.msk.bf16.gmra.mrb[12].mxu0 %vm1835_vm1, %v17724_v25 }
 0x38c   : > { %13338 = vmatprep.mubr.msk.bf16.mxu0 %vm1835_vm1, %v17725_v32 }
 0x393   : > { %13339 = vmatmul.mubr.msk.bf16.gmra.mrb[16].mxu0 %vm1835_vm1, %v17726_v60  ;;  %v16725_v60 = vld [vmem:[%s17540_s9] ss:$0 sm:$0xff] }
 0x394   : > { %13342 = vmatprep.mubr.msk.bf16.mxu0 %vm1835_vm1, %v17786_v26 }
 0x39b   : > { %13343 = vmatmul.mubr.msk.bf16.gmra.mrb[20].mxu0 %vm1835_vm1, %v17787_v3 }
 0x39c   : > { %13346 = vmatprep.mubr.msk.bf16.mxu0 %vm1835_vm1, %v17788_v62 }
 0x3a3   : > { %13347 = vmatmul.mubr.msk.bf16.gmra.mrb[24].mxu0 %vm1835_vm1, %v17789_v2 }
 0x3a4   : > { %13350 = vmatprep.mubr.msk.bf16.mxu0 %vm1835_vm1, %v17790_v5 }
 0x3ab   : > { %13351 = vmatmul.mubr.msk.bf16.gmra.mrb[28].mxu0 %vm1835_vm1, %v17791_v49 }
 0x3ac   : > { %13354 = vmatprep.mubr.msk.bf16.mxu0 %vm1835_vm1, %v17792_v59 }
 0x3b3   : > { %13355 = vmatmul.mubr.msk.bf16.gmra.mrb[32].mxu0 %vm1835_vm1, %v17793_v55 }
 0x3b4   : > { %13358 = vmatprep.mubr.msk.bf16.mxu0 %vm1835_vm1, %v17794_v27 }
 0x3bb   : > { %13359 = vmatmul.mubr.msk.bf16.gmra.mrb[36].mxu0 %vm1835_vm1, %v17795_v23 }
 0x3bc   : > { %13362 = vmatprep.mubr.msk.bf16.mxu0 %vm1835_vm1, %v17715_v41 }
 0x3c3   : > { %13363 = vmatmul.mubr.msk.bf16.gmra.mrb[40].mxu0 %vm1835_vm1, %v6345_v44 }
 0x456   : > { %v13332_v41 = vpop.f32.mrb[8].mxu0 }
 0x457   : > { %v13802_v25 = vadd.f32 %v16395_v19, %v13332_v41  ;;  %v6616_v32 = vpop.f32.mrb[9].mxu0 }
 0x458   : > { %v13333_v8 = vpop.f32.mrb[10].mxu0 }
 0x459   : > { %v6912_v42 = vmul.f32 %v13802_v25, %v16719_v7  ;;  %v13805_v35 = vadd.f32 %v16399_v29, %v13333_v8  ;;  %v6619_v11 = vpop.f32.mrb[11].mxu0 }
 0x45b   : > { %v6955_v45 = vadd.f32 %v16725_v60, %v6912_v42  ;;  %v6913_v31 = vmul.f32 %v13805_v35, %v16719_v7 }
 0x45d   : > { %v6956_v39 = vadd.f32 %v16725_v60, %v6913_v31  ;;  %v6991_v19 = vmax.f32 %v6955_v45, 0.0 }
 0x45e   : > { %v13336_v28 = vpop.f32.mrb[12].mxu0 }
 0x45f   : > { %v6992_v14 = vmax.f32 %v6956_v39, 0.0  ;;  %v13808_v24 = vadd.f32 %v16407_v10, %v13336_v28  ;;  %v6632_v6 = vpop.f32.mrb[13].mxu0  ;;  %v14811_v28 = vld [vmem:[%s17541_s10 + $0x48] sm:$0xff]  }
 0x460   : > { %v13811_v47 = vadd.f32 %v16411_v48, %v6632_v6  ;;  %v13337_v4 = vpop.f32.mrb[14].mxu0  ;;  %v14843_v10 = vld [vmem:[%s17541_s10 + $0x148] sm:$0xff]  }
 0x461   : > { %v16734_v54 = vpack.c.bf16 %v6992_v14, %v6991_v19  ;;  %v6916_v29 = vmul.f32 %v13808_v24, %v16719_v7  ;;  %v13814_v22 = vadd.f32 %v16414_v33, %v13337_v4  ;;  %v6635_v50 = vpop.f32.mrb[15].mxu0  ;;  %v17797_v14 = vld [vmem:[#allocation6_spill] sm:$0xff] }
 0x462   : > { %v6914_v44 = vmul.f32 %v13811_v47, %v16719_v7  ;;  %v13817_v26 = vadd.f32 %v16417_v34, %v6635_v50 }
 0x463   : > { %v6959_v3 = vadd.f32 %v16725_v60, %v6916_v29  ;;  %v6917_v62 = vmul.f32 %v13814_v22, %v16719_v7  ;;  %v7366_v48 = vsel %vm15103_vm10, 0, %v16734_v54 }
 0x464   : > { %v6957_v2 = vadd.f32 %v16725_v60, %v6914_v44  ;;  %v6915_v5 = vmul.f32 %v13817_v26, %v16719_v7  ;;  %v7426_v49 = vshrl.u32 %v7366_v48, 16  ;;  %v7429_v34 = vshll.u32 %v7366_v48, 16  ;;  %v14812_v26 = vld [vmem:[%s17541_s10 + $0x50] sm:$0xff]  }
 0x465   : > { %v6960_v33 = vadd.f32 %v16725_v60, %v6917_v62  ;;  %v6995_v23 = vmax.f32 %v6959_v3, 0.0 }
 0x466   : > { %v6958_v59 = vadd.f32 %v16725_v60, %v6915_v5  ;;  %v13340_v55 = vpop.f32.mrb[16].mxu0  ;;  %v16749_v27 = vrot.slane %v7426_v49, 7  ;;  %v6993_v25 = vmax.f32 %v6957_v2, 0.0 }
 0x467   : > { %v6996_v63 = vmax.f32 %v6960_v33, 0.0  ;;  %v13818_v53 = vadd.f32 %v13340_v55, %v16509_v43  ;;  %v6648_v41 = vpop.f32.mrb[17].mxu0 }
 0x468   : > { %v6994_v32 = vmax.f32 %v6958_v59, 0.0  ;;  %v13819_v8 = vadd.f32 %v6648_v41, %v16512_v30  ;;  %v13341_v42 = vpop.f32.mrb[18].mxu0  ;;  %v7431_v35 = vor.u32 %v7429_v34, %v16749_v27 }
 0x469   : > { %v16754_v11 = vpack.c.bf16 %v6996_v63, %v6995_v23  ;;  %v6920_v45 = vmul.f32 %v13818_v53, %v16719_v7  ;;  %v13820_v31 = vadd.f32 %v13341_v42, %v16515_v38  ;;  %v6651_v39 = vpop.f32.mrb[19].mxu0 }
 0x46a   : > { %v16761_v43 = vpack.c.bf16 %v6994_v32, %v6993_v25  ;;  %v6918_v19 = vmul.f32 %v13819_v8, %v16719_v7  ;;  %v13821_v30 = vadd.f32 %v6651_v39, %v16518_v17  ;;  %v16767_v24 = vsel %vm1299_vm11, %v17797_v14, %v7431_v35 }
 0x46b   : > { %v6963_v6 = vadd.f32 %v16725_v60, %v6920_v45  ;;  %v6921_v47 = vmul.f32 %v13820_v31, %v16719_v7  ;;  %13383 = vmatmul.mubr.bf16.vlgmr.msra.gmra.mrb[44].mxu1 %v16767_v24  ;;  %v7368_v38 = vsel %vm15103_vm10, 0, %v16754_v11 }
 0x46c   : > { %v6961_v4 = vadd.f32 %v16725_v60, %v6918_v19  ;;  %v6919_v29 = vmul.f32 %v13821_v30, %v16719_v7  ;;  %13415 = vmatpush3.bf16.msra.mxu1 %v14810_v18  ;;  %v7367_v17 = vsel %vm15103_vm10, 0, %v16761_v43  ;;  %v7442_v22 = vshrl.u32 %v7368_v38, 16 }
 0x46d   : > { %v6964_v50 = vadd.f32 %v16725_v60, %v6921_v47  ;;  %v7434_v44 = vshrl.u32 %v7367_v17, 16  ;;  %13416 = vmatprep.subr.bf16.mxu1 %v14811_v28  ;;  %v6999_v3 = vmax.f32 %v6963_v6, 0.0  ;;  %v7445_v18 = vshll.u32 %v7368_v38, 16 }
 0x46e   : > { %v6962_v62 = vadd.f32 %v16725_v60, %v6919_v29  ;;  %v13344_v48 = vpop.f32.mrb[20].mxu0  ;;  %v16785_v2 = vrot.slane %v7442_v22, 7  ;;  %v7437_v55 = vshll.u32 %v7367_v17, 16  ;;  %v6997_v34 = vmax.f32 %v6961_v4, 0.0  ;;  %v14814_v29 = vld [vmem:[%s17541_s10 + $0x60] sm:$0xff]  }
 0x46f   : > { %v7000_v5 = vmax.f32 %v6964_v50, 0.0  ;;  %v13822_v49 = vadd.f32 %v13344_v48, %v16520_v16  ;;  %v6664_v33 = vpop.f32.mrb[21].mxu0  ;;  %v7436_v59 = vrot.slane %v7434_v44, 7  ;;  %v14813_v16 = vld [vmem:[%s17541_s10 + $0x58] sm:$0xff]  }
 0x470   : > { %v6998_v23 = vmax.f32 %v6962_v62, 0.0  ;;  %v13823_v63 = vadd.f32 %v6664_v33, %v16522_v9  ;;  %v13345_v53 = vpop.f32.mrb[22].mxu0  ;;  %v7447_v41 = vor.u32 %v7445_v18, %v16785_v2  ;;  %13417 = vmatpush3.bf16.msra.mxu1 %v14811_v28 }
 0x471   : > { %v16790_v25 = vpack.c.bf16 %v7000_v5, %v6999_v3  ;;  %v6924_v32 = vmul.f32 %v13822_v49, %v16719_v7  ;;  %v13824_v8 = vadd.f32 %v13345_v53, %v16525_v40  ;;  %v6667_v42 = vpop.f32.mrb[23].mxu0  ;;  %v7439_v35 = vor.u32 %v7437_v55, %v7436_v59  ;;  %13418 = vmatprep.subr.bf16.mxu1 %v14812_v26 }
 0x472   : > { %v16797_v45 = vpack.c.bf16 %v6998_v23, %v6997_v34  ;;  %v6922_v9 = vmul.f32 %v13823_v63, %v16719_v7  ;;  %v13825_v31 = vadd.f32 %v6667_v42, %v16528_v0  ;;  %v16802_v39 = vsel %vm1299_vm11, %v7436_v59, %v7447_v41 }
 0x473   : > { %v6967_v28 = vadd.f32 %v16725_v60, %v6924_v32  ;;  %v6925_v40 = vmul.f32 %v13824_v8, %v16719_v7  ;;  %v16808_v19 = vsel %vm1299_vm11, %v16749_v27, %v7439_v35  ;;  %v7370_v30 = vsel %vm15103_vm10, 0, %v16790_v25 }
 0x474   : > { %v6965_v6 = vadd.f32 %v16725_v60, %v6922_v9  ;;  %v6923_v47 = vmul.f32 %v13825_v31, %v16719_v7  ;;  %13386 = vmatprep.mubr.bf16.mxu1 %v16808_v19  ;;  %v7369_v0 = vsel %vm15103_vm10, 0, %v16797_v45  ;;  %v7458_v38 = vshrl.u32 %v7370_v30, 16  ;;  %13419 = vmatpush3.bf16.msra.mxu1 %v14812_v26 }
 0x475   : > { %v6968_v4 = vadd.f32 %v16725_v60, %v6925_v40  ;;  %13387 = vmatmul.mubr.bf16.gmra.mrb[48].mxu1 %v16802_v39  ;;  %v7450_v27 = vshrl.u32 %v7369_v0, 16  ;;  %13420 = vmatprep.subr.bf16.mxu1 %v14813_v16  ;;  %v7003_v17 = vmax.f32 %v6967_v28, 0.0  ;;  %v7461_v3 = vshll.u32 %v7370_v30, 16 }
 0x476   : > { %v6966_v22 = vadd.f32 %v16725_v60, %v6923_v47  ;;  %v13348_v50 = vpop.f32.mrb[24].mxu0  ;;  %v16825_v44 = vrot.slane %v7458_v38, 7  ;;  %v7453_v5 = vshll.u32 %v7369_v0, 16  ;;  %v7001_v49 = vmax.f32 %v6965_v6, 0.0  ;;  %v14816_v47 = vld [vmem:[%s17541_s10 + $0x70] sm:$0xff]  }
 0x477   : > { %v7004_v62 = vmax.f32 %v6968_v4, 0.0  ;;  %v13826_v26 = vadd.f32 %v13348_v50, %v16530_v61  ;;  %v6680_v48 = vpop.f32.mrb[25].mxu0  ;;  %v7452_v18 = vrot.slane %v7450_v27, 7  ;;  %v14815_v61 = vld [vmem:[%s17541_s10 + $0x68] sm:$0xff]  }
 0x478   : > { %v7002_v33 = vmax.f32 %v6966_v22, 0.0  ;;  %v13827_v59 = vadd.f32 %v6680_v48, %v16532_v46  ;;  %v13349_v55 = vpop.f32.mrb[26].mxu0  ;;  %v7463_v34 = vor.u32 %v7461_v3, %v16825_v44  ;;  %13421 = vmatpush3.bf16.msra.mxu1 %v14813_v16 }
 0x479   : > { %v16830_v23 = vpack.c.bf16 %v7004_v62, %v7003_v17  ;;  %v6928_v63 = vmul.f32 %v13826_v26, %v16719_v7  ;;  %v13828_v53 = vadd.f32 %v13349_v55, %v16535_v15  ;;  %v6683_v41 = vpop.f32.mrb[27].mxu0  ;;  %v7455_v32 = vor.u32 %v7453_v5, %v7452_v18  ;;  %13422 = vmatprep.subr.bf16.mxu1 %v14814_v29 }
 0x47a   : > { %v16837_v8 = vpack.c.bf16 %v7002_v33, %v7001_v49  ;;  %v6926_v46 = vmul.f32 %v13827_v59, %v16719_v7  ;;  %v13829_v42 = vadd.f32 %v6683_v41, %v16538_v1  ;;  %v16842_v35 = vsel %vm1299_vm11, %v7452_v18, %v7463_v34 }
 0x47b   : > { %v6971_v16 = vadd.f32 %v16725_v60, %v6928_v63  ;;  %v6929_v15 = vmul.f32 %v13828_v53, %v16719_v7  ;;  %v16848_v9 = vsel %vm1299_vm11, %v16785_v2, %v7455_v32  ;;  %v7372_v31 = vsel %vm15103_vm10, 0, %v16830_v23 }
 0x47c   : > { %v6969_v28 = vadd.f32 %v16725_v60, %v6926_v46  ;;  %v6927_v40 = vmul.f32 %v13829_v42, %v16719_v7  ;;  %13390 = vmatprep.mubr.bf16.mxu1 %v16848_v9  ;;  %v7371_v1 = vsel %vm15103_vm10, 0, %v16837_v8  ;;  %v7474_v30 = vshrl.u32 %v7372_v31, 16  ;;  %13423 = vmatpush3.bf16.msra.mxu1 %v14814_v29 }
 0x47d   : > { %v6972_v6 = vadd.f32 %v16725_v60, %v6929_v15  ;;  %13391 = vmatmul.mubr.bf16.gmra.mrb[52].mxu1 %v16842_v35  ;;  %v7466_v2 = vshrl.u32 %v7371_v1, 16  ;;  %13424 = vmatprep.subr.bf16.mxu1 %v14815_v61  ;;  %v7007_v0 = vmax.f32 %v6971_v16, 0.0  ;;  %v7477_v17 = vshll.u32 %v7372_v31, 16 }
 0x47e   : > { %v6970_v38 = vadd.f32 %v16725_v60, %v6927_v40  ;;  %v13352_v4 = vpop.f32.mrb[28].mxu0  ;;  %v16865_v27 = vrot.slane %v7474_v30, 7  ;;  %v7469_v62 = vshll.u32 %v7371_v1, 16  ;;  %v7005_v26 = vmax.f32 %v6969_v28, 0.0  ;;  %v16904_v40 = vld [vmem:[%s17541_s10 + $0x80] sm:$0xff]  }
 0x47f   : > { %v7008_v22 = vmax.f32 %v6972_v6, 0.0  ;;  %v13830_v29 = vadd.f32 %v13352_v4, %v16540_v37  ;;  %v6696_v50 = vpop.f32.mrb[29].mxu0  ;;  %v7468_v3 = vrot.slane %v7466_v2, 7  ;;  %v14817_v37 = vld [vmem:[%s17541_s10 + $0x78] sm:$0xff]  }
 0x480   : > { %v7006_v48 = vmax.f32 %v6970_v38, 0.0  ;;  %v13831_v18 = vadd.f32 %v6696_v50, %v16542_v12  ;;  %v13353_v5 = vpop.f32.mrb[30].mxu0  ;;  %v7479_v49 = vor.u32 %v7477_v17, %v16865_v27  ;;  %13425 = vmatpush3.bf16.msra.mxu1 %v14815_v61 }
 0x481   : > { %v16870_v33 = vpack.c.bf16 %v7008_v22, %v7007_v0  ;;  %v6932_v59 = vmul.f32 %v13830_v29, %v16719_v7  ;;  %v13832_v55 = vadd.f32 %v13353_v5, %v16545_v21  ;;  %v6699_v34 = vpop.f32.mrb[31].mxu0  ;;  %v7471_v63 = vor.u32 %v7469_v62, %v7468_v3  ;;  %13426 = vmatprep.subr.bf16.mxu1 %v14816_v47 }
 0x482   : > { %v16877_v53 = vpack.c.bf16 %v7006_v48, %v7005_v26  ;;  %v6930_v12 = vmul.f32 %v13831_v18, %v16719_v7  ;;  %v13833_v41 = vadd.f32 %v6699_v34, %v16549_v57  ;;  %v16882_v32 = vsel %vm1299_vm11, %v7468_v3, %v7479_v49  ;;  %v17798_v34 = vld [vmem:[#allocation8_spill] sm:$0xff] }
 0x483   : > { %v6975_v61 = vadd.f32 %v16725_v60, %v6932_v59  ;;  %v6933_v21 = vmul.f32 %v13832_v55, %v16719_v7  ;;  %v16888_v46 = vsel %vm1299_vm11, %v16825_v44, %v7471_v63  ;;  %v7374_v42 = vsel %vm15103_vm10, 0, %v16870_v33 }
 0x484   : > { %v6973_v16 = vadd.f32 %v16725_v60, %v6930_v12  ;;  %v6931_v15 = vmul.f32 %v13833_v41, %v16719_v7  ;;  %13394 = vmatprep.mubr.bf16.mxu1 %v16888_v46  ;;  %v7373_v57 = vsel %vm15103_vm10, 0, %v16877_v53  ;;  %v7490_v31 = vshrl.u32 %v7374_v42, 16  ;;  %13427 = vmatpush3.bf16.msra.mxu1 %v14816_v47 }
 0x485   : > { %v6976_v28 = vadd.f32 %v16725_v60, %v6933_v21  ;;  %13395 = vmatmul.mubr.bf16.gmra.mrb[56].mxu1 %v16882_v32  ;;  %v7482_v44 = vshrl.u32 %v7373_v57, 16  ;;  %13428 = vmatprep.subr.bf16.mxu1 %v14817_v37  ;;  %v7011_v1 = vmax.f32 %v6975_v61, 0.0  ;;  %v7493_v0 = vshll.u32 %v7374_v42, 16 }
 0x486   : > { %v6974_v30 = vadd.f32 %v16725_v60, %v6931_v15  ;;  %v13356_v6 = vpop.f32.mrb[32].mxu0  ;;  %v7492_v2 = vrot.slane %v7490_v31, 7  ;;  %v7485_v22 = vshll.u32 %v7373_v57, 16  ;;  %v7009_v29 = vmax.f32 %v6973_v16, 0.0 }
 0x487   : > { %v7012_v38 = vmax.f32 %v6976_v28, 0.0  ;;  %v13834_v47 = vadd.f32 %v13356_v6, %v16551_v20  ;;  %v6712_v4 = vpop.f32.mrb[33].mxu0  ;;  %v7484_v17 = vrot.slane %v7482_v44, 7  ;;  %v17799_v6 = vld [vmem:[#allocation9_spill] sm:$0xff] }
 0x488   : > { %v7010_v50 = vmax.f32 %v6974_v30, 0.0  ;;  %v13835_v3 = vadd.f32 %v6712_v4, %v16553_v13  ;;  %v13357_v62 = vpop.f32.mrb[34].mxu0  ;;  %v7495_v26 = vor.u32 %v7493_v0, %v7492_v2  ;;  %13429 = vmatpush3.bf16.msra.mxu1 %v14817_v37 }
 0x489   : > { %v16909_v48 = vpack.c.bf16 %v7012_v38, %v7011_v1  ;;  %v6936_v18 = vmul.f32 %v13834_v47, %v16719_v7  ;;  %v13836_v5 = vadd.f32 %v13357_v62, %v16560_v51  ;;  %v6715_v49 = vpop.f32.mrb[35].mxu0  ;;  %v7487_v59 = vor.u32 %v7485_v22, %v7484_v17  ;;  %13462 = vmatprep.subr.bf16.mxu1 %v16904_v40 }
 0x48a   : > { %v16914_v20 = vpack.c.bf16 %v7010_v50, %v7009_v29  ;;  %v6934_v55 = vmul.f32 %v13835_v3, %v16719_v7  ;;  %v13837_v63 = vadd.f32 %v6715_v49, %v17798_v34  ;;  %v16919_v13 = vsel %vm1299_vm11, %v7484_v17, %v7495_v26  ;;  %v17800_v29 = vld [vmem:[#allocation10_spill] sm:$0xff] }
 0x48b   : > { %v6979_v37 = vadd.f32 %v16725_v60, %v6936_v18  ;;  %v6937_v12 = vmul.f32 %v13836_v5, %v16719_v7  ;;  %v16925_v51 = vsel %vm1299_vm11, %v16865_v27, %v7487_v59  ;;  %v7376_v41 = vsel %vm15103_vm10, 0, %v16909_v48  ;;  %v17801_v5 = vld [vmem:[#allocation11_spill] sm:$0xff] }
 0x48c   : > { %v6977_v61 = vadd.f32 %v16725_v60, %v6934_v55  ;;  %v6935_v21 = vmul.f32 %v13837_v63, %v16719_v7  ;;  %13398 = vmatprep.mubr.bf16.mxu1 %v16925_v51  ;;  %v7375_v42 = vsel %vm15103_vm10, 0, %v16914_v20  ;;  %v7506_v16 = vshrl.u32 %v7376_v41, 16 }
 0x48d   : > { %v6980_v15 = vadd.f32 %v16725_v60, %v6937_v12  ;;  %13399 = vmatmul.mubr.bf16.gmra.mrb[60].mxu1 %v16919_v13  ;;  %v7498_v27 = vshrl.u32 %v7375_v42, 16  ;;  %v7015_v57 = vmax.f32 %v6979_v37, 0.0  ;;  %v7509_v1 = vshll.u32 %v7376_v41, 16 }
 0x48e   : > { %v6978_v31 = vadd.f32 %v16725_v60, %v6935_v21  ;;  %v13360_v28 = vpop.f32.mrb[36].mxu0  ;;  %v7508_v44 = vrot.slane %v7506_v16, 7  ;;  %v7501_v4 = vshll.u32 %v7375_v42, 16  ;;  %v7013_v17 = vmax.f32 %v6977_v61, 0.0 }
 0x48f   : > { %v7016_v30 = vmax.f32 %v6980_v15, 0.0  ;;  %v13838_v0 = vadd.f32 %v13360_v28, %v17799_v6  ;;  %v6728_v38 = vpop.f32.mrb[37].mxu0  ;;  %v7500_v47 = vrot.slane %v7498_v27, 7 }
 0x490   : > { %v7014_v22 = vmax.f32 %v6978_v31, 0.0  ;;  %v13839_v50 = vadd.f32 %v6728_v38, %v17800_v29  ;;  %v13361_v3 = vpop.f32.mrb[38].mxu0  ;;  %v7511_v62 = vor.u32 %v7509_v1, %v7508_v44 }
 0x491   : > { %v16941_v26 = vpack.c.bf16 %v7016_v30, %v7015_v57  ;;  %v6940_v18 = vmul.f32 %v13838_v0, %v16719_v7  ;;  %v13840_v49 = vadd.f32 %v13361_v3, %v17801_v5  ;;  %v6731_v59 = vpop.f32.mrb[39].mxu0  ;;  %v7503_v55 = vor.u32 %v7501_v4, %v7500_v47 }
 0x492   : > { %v16945_v34 = vpack.c.bf16 %v7014_v22, %v7013_v17  ;;  %v6938_v63 = vmul.f32 %v13839_v50, %v16719_v7  ;;  %v13841_v37 = vadd.f32 %v6731_v59, %v16582_v36  ;;  %v16950_v12 = vsel %vm1299_vm11, %v7500_v47, %v7511_v62 }
 0x493   : > { %v6983_v41 = vadd.f32 %v16725_v60, %v6940_v18  ;;  %v6941_v61 = vmul.f32 %v13840_v49, %v16719_v7  ;;  %v16955_v21 = vsel %vm1299_vm11, %v7492_v2, %v7503_v55  ;;  %v7378_v42 = vsel %vm15103_vm10, 0, %v16941_v26 }
 0x494   : > { %v6981_v16 = vadd.f32 %v16725_v60, %v6938_v63  ;;  %v6939_v15 = vmul.f32 %v13841_v37, %v16719_v7  ;;  %13402 = vmatprep.mubr.bf16.mxu1 %v16955_v21  ;;  %v7377_v36 = vsel %vm15103_vm10, 0, %v16945_v34  ;;  %v7522_v27 = vshrl.u32 %v7378_v42, 16 }
 0x495   : > { %v6984_v57 = vadd.f32 %v16725_v60, %v6941_v61  ;;  %13403 = vmatmul.mubr.bf16.gmra.mrb[64].mxu1 %v16950_v12  ;;  %v7514_v2 = vshrl.u32 %v7377_v36, 16  ;;  %v7525_v30 = vshll.u32 %v7378_v42, 16  ;;  %v7019_v6 = vmax.f32 %v6983_v41, 0.0 }
 0x496   : > { %v6982_v31 = vadd.f32 %v16725_v60, %v6939_v15  ;;  %v13364_v28 = vpop.f32.mrb[40].mxu0  ;;  %v7524_v1 = vrot.slane %v7522_v27, 7  ;;  %v7517_v4 = vshll.u32 %v7377_v36, 16  ;;  %v7017_v17 = vmax.f32 %v6981_v16, 0.0 }
 0x497   : > { %v7020_v0 = vmax.f32 %v6984_v57, 0.0  ;;  %v6744_v38 = vpop.f32.mrb[41].mxu0  ;;  %v7516_v47 = vrot.slane %v7514_v2, 7 }
 0x498   : > { %v7018_v22 = vmax.f32 %v6982_v31, 0.0  ;;  %v13842_v29 = vadd.f32 %v6744_v38, %v16587_v56  ;;  %v13365_v50 = vpop.f32.mrb[42].mxu0  ;;  %v7527_v3 = vor.u32 %v7525_v30, %v7524_v1  ;;  %v14819_v38 = vld [vmem:[%s17541_s10 + $0x88] sm:$0xff]  }
 0x499   : > { %v16970_v62 = vpack.c.bf16 %v7020_v0, %v7019_v6  ;;  %v6747_v18 = vpop.f32.mrb[43].mxu0  ;;  %v7519_v5 = vor.u32 %v7517_v4, %v7516_v47  ;;  %v14820_v4 = vld [vmem:[%s17541_s10 + $0x90] sm:$0xff]   ;;  %v14821_v50 = vld [vmem:[%s17541_s10 + $0x98] sm:$0xff]  }
 0x49a   : > { %v16972_v49 = vpack.c.bf16 %v7018_v22, %v7017_v17  ;;  %v6942_v59 = vmul.f32 %v13842_v29, %v16719_v7  ;;  %v13843_v55 = vadd.f32 %v6747_v18, %v16594_v58  ;;  %v16980_v37 = vsel %vm1299_vm11, %v7516_v47, %v7527_v3  ;;  %v14822_v3 = vld [vmem:[%s17541_s10 + $0xa0] sm:$0xff]   ;;  %v14823_v18 = vld [vmem:[%s17541_s10 + $0xa8] sm:$0xff]  }
 0x49b   : > { %v16977_v63 = vsel %vm1299_vm11, %v7508_v44, %v7519_v5  ;;  %v7380_v56 = vsel %vm15103_vm10, 0, %v16970_v62  ;;  %v14824_v5 = vld [vmem:[%s17541_s10 + $0xb0] sm:$0xff]  }
 0x49c   : > { %v6985_v41 = vadd.f32 %v16725_v60, %v6942_v59  ;;  %v6943_v61 = vmul.f32 %v13843_v55, %v16719_v7  ;;  %13406 = vmatprep.mubr.bf16.mxu1 %v16977_v63  ;;  %v7379_v58 = vsel %vm15103_vm10, 0, %v16972_v49  ;;  %v7538_v42 = vshrl.u32 %v7380_v56, 16  ;;  %v14825_v59 = vld [vmem:[%s17541_s10 + $0xb8] sm:$0xff]   ;;  %v14826_v55 = vld [vmem:[%s17541_s10 + $0xc0] sm:$0xff]  }
 0x49d   : > { %13407 = vmatmul.mubr.bf16.gmra.mrb[68].mxu1 %v16980_v37  ;;  %v7530_v44 = vshrl.u32 %v7379_v58, 16  ;;  %v7541_v36 = vshll.u32 %v7380_v56, 16  ;;  %v7533_v57 = vshll.u32 %v7379_v58, 16  ;;  %v7384_v56 = vsel %vm15082_vm9, 0, %v16734_v54 }
 0x49e   : > { %v6986_v16 = vadd.f32 %v16725_v60, %v6943_v61  ;;  %v16993_v15 = vrot.slane %v7538_v42, 7  ;;  %v7021_v2 = vmax.f32 %v6985_v41, 0.0  ;;  %v17635_v60 = vmov 0.0|0.0  }
 0x49f   : > { %v7532_v27 = vrot.slane %v7530_v44, 7  ;;  %v8149_v41 = vshll.u32 %v7384_v56, 16  ;;  %v7385_v61 = vsel %vm15082_vm9, 0, %v16761_v43  ;;  %v7386_v44 = vsel %vm15082_vm9, 0, %v16754_v11 }
 0x4a0   : > { %v7022_v31 = vmax.f32 %v6986_v16, 0.0  ;;  %v7543_v7 = vor.u32 %v7541_v36, %v16993_v15  ;;  %v8157_v42 = vshll.u32 %v7385_v61, 16 }
 0x4a1   : > { %v7535_v28 = vor.u32 %v7533_v57, %v7532_v27  ;;  %v8151_v58 = vrot.slane %v8149_v41, 1  ;;  %v8161_v57 = vshrl.u32 %v7385_v61, 16  ;;  %v8169_v41 = vshrl.u32 %v7386_v44, 16 }
 0x4a2   : > { %v16996_v30 = vpack.c.bf16 %v7022_v31, %v7021_v2  ;;  %v17003_v0 = vsel %vm1299_vm11, %v7532_v27, %v7543_v7  ;;  %v8159_v36 = vrot.slane %v8157_v42, 1  ;;  %v7387_v27 = vsel %vm15082_vm9, 0, %v16797_v45 }
 0x4a3   : > { %v16999_v6 = vsel %vm1299_vm11, %v7524_v1, %v7535_v28  ;;  %v8152_v16 = vsel %vm2712_vm8, %v16667_v52, %v8151_v58  ;;  %v8165_v2 = vshll.u32 %v7386_v44, 16  ;;  %v8153_v31 = vshrl.u32 %v7384_v56, 16  ;;  %v14828_v56 = vld [vmem:[%s17541_s10 + $0xd0] sm:$0xff]  }
 0x4a4   : > { %13410 = vmatprep.mubr.bf16.mxu1 %v16999_v6  ;;  %v7399_v47 = vsel %vm15082_vm9, 0, %v16996_v30  ;;  %v8163_v7 = vor.u32 %v8161_v57, %v8159_v36  ;;  %v8173_v28 = vshll.u32 %v7387_v27, 16 }
 0x4a5   : > { %13411 = vmatmul.mubr.bf16.gmra.mrb[72].mxu1 %v17003_v0  ;;  %v8269_v17 = vshll.u32 %v7399_v47, 16  ;;  %v9264_v29 = vshrl.u32 %v7399_v47, 16  ;;  %v8167_v47 = vrot.slane %v8165_v2, 1  ;;  %v7391_v2 = vsel %vm15082_vm9, 0, %v16877_v53 }
 0x4a6   : > { %13430 = vmatprep.mubr.bf16.mxu1 %v17635_v60 }
 0x4a7   : > { %v17019_v22 = vrot.slane %v8269_v17, 1  ;;  %v8171_v42 = vor.u32 %v8169_v41, %v8167_v47 }
 0x4ad   : > { %13431 = vmatmul.mubr.bf16.vlgmr.msra.gmra.mrb[44].mxu1 %v16734_v54 }
 0x4ae   : > { %13434 = vmatprep.mubr.bf16.mxu1 %v16761_v43  ;;  %13463 = vmatpush3.bf16.msra.mxu1 %v16904_v40  ;;  %v17025_v40 = vor.u32 %v9264_v29, %v17019_v22  ;;  %v7388_v29 = vsel %vm15082_vm9, 0, %v16790_v25 }
 0x4af   : > { %13464 = vmatprep.subr.bf16.mxu1 %v14819_v38 }
 0x4b0   : > { %17803 = vst [vmem:[#allocation13_spill] sm:$0xff] %v17025_v40 }
 0x4b2   : > { %13465 = vmatpush3.bf16.msra.mxu1 %v14819_v38  ;;  %v8155_v38 = vor.u32 %v8153_v31, %v8151_v58 }
 0x4b3   : > { %13466 = vmatprep.subr.bf16.mxu1 %v14820_v4 }
 0x4b4   : > { %v17073_v17 = vsel %vm2712_vm8, %v8155_v38, %v8159_v36  ;;  %v8185_v38 = vshrl.u32 %v7388_v29, 16 }
 0x4b5   : > { %13435 = vmatmul.mubr.bf16.gmra.mrb[48].mxu1 %v16754_v11 }
 0x4b6   : > { %13438 = vmatprep.mubr.bf16.mxu1 %v16797_v45  ;;  %13467 = vmatpush3.bf16.msra.mxu1 %v14820_v4  ;;  %v14827_v4 = vld [vmem:[%s17541_s10 + $0xc8] sm:$0xff]  }
 0x4b7   : > { %13468 = vmatprep.subr.bf16.mxu1 %v14821_v50 }
 0x4ba   : > { %13469 = vmatpush3.bf16.msra.mxu1 %v14821_v50  ;;  %v17080_v50 = vsel %vm2712_vm8, %v8163_v7, %v8167_v47 }
 0x4bb   : > { %13470 = vmatprep.subr.bf16.mxu1 %v14822_v3 }
 0x4bd   : > { %13439 = vmatmul.mubr.bf16.gmra.mrb[52].mxu1 %v16790_v25 }
 0x4be   : > { %13442 = vmatprep.mubr.bf16.mxu1 %v16837_v8  ;;  %13471 = vmatpush3.bf16.msra.mxu1 %v14822_v3  ;;  %v8175_v3 = vrot.slane %v8173_v28, 1  ;;  %v14830_v28 = vld [vmem:[%s17541_s10 + $0xe0] sm:$0xff]  }
 0x4bf   : > { %13472 = vmatprep.subr.bf16.mxu1 %v14823_v18 }
 0x4c0   : > { %v17093_v36 = vsel %vm2712_vm8, %v8171_v42, %v8175_v3 }
 0x4c2   : > { %13473 = vmatpush3.bf16.msra.mxu1 %v14823_v18  ;;  %v7389_v18 = vsel %vm15082_vm9, 0, %v16837_v8 }
 0x4c3   : > { %13474 = vmatprep.subr.bf16.mxu1 %v14824_v5  ;;  %v8189_v58 = vshll.u32 %v7389_v18, 16  ;;  %v8193_v31 = vshrl.u32 %v7389_v18, 16  ;;  %v7392_v18 = vsel %vm15082_vm9, 0, %v16870_v33 }
 0x4c4   : > { %v8213_v42 = vshll.u32 %v7392_v18, 16 }
 0x4c5   : > { %13443 = vmatmul.mubr.bf16.gmra.mrb[56].mxu1 %v16830_v23  ;;  %v8191_v57 = vrot.slane %v8189_v58, 1  ;;  %v8209_v58 = vshrl.u32 %v7391_v2, 16 }
 0x4c6   : > { %13446 = vmatprep.mubr.bf16.mxu1 %v16877_v53  ;;  %13475 = vmatpush3.bf16.msra.mxu1 %v14824_v5  ;;  %v8177_v5 = vshrl.u32 %v7387_v27, 16  ;;  %v7390_v27 = vsel %vm15082_vm9, 0, %v16830_v23 }
 0x4c7   : > { %13476 = vmatprep.subr.bf16.mxu1 %v14825_v59  ;;  %v8197_v7 = vshll.u32 %v7390_v27, 16  ;;  %v8195_v47 = vor.u32 %v8193_v31, %v8191_v57 }
 0x4c8   : > { %v8179_v61 = vor.u32 %v8177_v5, %v8175_v3 }
 0x4c9   : > { %v8199_v5 = vrot.slane %v8197_v7, 1 }
 0x4ca   : > { %13477 = vmatpush3.bf16.msra.mxu1 %v14825_v59  ;;  %v8181_v59 = vshll.u32 %v7388_v29, 16 }
 0x4cb   : > { %13510 = vmatprep.subr.bf16.mxu1 %v14826_v55  ;;  %v17120_v29 = vsel %vm2712_vm8, %v8195_v47, %v8199_v5  ;;  %v14833_v47 = vld [vmem:[%s17541_s10 + $0xf8] sm:$0xff]  }
 0x4cd   : > { %13447 = vmatmul.mubr.bf16.gmra.mrb[60].mxu1 %v16870_v33 }
 0x4ce   : > { %13450 = vmatprep.mubr.bf16.mxu1 %v16914_v20 }
 0x4d5   : > { %13451 = vmatmul.mubr.bf16.gmra.mrb[64].mxu1 %v16909_v48 }
 0x4d6   : > { %13454 = vmatprep.mubr.bf16.mxu1 %v16945_v34 }
 0x4dd   : > { %13455 = vmatmul.mubr.bf16.gmra.mrb[68].mxu1 %v16941_v26 }
 0x4de   : > { %13458 = vmatprep.mubr.bf16.mxu1 %v16972_v49 }
 0x4e5   : > { %13459 = vmatmul.mubr.bf16.gmra.mrb[72].mxu1 %v16970_v62 }
 0x4e6   : > { %13478 = vmatprep.mubr.bf16.mxu1 %v8152_v16  ;;  %v8183_v16 = vrot.slane %v8181_v59, 1  ;;  %v14831_v59 = vld [vmem:[%s17541_s10 + $0xe8] sm:$0xff]  }
 0x4e8   : > { %v17100_v44 = vsel %vm2712_vm8, %v8179_v61, %v8183_v16  ;;  %v8187_v3 = vor.u32 %v8185_v38, %v8183_v16  ;;  %v7393_v61 = vsel %vm15082_vm9, 0, %v16914_v20  ;;  %v14832_v16 = vld [vmem:[%s17541_s10 + $0xf0] sm:$0xff]   ;;  %v8215_v38 = vrot.slane %v8213_v42, 1 }
 0x4e9   : > { %v8221_v31 = vshll.u32 %v7393_v61, 16 }
 0x4ed   : > { %13479 = vmatmul.mubr.bf16.vlgmr.msra.gmra.mrb[44].mxu1 %v17073_v17 }
 0x4ee   : > { %13482 = vmatprep.mubr.bf16.mxu1 %v17080_v50  ;;  %13511 = vmatpush3.bf16.msra.mxu1 %v14826_v55  ;;  %v14829_v55 = vld [vmem:[%s17541_s10 + $0xd8] sm:$0xff]  }
 0x4ef   : > { %13512 = vmatprep.subr.bf16.mxu1 %v14827_v4 }
 0x4f2   : > { %13513 = vmatpush3.bf16.msra.mxu1 %v14827_v4  ;;  %v8205_v4 = vshll.u32 %v7391_v2, 16  ;;  %v7394_v2 = vsel %vm15082_vm9, 0, %v16909_v48 }
 0x4f3   : > { %13514 = vmatprep.subr.bf16.mxu1 %v14828_v56 }
 0x4f4   : > { %v8207_v41 = vrot.slane %v8205_v4, 1  ;;  %v8223_v4 = vrot.slane %v8221_v31, 1 }
 0x4f5   : > { %13483 = vmatmul.mubr.bf16.gmra.mrb[48].mxu1 %v17093_v36 }
 0x4f6   : > { %13486 = vmatprep.mubr.bf16.mxu1 %v17100_v44  ;;  %13515 = vmatpush3.bf16.msra.mxu1 %v14828_v56  ;;  %v17113_v56 = vsel %vm2712_vm8, %v8187_v3, %v8191_v57  ;;  %v8211_v57 = vor.u32 %v8209_v58, %v8207_v41  ;;  %v7395_v3 = vsel %vm15082_vm9, 0, %v16945_v34  ;;  %v8217_v58 = vshrl.u32 %v7392_v18, 16 }
 0x4f7   : > { %13516 = vmatprep.subr.bf16.mxu1 %v14829_v55  ;;  %v7397_v18 = vsel %vm15082_vm9, 0, %v16972_v49 }
 0x4fa   : > { %13517 = vmatpush3.bf16.msra.mxu1 %v14829_v55  ;;  %v8201_v55 = vshrl.u32 %v7390_v27, 16  ;;  %v17140_v27 = vsel %vm2712_vm8, %v8211_v57, %v8215_v38  ;;  %v8219_v57 = vor.u32 %v8217_v58, %v8215_v38  ;;  %v8241_v38 = vshrl.u32 %v7395_v3, 16 }
 0x4fb   : > { %13518 = vmatprep.subr.bf16.mxu1 %v14830_v28 }
 0x4fc   : > { %v8203_v7 = vor.u32 %v8201_v55, %v8199_v5  ;;  %v8225_v5 = vshrl.u32 %v7393_v61, 16  ;;  %v8237_v55 = vshll.u32 %v7395_v3, 16  ;;  %v7396_v61 = vsel %vm15082_vm9, 0, %v16941_v26 }
 0x4fd   : > { %13487 = vmatmul.mubr.bf16.gmra.mrb[52].mxu1 %v17113_v56 }
 0x4fe   : > { %13490 = vmatprep.mubr.bf16.mxu1 %v17120_v29  ;;  %13519 = vmatpush3.bf16.msra.mxu1 %v14830_v28  ;;  %v17133_v28 = vsel %vm2712_vm8, %v8203_v7, %v8207_v41  ;;  %v14834_v41 = vld [vmem:[%s17541_s10 + $0x100] sm:$0xff]   ;;  %v8227_v42 = vor.u32 %v8225_v5, %v8223_v4  ;;  %v17150_v7 = vsel %vm2712_vm8, %v8219_v57, %v8223_v4  ;;  %v8239_v60 = vrot.slane %v8237_v55, 1 }
 0x4ff   : > { %13520 = vmatprep.subr.bf16.mxu1 %v14831_v59  ;;  %v8233_v4 = vshrl.u32 %v7394_v2, 16 }
 0x500   : > { %v8243_v5 = vor.u32 %v8241_v38, %v8239_v60  ;;  %v8249_v38 = vshrl.u32 %v7396_v61, 16 }
 0x502   : > { %13521 = vmatpush3.bf16.msra.mxu1 %v14831_v59  ;;  %v8229_v59 = vshll.u32 %v7394_v2, 16  ;;  %v8257_v2 = vshrl.u32 %v7397_v18, 16 }
 0x503   : > { %13522 = vmatprep.subr.bf16.mxu1 %v14832_v16 }
 0x504   : > { %v8231_v31 = vrot.slane %v8229_v59, 1  ;;  %v8253_v59 = vshll.u32 %v7397_v18, 16 }
 0x505   : > { %13491 = vmatmul.mubr.bf16.gmra.mrb[56].mxu1 %v17133_v28 }
 0x506   : > { %13494 = vmatprep.mubr.bf16.mxu1 %v17140_v27  ;;  %13523 = vmatpush3.bf16.msra.mxu1 %v14832_v16  ;;  %v17157_v16 = vsel %vm2712_vm8, %v8227_v42, %v8231_v31  ;;  %v8235_v58 = vor.u32 %v8233_v4, %v8231_v31  ;;  %v7398_v42 = vsel %vm15082_vm9, 0, %v16970_v62  ;;  %v8255_v40 = vrot.slane %v8253_v59, 1 }
 0x507   : > { %13524 = vmatprep.subr.bf16.mxu1 %v14833_v47  ;;  %v8261_v3 = vshll.u32 %v7398_v42, 16 }
 0x508   : > { %v17164_v14 = vsel %vm2712_vm8, %v8235_v58, %v8239_v60  ;;  %v8259_v31 = vor.u32 %v8257_v2, %v8255_v40  ;;  %v14840_v58 = vld [vmem:[%s17541_s10 + $0x130] sm:$0xff]   ;;  %v7381_v2 = vsel %vm15103_vm10, 0, %v16996_v30 }
 0x509   : > { %v8263_v4 = vrot.slane %v8261_v3, 1  ;;  %v8612_v3 = vshrl.u32 %v7381_v2, 16 }
 0x50a   : > { %13525 = vmatpush3.bf16.msra.mxu1 %v14833_v47  ;;  %v8245_v47 = vshll.u32 %v7396_v61, 16  ;;  %v14836_v61 = vld [vmem:[%s17541_s10 + $0x110] sm:$0xff]  }
 0x50b   : > { %13558 = vmatprep.subr.bf16.mxu1 %v14834_v41  ;;  %v17179_v1 = vsel %vm2712_vm8, %v8259_v31, %v8263_v4  ;;  %v8615_v31 = vshll.u32 %v7381_v2, 16  ;;  %v14857_v2 = vld [vmem:[%s17541_s10 + $0x1b8] sm:$0xff]  }
 0x50c   : > { %v8247_v57 = vrot.slane %v8245_v47, 1 }
 0x50d   : > { %13495 = vmatmul.mubr.bf16.gmra.mrb[60].mxu1 %v17150_v7 }
 0x50e   : > { %13498 = vmatprep.mubr.bf16.mxu1 %v17157_v16  ;;  %v17171_v55 = vsel %vm2712_vm8, %v8243_v5, %v8247_v57  ;;  %v8251_v47 = vor.u32 %v8249_v38, %v8247_v57  ;;  %v8265_v5 = vshrl.u32 %v7398_v42, 16  ;;  %v14841_v57 = vld [vmem:[%s17541_s10 + $0x138] sm:$0xff]   ;;  %v14842_v42 = vld [vmem:[%s17541_s10 + $0x140] sm:$0xff]   ;;  %v17227_v38 = vrot.slane %v8612_v3, 7 }
 0x50f   : > { %v14858_v3 = vld [vmem:[%s17541_s10 + $0x1c0] sm:$0xff]  }
 0x510   : > { %v17175_v60 = vsel %vm2712_vm8, %v8251_v47, %v8255_v40  ;;  %v8267_v59 = vor.u32 %v8265_v5, %v8263_v4  ;;  %v14835_v40 = vld [vmem:[%s17541_s10 + $0x108] sm:$0xff]   ;;  %v8617_v47 = vor.u32 %v8615_v31, %v17227_v38  ;;  %v14844_v5 = vld [vmem:[%s17541_s10 + $0x150] sm:$0xff]  }
 0x511   : > { %v17804_v31 = vld [vmem:[#allocation13_spill] sm:$0xff] }
 0x512   : > { %v17184_v18 = vsel %vm2712_vm8, %v8267_v59, %v17019_v22  ;;  %v14838_v22 = vld [vmem:[%s17541_s10 + $0x120] sm:$0xff]   ;;  %v17234_v4 = vsel %vm1299_vm11, %v16993_v15, %v8617_v47  ;;  %v14847_v59 = vld [vmem:[%s17541_s10 + $0x168] sm:$0xff]   ;;  %v17319_v47 = vsel %vm2712_vm8, %v17804_v31, %v16667_v52 }
 0x513   : > { %v14846_v15 = vld [vmem:[%s17541_s10 + $0x160] sm:$0xff]  }
 0x515   : > { %13499 = vmatmul.mubr.bf16.gmra.mrb[64].mxu1 %v17164_v14 }
 0x516   : > { %13502 = vmatprep.mubr.bf16.mxu1 %v17171_v55 }
 0x51d   : > { %13503 = vmatmul.mubr.bf16.gmra.mrb[68].mxu1 %v17175_v60 }
 0x51e   : > { %13506 = vmatprep.mubr.bf16.mxu1 %v17179_v1 }
 0x525   : > { %13507 = vmatmul.mubr.bf16.gmra.mrb[72].mxu1 %v17184_v18 }
 0x526   : > { %13526 = vmatprep.mubr.bf16.mxu1 %v16767_v24  ;;  %v14837_v24 = vld [vmem:[%s17541_s10 + $0x118] sm:$0xff]  }
 0x52d   : > { %13527 = vmatmul.mubr.bf16.vlgmr.msra.gmra.mrb[44].mxu1 %v16808_v19 }
 0x52e   : > { %13530 = vmatprep.mubr.bf16.mxu1 %v16802_v39  ;;  %13559 = vmatpush3.bf16.msra.mxu1 %v14834_v41  ;;  %v14839_v41 = vld [vmem:[%s17541_s10 + $0x128] sm:$0xff]  }
 0x52f   : > { %13560 = vmatprep.subr.bf16.mxu1 %v14835_v40 }
 0x532   : > { %13561 = vmatpush3.bf16.msra.mxu1 %v14835_v40  ;;  %v14848_v40 = vld [vmem:[%s17541_s10 + $0x170] sm:$0xff]  }
 0x533   : > { %13562 = vmatprep.subr.bf16.mxu1 %v14836_v61 }
 0x535   : > { %13531 = vmatmul.mubr.bf16.gmra.mrb[48].mxu1 %v16848_v9 }
 0x536   : > { %13534 = vmatprep.mubr.bf16.mxu1 %v16842_v35  ;;  %13563 = vmatpush3.bf16.msra.mxu1 %v14836_v61  ;;  %v14849_v61 = vld [vmem:[%s17541_s10 + $0x178] sm:$0xff]  }
 0x537   : > { %13564 = vmatprep.subr.bf16.mxu1 %v14837_v24 }
 0x53a   : > { %13565 = vmatpush3.bf16.msra.mxu1 %v14837_v24  ;;  %v14850_v24 = vld [vmem:[%s17541_s10 + $0x180] sm:$0xff]  }
 0x53b   : > { %13566 = vmatprep.subr.bf16.mxu1 %v14838_v22 }
 0x53d   : > { %13535 = vmatmul.mubr.bf16.gmra.mrb[52].mxu1 %v16888_v46 }
 0x53e   : > { %13538 = vmatprep.mubr.bf16.mxu1 %v16882_v32  ;;  %13567 = vmatpush3.bf16.msra.mxu1 %v14838_v22  ;;  %v14851_v22 = vld [vmem:[%s17541_s10 + $0x188] sm:$0xff]  }
 0x53f   : > { %13568 = vmatprep.subr.bf16.mxu1 %v14839_v41 }
 0x542   : > { %13569 = vmatpush3.bf16.msra.mxu1 %v14839_v41  ;;  %v14852_v41 = vld [vmem:[%s17541_s10 + $0x190] sm:$0xff]  }
 0x543   : > { %13570 = vmatprep.subr.bf16.mxu1 %v14840_v58 }
 0x545   : > { %13539 = vmatmul.mubr.bf16.gmra.mrb[56].mxu1 %v16925_v51 }
 0x546   : > { %13542 = vmatprep.mubr.bf16.mxu1 %v16919_v13  ;;  %13571 = vmatpush3.bf16.msra.mxu1 %v14840_v58  ;;  %v14854_v58 = vld [vmem:[%s17541_s10 + $0x1a0] sm:$0xff]  }
 0x547   : > { %13572 = vmatprep.subr.bf16.mxu1 %v14841_v57 }
 0x54a   : > { %13573 = vmatpush3.bf16.msra.mxu1 %v14841_v57  ;;  %v14855_v57 = vld [vmem:[%s17541_s10 + $0x1a8] sm:$0xff]  }
 0x54b   : > { %13606 = vmatprep.subr.bf16.mxu1 %v14842_v42 }
 0x54d   : > { %13543 = vmatmul.mubr.bf16.gmra.mrb[60].mxu1 %v16955_v21 }
 0x54e   : > { %13546 = vmatprep.mubr.bf16.mxu1 %v16950_v12 }
 0x555   : > { %13547 = vmatmul.mubr.bf16.gmra.mrb[64].mxu1 %v16977_v63 }
 0x556   : > { %13550 = vmatprep.mubr.bf16.mxu1 %v16980_v37 }
 0x55d   : > { %13551 = vmatmul.mubr.bf16.gmra.mrb[68].mxu1 %v16999_v6 }
 0x55e   : > { %13554 = vmatprep.mubr.bf16.mxu1 %v17003_v0 }
 0x565   : > { %13555 = vmatmul.mubr.bf16.gmra.mrb[72].mxu1 %v17234_v4 }
 0x566   : > { %13574 = vmatprep.mubr.bf16.mxu1 %v16734_v54  ;;  %v14845_v54 = vld [vmem:[%s17541_s10 + $0x158] sm:$0xff]  }
 0x56d   : > { %13575 = vmatmul.mubr.bf16.vlgmr.msra.gmra.mrb[44].mxu1 %v16761_v43 }
 0x56e   : > { %13578 = vmatprep.mubr.bf16.mxu1 %v16754_v11  ;;  %13607 = vmatpush3.bf16.msra.mxu1 %v14842_v42  ;;  %v14856_v42 = vld [vmem:[%s17541_s10 + $0x1b0] sm:$0xff]  }
 0x56f   : > { %13608 = vmatprep.subr.bf16.mxu1 %v14843_v10 }
 0x572   : > { %13609 = vmatpush3.bf16.msra.mxu1 %v14843_v10  ;;  %v14859_v10 = vld [vmem:[%s17541_s10 + $0x1c8] sm:$0xff]  }
 0x573   : > { %13610 = vmatprep.subr.bf16.mxu1 %v14844_v5 }
 0x575   : > { %13579 = vmatmul.mubr.bf16.gmra.mrb[48].mxu1 %v16797_v45 }
 0x576   : > { %13582 = vmatprep.mubr.bf16.mxu1 %v16790_v25  ;;  %13611 = vmatpush3.bf16.msra.mxu1 %v14844_v5  ;;  %v14860_v5 = vld [vmem:[%s17541_s10 + $0x1d0] sm:$0xff]  }
 0x577   : > { %13612 = vmatprep.subr.bf16.mxu1 %v14845_v54 }
 0x57a   : > { %13613 = vmatpush3.bf16.msra.mxu1 %v14845_v54 }
 0x57b   : > { %13614 = vmatprep.subr.bf16.mxu1 %v14846_v15 }
 0x57d   : > { %13583 = vmatmul.mubr.bf16.gmra.mrb[52].mxu1 %v16837_v8 }
 0x57e   : > { %13586 = vmatprep.mubr.bf16.mxu1 %v16830_v23  ;;  %13615 = vmatpush3.bf16.msra.mxu1 %v14846_v15 }
 0x57f   : > { %13616 = vmatprep.subr.bf16.mxu1 %v14847_v59 }
 0x582   : > { %13617 = vmatpush3.bf16.msra.mxu1 %v14847_v59 }
 0x583   : > { %13618 = vmatprep.subr.bf16.mxu1 %v14848_v40 }
 0x585   : > { %13587 = vmatmul.mubr.bf16.gmra.mrb[56].mxu1 %v16877_v53 }
 0x586   : > { %13590 = vmatprep.mubr.bf16.mxu1 %v16870_v33  ;;  %13619 = vmatpush3.bf16.msra.mxu1 %v14848_v40 }
 0x587   : > { %13620 = vmatprep.subr.bf16.mxu1 %v14849_v61 }
 0x58a   : > { %13621 = vmatpush3.bf16.msra.mxu1 %v14849_v61 }
 0x58b   : > { %13654 = vmatprep.subr.bf16.mxu1 %v14850_v24 }
 0x58d   : > { %13591 = vmatmul.mubr.bf16.gmra.mrb[60].mxu1 %v16914_v20 }
 0x58e   : > { %13594 = vmatprep.mubr.bf16.mxu1 %v16909_v48 }
 0x595   : > { %13595 = vmatmul.mubr.bf16.gmra.mrb[64].mxu1 %v16945_v34 }
 0x596   : > { %13598 = vmatprep.mubr.bf16.mxu1 %v16941_v26 }
 0x59d   : > { %13599 = vmatmul.mubr.bf16.gmra.mrb[68].mxu1 %v16972_v49 }
 0x59e   : > { %13602 = vmatprep.mubr.bf16.mxu1 %v16970_v62 }
 0x5a5   : > { %13603 = vmatmul.mubr.bf16.gmra.mrb[72].mxu1 %v16996_v30 }
 0x5a6   : > { %13622 = vmatprep.mubr.bf16.mxu1 %v17073_v17  ;;  %v14853_v17 = vld [vmem:[%s17541_s10 + $0x198] sm:$0xff]  }
 0x5ad   : > { %13623 = vmatmul.mubr.bf16.vlgmr.msra.gmra.mrb[44].mxu1 %v17080_v50 }
 0x5ae   : > { %13626 = vmatprep.mubr.bf16.mxu1 %v17093_v36  ;;  %13655 = vmatpush3.bf16.msra.mxu1 %v14850_v24 }
 0x5af   : > { %13656 = vmatprep.subr.bf16.mxu1 %v14851_v22 }
 0x5b2   : > { %13657 = vmatpush3.bf16.msra.mxu1 %v14851_v22 }
 0x5b3   : > { %13658 = vmatprep.subr.bf16.mxu1 %v14852_v41 }
 0x5b5   : > { %13627 = vmatmul.mubr.bf16.gmra.mrb[48].mxu1 %v17100_v44 }
 0x5b6   : > { %13630 = vmatprep.mubr.bf16.mxu1 %v17113_v56  ;;  %13659 = vmatpush3.bf16.msra.mxu1 %v14852_v41 }
 0x5b7   : > { %13660 = vmatprep.subr.bf16.mxu1 %v14853_v17 }
 0x5ba   : > { %13661 = vmatpush3.bf16.msra.mxu1 %v14853_v17 }
 0x5bb   : > { %13662 = vmatprep.subr.bf16.mxu1 %v14854_v58 }
 0x5bd   : > { %13631 = vmatmul.mubr.bf16.gmra.mrb[52].mxu1 %v17120_v29 }
 0x5be   : > { %13634 = vmatprep.mubr.bf16.mxu1 %v17133_v28  ;;  %13663 = vmatpush3.bf16.msra.mxu1 %v14854_v58 }
 0x5bf   : > { %13664 = vmatprep.subr.bf16.mxu1 %v14855_v57 }
 0x5c2   : > { %13665 = vmatpush3.bf16.msra.mxu1 %v14855_v57 }
 0x5c3   : > { %13666 = vmatprep.subr.bf16.mxu1 %v14856_v42 }
 0x5c5   : > { %13635 = vmatmul.mubr.bf16.gmra.mrb[56].mxu1 %v17140_v27 }
 0x5c6   : > { %13638 = vmatprep.mubr.bf16.mxu1 %v17150_v7  ;;  %13667 = vmatpush3.bf16.msra.mxu1 %v14856_v42 }
 0x5c7   : > { %13668 = vmatprep.subr.bf16.mxu1 %v14857_v2 }
 0x5ca   : > { %13669 = vmatpush3.bf16.msra.mxu1 %v14857_v2 }
 0x5cb   : > { %13702 = vmatprep.subr.bf16.mxu1 %v14858_v3 }
 0x5cd   : > { %13639 = vmatmul.mubr.bf16.gmra.mrb[60].mxu1 %v17157_v16 }
 0x5ce   : > { %13642 = vmatprep.mubr.bf16.mxu1 %v17164_v14 }
 0x5d5   : > { %13643 = vmatmul.mubr.bf16.gmra.mrb[64].mxu1 %v17171_v55 }
 0x5d6   : > { %13646 = vmatprep.mubr.bf16.mxu1 %v17175_v60 }
 0x5dd   : > { %13647 = vmatmul.mubr.bf16.gmra.mrb[68].mxu1 %v17179_v1 }
 0x5de   : > { %13650 = vmatprep.mubr.bf16.mxu1 %v17184_v18 }
 0x5e5   : > { %13651 = vmatmul.mubr.bf16.gmra.mrb[72].mxu1 %v17319_v47 }
 0x5e6   : > { %13670 = vmatprep.mubr.bf16.mxu1 %v16808_v19  ;;  %v14861_v19 = vld [vmem:[%s17541_s10 + $0x1d8] sm:$0xff]  }
 0x5ed   : > { %13671 = vmatmul.mubr.bf16.vlgmr.msra.gmra.mrb[44].mxu1 %v16802_v39  ;;  %v14862_v39 = vld [vmem:[%s17541_s10 + $0x1e0] sm:$0xff]  }
 0x5ee   : > { %13674 = vmatprep.mubr.bf16.mxu1 %v16848_v9  ;;  %13703 = vmatpush3.bf16.msra.mxu1 %v14858_v3  ;;  %v14863_v9 = vld [vmem:[%s17541_s10 + $0x1e8] sm:$0xff]  }
 0x5ef   : > { %13704 = vmatprep.subr.bf16.mxu1 %v14859_v10 }
 0x5f2   : > { %13705 = vmatpush3.bf16.msra.mxu1 %v14859_v10 }
 0x5f3   : > { %13706 = vmatprep.subr.bf16.mxu1 %v14860_v5 }
 0x5f5   : > { %13675 = vmatmul.mubr.bf16.gmra.mrb[48].mxu1 %v16842_v35  ;;  %v14864_v35 = vld [vmem:[%s17541_s10 + $0x1f0] sm:$0xff]  }
 0x5f6   : > { %13678 = vmatprep.mubr.bf16.mxu1 %v16888_v46  ;;  %13707 = vmatpush3.bf16.msra.mxu1 %v14860_v5  ;;  %v14865_v46 = vld [vmem:[%s17541_s10 + $0x1f8] sm:$0xff]  }
 0x5f7   : > { %13708 = vmatprep.subr.bf16.mxu1 %v14861_v19 }
 0x5fa   : > { %13709 = vmatpush3.bf16.msra.mxu1 %v14861_v19 }
 0x5fb   : > { %13710 = vmatprep.subr.bf16.mxu1 %v14862_v39 }
 0x5fd   : > { %13679 = vmatmul.mubr.bf16.gmra.mrb[52].mxu1 %v16882_v32  ;;  %v14866_v32 = vld [vmem:[%s17541_s10 + $0x200] sm:$0xff]  }
 0x5fe   : > { %13682 = vmatprep.mubr.bf16.mxu1 %v16925_v51  ;;  %13711 = vmatpush3.bf16.msra.mxu1 %v14862_v39 }
 0x5ff   : > { %13712 = vmatprep.subr.bf16.mxu1 %v14863_v9 }
 0x602   : > { %13713 = vmatpush3.bf16.msra.mxu1 %v14863_v9 }
 0x603   : > { %13714 = vmatprep.subr.bf16.mxu1 %v14864_v35 }
 0x605   : > { %13683 = vmatmul.mubr.bf16.gmra.mrb[56].mxu1 %v16919_v13  ;;  %v17805_v13 = vld [vmem:[#allocation6_spill] sm:$0xff] }
 0x606   : > { %13686 = vmatprep.mubr.bf16.mxu1 %v16955_v21  ;;  %13715 = vmatpush3.bf16.msra.mxu1 %v14864_v35  ;;  %v9602_v51 = vsel %vm1299_vm11, %v17227_v38, %v17805_v13  ;;  %v14868_v21 = vld [vmem:[%s17541_s10 + $0x210] sm:$0xff]  }
 0x607   : > { %13716 = vmatprep.subr.bf16.mxu1 %v14865_v46 }
 0x60a   : > { %13717 = vmatpush3.bf16.msra.mxu1 %v14865_v46 }
 0x60b   : > { %13750 = vmatprep.subr.bf16.mxu1 %v14866_v32 }
 0x60d   : > { %13687 = vmatmul.mubr.bf16.gmra.mrb[60].mxu1 %v16950_v12  ;;  %v14867_v12 = vld [vmem:[%s17541_s10 + $0x208] sm:$0xff]  }
 0x60e   : > { %13690 = vmatprep.mubr.bf16.mxu1 %v16977_v63 }
 0x615   : > { %13691 = vmatmul.mubr.bf16.gmra.mrb[64].mxu1 %v16980_v37 }
 0x616   : > { %13694 = vmatprep.mubr.bf16.mxu1 %v16999_v6 }
 0x61d   : > { %13695 = vmatmul.mubr.bf16.gmra.mrb[68].mxu1 %v17003_v0 }
 0x61e   : > { %13698 = vmatprep.mubr.bf16.mxu1 %v17234_v4 }
 0x625   : > { %13699 = vmatmul.mubr.bf16.gmra.mrb[72].mxu1 %v9602_v51 }
 0x626   : > { %13718 = vmatprep.mubr.bf16.mxu1 %v16761_v43  ;;  %v14869_v43 = vld [vmem:[%s17541_s10 + $0x218] sm:$0xff]  }
 0x62d   : > { %13719 = vmatmul.mubr.bf16.vlgmr.msra.gmra.mrb[44].mxu1 %v16754_v11  ;;  %v14870_v11 = vld [vmem:[%s17541_s10 + $0x220] sm:$0xff]  }
 0x62e   : > { %13722 = vmatprep.mubr.bf16.mxu1 %v16797_v45  ;;  %13751 = vmatpush3.bf16.msra.mxu1 %v14866_v32  ;;  %v14871_v45 = vld [vmem:[%s17541_s10 + $0x228] sm:$0xff]  }
 0x62f   : > { %13752 = vmatprep.subr.bf16.mxu1 %v14867_v12 }
 0x632   : > { %13753 = vmatpush3.bf16.msra.mxu1 %v14867_v12 }
 0x633   : > { %13754 = vmatprep.subr.bf16.mxu1 %v14868_v21 }
 0x635   : > { %13723 = vmatmul.mubr.bf16.gmra.mrb[48].mxu1 %v16790_v25  ;;  %v14872_v25 = vld [vmem:[%s17541_s10 + $0x230] sm:$0xff]  }
 0x636   : > { %13726 = vmatprep.mubr.bf16.mxu1 %v16837_v8  ;;  %13755 = vmatpush3.bf16.msra.mxu1 %v14868_v21  ;;  %v14873_v8 = vld [vmem:[%s17541_s10 + $0x238] sm:$0xff]  }
 0x637   : > { %13756 = vmatprep.subr.bf16.mxu1 %v14869_v43 }
 0x63a   : > { %13757 = vmatpush3.bf16.msra.mxu1 %v14869_v43 }
 0x63b   : > { %13758 = vmatprep.subr.bf16.mxu1 %v14870_v11 }
 0x63d   : > { %13727 = vmatmul.mubr.bf16.gmra.mrb[52].mxu1 %v16830_v23  ;;  %v17806_v23 = vmov 0.0|0.0  }
 0x63e   : > { %13730 = vmatprep.mubr.bf16.mxu1 %v16877_v53  ;;  %13759 = vmatpush3.bf16.msra.mxu1 %v14870_v11 }
 0x63f   : > { %13760 = vmatprep.subr.bf16.mxu1 %v14871_v45 }
 0x642   : > { %13761 = vmatpush3.bf16.msra.mxu1 %v14871_v45 }
 0x643   : > { %13762 = vmatprep.subr.bf16.mxu1 %v14872_v25 }
 0x645   : > { %13731 = vmatmul.mubr.bf16.gmra.mrb[56].mxu1 %v16870_v33  ;;  %v14934_v33 = vmov 0.0  }
 0x646   : > { %13734 = vmatprep.mubr.bf16.mxu1 %v16914_v20  ;;  %13763 = vmatpush3.bf16.msra.mxu1 %v14872_v25  ;;  %10863 = vst [vmem:[%s17421_s29] sm:$0x1] %v14934_v33 }
 0x647   : > { %13764 = vmatprep.subr.bf16.mxu1 %v14873_v8 }
 0x64a   : > { %13765 = vmatpush3.bf16.msra.mxu1 %v14873_v8 }
 0x64d   : > { %13735 = vmatmul.mubr.bf16.gmra.mrb[60].mxu1 %v16909_v48  ;;  %v17432_v48 = vld [vmem:[%s17543_s12] ss:$0 sm:$0xff] }
 0x64e   : > { %13738 = vmatprep.mubr.bf16.mxu1 %v16945_v34 }
 0x655   : > { %13739 = vmatmul.mubr.bf16.gmra.mrb[64].mxu1 %v16941_v26 }
 0x656   : > { %13742 = vmatprep.mubr.bf16.mxu1 %v16972_v49 }
 0x65d   : > { %13743 = vmatmul.mubr.bf16.gmra.mrb[68].mxu1 %v16970_v62 }
 0x65e   : > { %13746 = vmatprep.mubr.bf16.mxu1 %v16996_v30 }
 0x665   : > { %13747 = vmatmul.mubr.bf16.gmra.mrb[72].mxu1 %v17806_v23 }
 0x666   : > { %13766 = vmatprep.mubr.bf16.mxu1 %v17080_v50 }
 0x66d   : > { %13767 = vmatmul.mubr.bf16.vlgmr.msra.gmra.mrb[44].mxu1 %v17093_v36 }
 0x66e   : > { %13770 = vmatprep.mubr.bf16.mxu1 %v17100_v44 }
 0x675   : > { %13771 = vmatmul.mubr.bf16.gmra.mrb[48].mxu1 %v17113_v56 }
 0x676   : > { %13774 = vmatprep.mubr.bf16.mxu1 %v17120_v29 }
 0x67d   : > { %13775 = vmatmul.mubr.bf16.gmra.mrb[52].mxu1 %v17133_v28 }
 0x67e   : > { %13778 = vmatprep.mubr.bf16.mxu1 %v17140_v27 }
 0x685   : > { %13779 = vmatmul.mubr.bf16.gmra.mrb[56].mxu1 %v17150_v7 }
 0x686   : > { %13782 = vmatprep.mubr.bf16.mxu1 %v17157_v16 }
 0x68d   : > { %13783 = vmatmul.mubr.bf16.gmra.mrb[60].mxu1 %v17164_v14  ;;  %v17427_v14 = vld [vmem:[%s17542_s11] ss:$0 sm:$0xff] }
 0x68e   : > { %13786 = vmatprep.mubr.bf16.mxu1 %v17171_v55 }
 0x695   : > { %13787 = vmatmul.mubr.bf16.gmra.mrb[64].mxu1 %v17175_v60 }
 0x696   : > { %13790 = vmatprep.mubr.bf16.mxu1 %v17179_v1 }
 0x69d   : > { %13791 = vmatmul.mubr.bf16.gmra.mrb[68].mxu1 %v17184_v18 }
 0x69e   : > { %13794 = vmatprep.mubr.bf16.mxu1 %v17319_v47 }
 0x6a5   : > { %13795 = vmatmul.mubr.bf16.gmra.mrb[72].mxu1 %v16667_v52 }
 0x740   : > { %v13768_v53 = vpop.f32.mrb[44].mxu1 }
 0x741   : > { %v10599_v52 = vmul.f32 %v13768_v53, %v17427_v14  ;;  %v10335_v20 = vpop.f32.mrb[45].mxu1 }
 0x742   : > { %v10597_v26 = vmul.f32 %v17427_v14, %v10335_v20  ;;  %v13769_v34 = vpop.f32.mrb[46].mxu1 }
 0x743   : > { %v10638_v62 = vadd.f32 %v17432_v48, %v10599_v52  ;;  %v10600_v49 = vmul.f32 %v13769_v34, %v17427_v14  ;;  %v10338_v63 = vpop.f32.mrb[47].mxu1 }
 0x744   : > { %v10636_v37 = vadd.f32 %v17432_v48, %v10597_v26  ;;  %v10598_v30 = vmul.f32 %v17427_v14, %v10338_v63 }
 0x745   : > { %v10639_v6 = vadd.f32 %v17432_v48, %v10600_v49  ;;  %v10670_v50 = vmax.f32 %v10638_v62, 0.0 }
 0x746   : > { %v10637_v0 = vadd.f32 %v17432_v48, %v10598_v30  ;;  %v10668_v44 = vmax.f32 %v10636_v37, 0.0 }
 0x747   : > { %v10671_v36 = vmax.f32 %v10639_v6, 0.0 }
 0x748   : > { %v10669_v56 = vmax.f32 %v10637_v0, 0.0  ;;  %v13772_v29 = vpop.f32.mrb[48].mxu1 }
 0x749   : > { %v11848_v28 = vpack.c.bf16 %v10671_v36, %v10670_v50  ;;  %v10603_v27 = vmul.f32 %v13772_v29, %v17427_v14  ;;  %v10351_v7 = vpop.f32.mrb[49].mxu1 }
 0x74a   : > { %v11843_v16 = vpack.c.bf16 %v10669_v56, %v10668_v44  ;;  %v10865_v55 = vadd.f32 %v10669_v56, %v10668_v44  ;;  %v10601_v60 = vmul.f32 %v17427_v14, %v10351_v7  ;;  %v13773_v1 = vpop.f32.mrb[50].mxu1 }
 0x74b   : > { %11920 = vst [vmem:[%s17446_s17 + $0x8] sm:$0xff] %v11848_v28   ;;  %v10642_v18 = vadd.f32 %v17432_v48, %v10603_v27  ;;  %v10604_v38 = vmul.f32 %v13773_v1, %v17427_v14  ;;  %v10354_v4 = vpop.f32.mrb[51].mxu1 }
 0x74c   : > { %11844 = vst [vmem:[%s17446_s17] sm:$0xff] %v11843_v16   ;;  %v10866_v54 = vadd.f32 %v10865_v55, %v10670_v50  ;;  %v10640_v15 = vadd.f32 %v17432_v48, %v10601_v60  ;;  %v10602_v59 = vmul.f32 %v17427_v14, %v10354_v4 }
 0x74d   : > { %v10643_v40 = vadd.f32 %v17432_v48, %v10604_v38  ;;  %v10674_v41 = vmax.f32 %v10642_v18, 0.0 }
 0x74e   : > { %v10672_v61 = vmax.f32 %v10640_v15, 0.0  ;;  %v10867_v24 = vadd.f32 %v10866_v54, %v10671_v36  ;;  %v10641_v22 = vadd.f32 %v17432_v48, %v10602_v59 }
 0x74f   : > { %v10675_v17 = vmax.f32 %v10643_v40, 0.0 }
 0x750   : > { %v10868_v58 = vadd.f32 %v10867_v24, %v10672_v61  ;;  %v10673_v57 = vmax.f32 %v10641_v22, 0.0  ;;  %v13776_v42 = vpop.f32.mrb[52].mxu1 }
 0x751   : > { %v11858_v2 = vpack.c.bf16 %v10675_v17, %v10674_v41  ;;  %v10607_v3 = vmul.f32 %v13776_v42, %v17427_v14  ;;  %v10367_v31 = vpop.f32.mrb[53].mxu1 }
 0x752   : > { %v11853_v47 = vpack.c.bf16 %v10673_v57, %v10672_v61  ;;  %v10869_v10 = vadd.f32 %v10868_v58, %v10673_v57  ;;  %v10605_v5 = vmul.f32 %v17427_v14, %v10367_v31  ;;  %v13777_v19 = vpop.f32.mrb[54].mxu1 }
 0x753   : > { %11922 = vst [vmem:[%s17446_s17 + $0x18] sm:$0xff] %v11858_v2   ;;  %v10646_v39 = vadd.f32 %v17432_v48, %v10607_v3  ;;  %v10608_v9 = vmul.f32 %v13777_v19, %v17427_v14  ;;  %v10370_v35 = vpop.f32.mrb[55].mxu1 }
 0x754   : > { %11921 = vst [vmem:[%s17446_s17 + $0x10] sm:$0xff] %v11853_v47   ;;  %v10870_v46 = vadd.f32 %v10869_v10, %v10674_v41  ;;  %v10644_v32 = vadd.f32 %v17432_v48, %v10605_v5  ;;  %v10606_v13 = vmul.f32 %v17427_v14, %v10370_v35 }
 0x755   : > { %v10647_v51 = vadd.f32 %v17432_v48, %v10608_v9  ;;  %v10678_v11 = vmax.f32 %v10646_v39, 0.0 }
 0x756   : > { %v10676_v12 = vmax.f32 %v10644_v32, 0.0  ;;  %v10871_v21 = vadd.f32 %v10870_v46, %v10675_v17  ;;  %v10645_v43 = vadd.f32 %v17432_v48, %v10606_v13 }
 0x757   : > { %v10679_v45 = vmax.f32 %v10647_v51, 0.0 }
 0x758   : > { %v10872_v25 = vadd.f32 %v10871_v21, %v10676_v12  ;;  %v10677_v8 = vmax.f32 %v10645_v43, 0.0  ;;  %v13780_v23 = vpop.f32.mrb[56].mxu1 }
 0x759   : > { %v11868_v33 = vpack.c.bf16 %v10679_v45, %v10678_v11  ;;  %v10611_v53 = vmul.f32 %v13780_v23, %v17427_v14  ;;  %v10383_v52 = vpop.f32.mrb[57].mxu1 }
 0x75a   : > { %v11863_v20 = vpack.c.bf16 %v10677_v8, %v10676_v12  ;;  %v10873_v26 = vadd.f32 %v10872_v25, %v10677_v8  ;;  %v10609_v34 = vmul.f32 %v17427_v14, %v10383_v52  ;;  %v13781_v62 = vpop.f32.mrb[58].mxu1 }
 0x75b   : > { %11924 = vst [vmem:[%s17446_s17 + $0x28] sm:$0xff] %v11868_v33   ;;  %v10650_v49 = vadd.f32 %v17432_v48, %v10611_v53  ;;  %v10612_v63 = vmul.f32 %v13781_v62, %v17427_v14  ;;  %v10386_v37 = vpop.f32.mrb[59].mxu1 }
 0x75c   : > { %11923 = vst [vmem:[%s17446_s17 + $0x20] sm:$0xff] %v11863_v20   ;;  %v10874_v30 = vadd.f32 %v10873_v26, %v10678_v11  ;;  %v10648_v6 = vadd.f32 %v17432_v48, %v10609_v34  ;;  %v10610_v0 = vmul.f32 %v17427_v14, %v10386_v37 }
 0x75d   : > { %v10651_v50 = vadd.f32 %v17432_v48, %v10612_v63  ;;  %v10682_v29 = vmax.f32 %v10650_v49, 0.0 }
 0x75e   : > { %v10680_v36 = vmax.f32 %v10648_v6, 0.0  ;;  %v10875_v44 = vadd.f32 %v10874_v30, %v10679_v45  ;;  %v10649_v56 = vadd.f32 %v17432_v48, %v10610_v0 }
 0x75f   : > { %v10683_v28 = vmax.f32 %v10651_v50, 0.0 }
 0x760   : > { %v10876_v27 = vadd.f32 %v10875_v44, %v10680_v36  ;;  %v10681_v7 = vmax.f32 %v10649_v56, 0.0  ;;  %v13784_v16 = vpop.f32.mrb[60].mxu1 }
 0x761   : > { %v11878_v55 = vpack.c.bf16 %v10683_v28, %v10682_v29  ;;  %v10615_v60 = vmul.f32 %v13784_v16, %v17427_v14  ;;  %v10399_v1 = vpop.f32.mrb[61].mxu1 }
 0x762   : > { %v11873_v18 = vpack.c.bf16 %v10681_v7, %v10680_v36  ;;  %v10877_v38 = vadd.f32 %v10876_v27, %v10681_v7  ;;  %v10613_v4 = vmul.f32 %v17427_v14, %v10399_v1  ;;  %v13785_v54 = vpop.f32.mrb[62].mxu1 }
 0x763   : > { %11926 = vst [vmem:[%s17446_s17 + $0x38] sm:$0xff] %v11878_v55   ;;  %v10654_v15 = vadd.f32 %v17432_v48, %v10615_v60  ;;  %v10616_v59 = vmul.f32 %v13785_v54, %v17427_v14  ;;  %v10402_v40 = vpop.f32.mrb[63].mxu1 }
 0x764   : > { %11925 = vst [vmem:[%s17446_s17 + $0x30] sm:$0xff] %v11873_v18   ;;  %v10878_v61 = vadd.f32 %v10877_v38, %v10682_v29  ;;  %v10652_v24 = vadd.f32 %v17432_v48, %v10613_v4  ;;  %v10614_v22 = vmul.f32 %v17427_v14, %v10402_v40 }
 0x765   : > { %v10655_v41 = vadd.f32 %v17432_v48, %v10616_v59  ;;  %v10686_v42 = vmax.f32 %v10654_v15, 0.0 }
 0x766   : > { %v10684_v17 = vmax.f32 %v10652_v24, 0.0  ;;  %v10879_v58 = vadd.f32 %v10878_v61, %v10683_v28  ;;  %v10653_v57 = vadd.f32 %v17432_v48, %v10614_v22 }
 0x767   : > { %v10687_v2 = vmax.f32 %v10655_v41, 0.0 }
 0x768   : > { %v10880_v3 = vadd.f32 %v10879_v58, %v10684_v17  ;;  %v10685_v31 = vmax.f32 %v10653_v57, 0.0  ;;  %v13788_v47 = vpop.f32.mrb[64].mxu1 }
 0x769   : > { %v11888_v10 = vpack.c.bf16 %v10687_v2, %v10686_v42  ;;  %v10619_v5 = vmul.f32 %v13788_v47, %v17427_v14  ;;  %v10415_v19 = vpop.f32.mrb[65].mxu1 }
 0x76a   : > { %v11883_v39 = vpack.c.bf16 %v10685_v31, %v10684_v17  ;;  %v10881_v9 = vadd.f32 %v10880_v3, %v10685_v31  ;;  %v10617_v35 = vmul.f32 %v17427_v14, %v10415_v19  ;;  %v13789_v46 = vpop.f32.mrb[66].mxu1 }
 0x76b   : > { %11928 = vst [vmem:[%s17446_s17 + $0x48] sm:$0xff] %v11888_v10   ;;  %v10658_v32 = vadd.f32 %v17432_v48, %v10619_v5  ;;  %v10620_v13 = vmul.f32 %v13789_v46, %v17427_v14  ;;  %v10418_v51 = vpop.f32.mrb[67].mxu1 }
 0x76c   : > { %11927 = vst [vmem:[%s17446_s17 + $0x40] sm:$0xff] %v11883_v39   ;;  %v10882_v12 = vadd.f32 %v10881_v9, %v10686_v42  ;;  %v10656_v21 = vadd.f32 %v17432_v48, %v10617_v35  ;;  %v10618_v43 = vmul.f32 %v17427_v14, %v10418_v51 }
 0x76d   : > { %v10659_v11 = vadd.f32 %v17432_v48, %v10620_v13  ;;  %v10690_v23 = vmax.f32 %v10658_v32, 0.0 }
 0x76e   : > { %v10688_v45 = vmax.f32 %v10656_v21, 0.0  ;;  %v10883_v25 = vadd.f32 %v10882_v12, %v10687_v2  ;;  %v10657_v8 = vadd.f32 %v17432_v48, %v10618_v43  ;;  %v10864_v43 = vld [vmem:[%s17421_s29] sm:$0x1] }
 0x76f   : > { %v10691_v33 = vmax.f32 %v10659_v11, 0.0 }
 0x770   : > { %v10884_v53 = vadd.f32 %v10883_v25, %v10688_v45  ;;  %v10689_v52 = vmax.f32 %v10657_v8, 0.0  ;;  %v13792_v20 = vpop.f32.mrb[68].mxu1 }
 0x771   : > { %v11898_v26 = vpack.c.bf16 %v10691_v33, %v10690_v23  ;;  %v10623_v34 = vmul.f32 %v13792_v20, %v17427_v14  ;;  %v10431_v62 = vpop.f32.mrb[69].mxu1 }
 0x772   : > { %v11893_v49 = vpack.c.bf16 %v10689_v52, %v10688_v45  ;;  %v10885_v63 = vadd.f32 %v10884_v53, %v10689_v52  ;;  %v10621_v37 = vmul.f32 %v17427_v14, %v10431_v62  ;;  %v13793_v30 = vpop.f32.mrb[70].mxu1 }
 0x773   : > { %11930 = vst [vmem:[%s17446_s17 + $0x58] sm:$0xff] %v11898_v26   ;;  %v10662_v6 = vadd.f32 %v17432_v48, %v10623_v34  ;;  %v10624_v0 = vmul.f32 %v13793_v30, %v17427_v14  ;;  %v10434_v50 = vpop.f32.mrb[71].mxu1 }
 0x774   : > { %11929 = vst [vmem:[%s17446_s17 + $0x50] sm:$0xff] %v11893_v49   ;;  %v10886_v36 = vadd.f32 %v10885_v63, %v10690_v23  ;;  %v10660_v44 = vadd.f32 %v17432_v48, %v10621_v37  ;;  %v10622_v56 = vmul.f32 %v17427_v14, %v10434_v50 }
 0x775   : > { %v10663_v29 = vadd.f32 %v17432_v48, %v10624_v0  ;;  %v10694_v16 = vmax.f32 %v10662_v6, 0.0 }
 0x776   : > { %v10692_v28 = vmax.f32 %v10660_v44, 0.0  ;;  %v10887_v27 = vadd.f32 %v10886_v36, %v10691_v33  ;;  %v10661_v7 = vadd.f32 %v17432_v48, %v10622_v56 }
 0x777   : > { %v10695_v55 = vmax.f32 %v10663_v29, 0.0 }
 0x778   : > { %v10888_v60 = vadd.f32 %v10887_v27, %v10692_v28  ;;  %v10693_v1 = vmax.f32 %v10661_v7, 0.0  ;;  %v13796_v18 = vpop.f32.mrb[72].mxu1 }
 0x779   : > { %v11908_v38 = vpack.c.bf16 %v10695_v55, %v10694_v16  ;;  %v10627_v4 = vmul.f32 %v13796_v18, %v17427_v14  ;;  %v10447_v54 = vpop.f32.mrb[73].mxu1 }
 0x77a   : > { %v11903_v15 = vpack.c.bf16 %v10693_v1, %v10692_v28  ;;  %v10889_v59 = vadd.f32 %v10888_v60, %v10693_v1  ;;  %v10625_v40 = vmul.f32 %v17427_v14, %v10447_v54  ;;  %v13797_v61 = vpop.f32.mrb[74].mxu1 }
 0x77b   : > { %11932 = vst [vmem:[%s17446_s17 + $0x68] sm:$0xff] %v11908_v38   ;;  %v10666_v24 = vadd.f32 %v17432_v48, %v10627_v4  ;;  %v10628_v22 = vmul.f32 %v13797_v61, %v17427_v14  ;;  %v10450_v41 = vpop.f32.mrb[75].mxu1 }
 0x77c   : > { %11931 = vst [vmem:[%s17446_s17 + $0x60] sm:$0xff] %v11903_v15   ;;  %v10890_v17 = vadd.f32 %v10889_v59, %v10694_v16  ;;  %v10664_v58 = vadd.f32 %v17432_v48, %v10625_v40  ;;  %v10626_v57 = vmul.f32 %v17427_v14, %v10450_v41 }
 0x77d   : > { %v10667_v42 = vadd.f32 %v17432_v48, %v10628_v22  ;;  %v10698_v47 = vmax.f32 %v10666_v24, 0.0 }
 0x77e   : > { %v10696_v2 = vmax.f32 %v10664_v58, 0.0  ;;  %v10891_v3 = vadd.f32 %v10890_v17, %v10695_v55  ;;  %v10665_v31 = vadd.f32 %v17432_v48, %v10626_v57 }
 0x77f   : > { %v10699_v10 = vmax.f32 %v10667_v42, 0.0 }
 0x780   : > { %v10892_v5 = vadd.f32 %v10891_v3, %v10696_v2  ;;  %v10697_v19 = vmax.f32 %v10665_v31, 0.0 }
 0x781   : > { %v11918_v39 = vpack.c.bf16 %v10699_v10, %v10698_v47 }
 0x782   : > { %v11913_v9 = vpack.c.bf16 %v10697_v19, %v10696_v2  ;;  %v10893_v35 = vadd.f32 %v10892_v5, %v10697_v19 }
 0x783   : > { %11934 = vst [vmem:[%s17446_s17 + $0x78] sm:$0xff] %v11918_v39  }
 0x784   : > { %11933 = vst [vmem:[%s17446_s17 + $0x70] sm:$0xff] %v11913_v9   ;;  %v10894_v46 = vadd.f32 %v10893_v35, %v10698_v47 }
 0x786   : > { %v10895_v32 = vadd.f32 %v10894_v46, %v10699_v10 }
 0x788   : > { %v10896_v14 = vrot.slane %v10895_v32, 4 }
 0x78a   : > { %v10897_v13 = vadd.f32 %v10896_v14, %v10895_v32 }
 0x78c   : > { %v10898_v51 = vrot.slane %v10897_v13, 2 }
 0x78e   : > { %v10899_v12 = vadd.f32 %v10898_v51, %v10897_v13 }
 0x790   : > { %v10900_v21 = vrot.slane %v10899_v12, 1 }
 0x792   : > { %v10901_v48 = vadd.f32 %v10900_v21, %v10899_v12 }
 0x794   : > { %v10902_v11 = vadd.f32 %v10901_v48, %v10864_v43 }
 0x796   : > { %10903 = vst [vmem:[%s17421_s29] sm:$0x1] %v10902_v11 }
 0x797 PF: > { %s25_s27 = sadd.s32 1, %s14929_s27   ;;  %s17807_s25 = smov %s14925_s26 }
 0x798   : > { %p22_p5 = scmp.ge.s32.totalorder %s25_s27, 4   ;;  %s17808_s26 = smov %s17810_s28 }
 0x79a   :  { %24 = sbr.rel (!%p22_p5) target bundleno = 2 (0x2), region = 157 }

</bundles_post_ra>
